<compile_context>
chip_gen: v5e
topology: v5e:2x2
jax: 0.10.0
libtpu: 0.0.40
codegen_flags: <defaults>
</compile_context>

<pallas_src>
import functools
import math

import jax
import jax.numpy as jnp
from jax.experimental import pallas as pl
from jax.experimental.pallas import tpu as pltpu

EPS = 1e-5                 # layer_norm_eps
_MM_DTYPE = jnp.bfloat16   # matmul-operand dtype (weights stored in this)
_NEG = -1e30


def _round_up(x, m):
    return -(-x // m) * m


def _layernorm(x, gamma, beta):
    # fp32 statistics; gamma/beta are (1, D) and broadcast over rows.
    mean = jnp.mean(x, axis=-1, keepdims=True)
    c = x - mean
    var = jnp.mean(c * c, axis=-1, keepdims=True)
    return c * jax.lax.rsqrt(var + EPS) * gamma + beta


# ---------------------------------------------------------------------------
# Whole-decoder kernel.  Grid = (batch_blocks, num_layers); layer axis inner.
# ---------------------------------------------------------------------------
def _decoder_kernel(*refs, nhead, bb, t_p, s_p):
    (x_ref, mem_ref, sab_ref, cab_ref,
     sa_lnq_g, sa_lnq_b, sa_lns_g, sa_lns_b,
     sa_wq, sa_bq, sa_wkv, sa_bkv, sa_wo, sa_bo,
     ca_lnq_g, ca_lnq_b,
     ca_wq, ca_bq, ca_wkv, ca_bkv, ca_wo, ca_bo,
     ff_ln_g, ff_ln_b, w1_ref, b1_ref, w2_ref, b2_ref,
     fin_g, fin_b,
     o_ref, saw_ref, caw_ref,
     q_scr, ctx_scr) = refs

    layer = pl.program_id(1)
    n_layers = pl.num_programs(1)
    D = x_ref.shape[-1]
    dh = D // nhead
    q_scale = 1.0 / math.sqrt(dh)
    M = bb * t_p
    N = bb * s_p

    @pl.when(layer == 0)
    def _():                                  # load the residual stream once
        q_scr[...] = x_ref[...].reshape(M, D)

    q = q_scr[...]                            # (M, D) fp32 running residual
    mem = mem_ref[...].reshape(N, D)          # (N, D) fp32

    def attend(q_norm, kv_src, bias, wq, bq, wkv, bkv, wo, bo, w_out_ref):
        # Projections on the flattened row blocks (fills the MXU's M axis).
        qp = (jnp.dot(q_norm.astype(_MM_DTYPE), wq[0],
                      preferred_element_type=jnp.float32) + bq[0]) * q_scale
        kvp = jnp.dot(kv_src.astype(_MM_DTYPE), wkv[0],
                      preferred_element_type=jnp.float32) + bkv[0]
        q3 = qp.reshape(bb, t_p, D)
        k3 = kvp[:, :D].reshape(bb, s_p, D)
        v3 = kvp[:, D:].reshape(bb, s_p, D)
        w_acc = None
        for h in range(nhead):                # static unroll over heads
            sl = slice(h * dh, (h + 1) * dh)
            # (bb, t_p, s_p) = batched q_h @ k_h^T, bf16 operands, fp32 acc.
            s = jax.lax.dot_general(
                q3[:, :, sl].astype(_MM_DTYPE), k3[:, :, sl].astype(_MM_DTYPE),
                (((2,), (2,)), ((0,), (0,))),
                preferred_element_type=jnp.float32)
            s = s + bias
            s = s - jnp.max(s, axis=-1, keepdims=True)
            e = jnp.exp(s)
            p = e * pl.reciprocal(jnp.sum(e, axis=-1, keepdims=True),
                                  approx=True)
            w_acc = p if w_acc is None else w_acc + p
            # context for this head straight into its lane offset (no concat)
            ctx_scr[:, :, sl] = jax.lax.dot_general(
                p.astype(_MM_DTYPE), v3[:, :, sl].astype(_MM_DTYPE),
                (((2,), (1,)), ((0,), (0,))),
                preferred_element_type=jnp.float32)
        # head-averaged map; output block is revisited across the layer axis,
        # so only the last layer's value is written back to HBM.
        w_out_ref[...] = w_acc * (1.0 / nhead)
        ctx = ctx_scr[...].reshape(M, D)
        return jnp.dot(ctx.astype(_MM_DTYPE), wo[0],
                       preferred_element_type=jnp.float32) + bo[0]

    # --- self ("query-stream") attention: Q = norm_q(q), K = V = norm_c(mem)
    qn = _layernorm(q, sa_lnq_g[0], sa_lnq_b[0])
    mn = _layernorm(mem, sa_lns_g[0], sa_lns_b[0])
    q = q + attend(qn, mn, sab_ref[...], sa_wq, sa_bq, sa_wkv, sa_bkv,
                   sa_wo, sa_bo, saw_ref)

    # --- cross attention: Q = norm1(q), K = V = mem (no src norm, no user mask)
    qn = _layernorm(q, ca_lnq_g[0], ca_lnq_b[0])
    q = q + attend(qn, mem, cab_ref[0], ca_wq, ca_bq, ca_wkv, ca_bkv,
                   ca_wo, ca_bo, caw_ref)

    # --- feed-forward: q + linear2(gelu(linear1(norm2(q))))
    n = _layernorm(q, ff_ln_g[0], ff_ln_b[0])
    h1 = jnp.dot(n.astype(_MM_DTYPE), w1_ref[0],
                 preferred_element_type=jnp.float32) + b1_ref[0]
    h1 = jax.nn.gelu(h1, approximate=True)    # tanh GELU (EUP); torch uses erf
    y = jnp.dot(h1.astype(_MM_DTYPE), w2_ref[0],
                preferred_element_type=jnp.float32) + b2_ref[0]
    q = q + y

    q_scr[...] = q                            # carry to the next layer

    @pl.when(layer == n_layers - 1)
    def _():                                  # decoder's final LayerNorm
        o_ref[...] = _layernorm(q, fin_g[0], fin_b[0]).reshape(bb, t_p, D)


# ---------------------------------------------------------------------------
# Wrapper: padding, mask -> additive bias, BlockSpecs, single pallas_call.
# ---------------------------------------------------------------------------
def _build_biases(B_p, B, T_p, T, S_p, S, query_mask, content_key_padding_mask):
    sa_bias = jnp.zeros((B_p, T_p, S_p), jnp.float32)
    ca_bias = jnp.zeros((1, 1, S_p), jnp.float32)
    if S_p > S:                                    # mask padded key positions
        pad = jnp.zeros((S_p,), jnp.float32).at[S:].set(_NEG)
        sa_bias = sa_bias + pad[None, None, :]
        ca_bias = ca_bias + pad[None, None, :]
    if query_mask is not None:                     # (T, S), True == masked
        qm = (jnp.where(query_mask, _NEG, 0.0)
              if query_mask.dtype == jnp.bool_
              else query_mask.astype(jnp.float32))
        sa_bias = sa_bias.at[:, :T, :S].add(qm[None, :, :])
    if content_key_padding_mask is not None:       # (B, S), True == masked
        km = (jnp.where(content_key_padding_mask, _NEG, 0.0)
              if content_key_padding_mask.dtype == jnp.bool_
              else content_key_padding_mask.astype(jnp.float32))
        sa_bias = sa_bias.at[:B, :, :S].add(km[:, None, :])
    return sa_bias, ca_bias


def decoder_forward(params, query, memory, query_mask=None, content_mask=None,
                    content_key_padding_mask=None, *, nhead):
    # content_mask unused: every layer runs with update_content=False.
    B, T, D = query.shape
    S = memory.shape[1]
    L = params["sa_wq"].shape[0]
    FF = params["w1"].shape[-1]
    assert D % nhead == 0

    T_p = _round_up(T, 8)          # sublane-aligned query rows
    S_p = _round_up(S, 128)        # lane-dense keys / attention-weight output
    # Batch block so projection / FFN matmuls see >= ~256 rows (fills the
    # 256-row MXU on v6e/v7x; >> the 128-row MXU on v5e). Blocks are evened
    # out so batch padding is minimal.
    bb_target = max(1, min(B, -(-256 // T_p)))
    grid_b = -(-B // bb_target)
    BB = -(-B // grid_b)
    B_p = grid_b * BB

    qpad = jnp.zeros((B_p, T_p, D), jnp.float32).at[:B, :T, :].set(
        query.astype(jnp.float32))
    mpad = jnp.zeros((B_p, S_p, D), jnp.float32).at[:B, :S, :].set(
        memory.astype(jnp.float32))
    sa_bias, ca_bias = _build_biases(B_p, B, T_p, T, S_p, S,
                                     query_mask, content_key_padding_mask)

    idx_b3 = lambda b, l: (b, 0, 0)   # per-batch-block, constant over layers
    idx_l3 = lambda b, l: (l, 0, 0)   # per-layer stacked parameters
    idx_c3 = lambda b, l: (0, 0, 0)   # fully constant

    args, in_specs = [], []

    def add(a, shape, idx):
        args.append(a)
        in_specs.append(pl.BlockSpec(shape, idx))

    add(qpad, (BB, T_p, D), idx_b3)
    add(mpad, (BB, S_p, D), idx_b3)
    add(sa_bias, (BB, T_p, S_p), idx_b3)
    add(ca_bias, (1, 1, S_p), idx_c3)
    add(params["sa_lnq_g"], (1, 1, D), idx_l3)       # norm_q
    add(params["sa_lnq_b"], (1, 1, D), idx_l3)
    add(params["sa_lns_g"], (1, 1, D), idx_l3)       # norm_c
    add(params["sa_lns_b"], (1, 1, D), idx_l3)
    add(params["sa_wq"], (1, D, D), idx_l3)
    add(params["sa_bq"], (1, 1, D), idx_l3)
    add(params["sa_wkv"], (1, D, 2 * D), idx_l3)
    add(params["sa_bkv"], (1, 1, 2 * D), idx_l3)
    add(params["sa_wo"], (1, D, D), idx_l3)
    add(params["sa_bo"], (1, 1, D), idx_l3)
    add(params["ca_lnq_g"], (1, 1, D), idx_l3)       # norm1
    add(params["ca_lnq_b"], (1, 1, D), idx_l3)
    add(params["ca_wq"], (1, D, D), idx_l3)
    add(params["ca_bq"], (1, 1, D), idx_l3)
    add(params["ca_wkv"], (1, D, 2 * D), idx_l3)
    add(params["ca_bkv"], (1, 1, 2 * D), idx_l3)
    add(params["ca_wo"], (1, D, D), idx_l3)
    add(params["ca_bo"], (1, 1, D), idx_l3)
    add(params["ff_ln_g"], (1, 1, D), idx_l3)        # norm2
    add(params["ff_ln_b"], (1, 1, D), idx_l3)
    # TODO(synk): w1/w2 are kept fully VMEM-resident per layer; add K/N tiling
    # if dim_feedforward ever exceeds the VMEM budget on v7x.
    add(params["w1"], (1, D, FF), idx_l3)
    add(params["b1"], (1, 1, FF), idx_l3)
    add(params["w2"], (1, FF, D), idx_l3)
    add(params["b2"], (1, 1, D), idx_l3)
    add(params["final_g"], (1, 1, D), idx_c3)
    add(params["final_b"], (1, 1, D), idx_c3)

    out_shape = (
        jax.ShapeDtypeStruct((B_p, T_p, D), jnp.float32),
        jax.ShapeDtypeStruct((B_p, T_p, S_p), jnp.float32),   # sa weights
        jax.ShapeDtypeStruct((B_p, T_p, S_p), jnp.float32),   # ca weights
    )
    out_specs = (
        pl.BlockSpec((BB, T_p, D), idx_b3),
        pl.BlockSpec((BB, T_p, S_p), idx_b3),
        pl.BlockSpec((BB, T_p, S_p), idx_b3),
    )

    kern = functools.partial(_decoder_kernel, nhead=nhead, bb=BB,
                             t_p=T_p, s_p=S_p)

    out, sa_w, ca_w = pl.pallas_call(
        kern,
        grid=(grid_b, L),
        out_shape=out_shape,
        in_specs=in_specs,
        out_specs=out_specs,
        scratch_shapes=[pltpu.VMEM((BB * T_p, D), jnp.float32),   # query carry
                        pltpu.VMEM((BB, T_p, D), jnp.float32)],   # ctx heads
        compiler_params=pltpu.CompilerParams(
            dimension_semantics=("parallel", "arbitrary"),
            vmem_limit_bytes=48 * 1024 * 1024),
    )(*args)

    return out[:B, :T, :], sa_w[:B, :T, :S], ca_w[:B, :T, :S]


# ---------------------------------------------------------------------------
# Pure-JAX reference (same parameter layout) for a correctness sanity check.
# ---------------------------------------------------------------------------
def reference_forward(params, query, memory, query_mask=None,
                      content_key_padding_mask=None, *, nhead):
    B, T, D = query.shape
    S = memory.shape[1]
    L = params["sa_wq"].shape[0]
    dh = D // nhead
    scale = 1.0 / math.sqrt(dh)

    bias = jnp.zeros((B, T, S), jnp.float32)
    if query_mask is not None:
        qm = (jnp.where(query_mask, _NEG, 0.0)
              if query_mask.dtype == jnp.bool_
              else query_mask.astype(jnp.float32))
        bias = bias + qm[None]
    if content_key_padding_mask is not None:
        km = (jnp.where(content_key_padding_mask, _NEG, 0.0)
              if content_key_padding_mask.dtype == jnp.bool_
              else content_key_padding_mask.astype(jnp.float32))
        bias = bias + km[:, None, :]

    def ln(x, g, b):
        m = jnp.mean(x, -1, keepdims=True)
        v = jnp.mean((x - m) ** 2, -1, keepdims=True)
        return (x - m) * jax.lax.rsqrt(v + EPS) * g + b

    def mha(xq, src, wq, bq, wkv, bkv, wo, bo, b_mask):
        q = (xq @ wq.astype(jnp.float32) + bq) * scale
        kv = src @ wkv.astype(jnp.float32) + bkv
        k, v = kv[..., :D], kv[..., D:]
        qh = q.reshape(B, T, nhead, dh)
        kh = k.reshape(B, S, nhead, dh)
        vh = v.reshape(B, S, nhead, dh)
        s = jnp.einsum('bthd,bshd->bhts', qh, kh)
        if b_mask is not None:
            s = s + b_mask[:, None]
        p = jax.nn.softmax(s, axis=-1)
        ctx = jnp.einsum('bhts,bshd->bthd', p, vh).reshape(B, T, D)
        return ctx @ wo.astype(jnp.float32) + bo, jnp.mean(p, axis=1)

    q = query.astype(jnp.float32)
    mem = memory.astype(jnp.float32)
    sa_w = ca_w = None
    for i in range(L):
        qn = ln(q, params["sa_lnq_g"][i, 0], params["sa_lnq_b"][i, 0])
        mn = ln(mem, params["sa_lns_g"][i, 0], params["sa_lns_b"][i, 0])
        o, sa_w = mha(qn, mn, params["sa_wq"][i], params["sa_bq"][i, 0],
                      params["sa_wkv"][i], params["sa_bkv"][i, 0],
                      params["sa_wo"][i], params["sa_bo"][i, 0], bias)
        q = q + o
        qn = ln(q, params["ca_lnq_g"][i, 0], params["ca_lnq_b"][i, 0])
        o, ca_w = mha(qn, mem, params["ca_wq"][i], params["ca_bq"][i, 0],
                      params["ca_wkv"][i], params["ca_bkv"][i, 0],
                      params["ca_wo"][i], params["ca_bo"][i, 0], None)
        q = q + o
        n = ln(q, params["ff_ln_g"][i, 0], params["ff_ln_b"][i, 0])
        h = jax.nn.gelu(n @ params["w1"][i].astype(jnp.float32)
                        + params["b1"][i, 0], approximate=True)
        q = q + h @ params["w2"][i].astype(jnp.float32) + params["b2"][i, 0]
    q = ln(q, params["final_g"][0, 0], params["final_b"][0, 0])
    return q, sa_w, ca_w


# ---------------------------------------------------------------------------
# Deterministic synthetic parameters (no checkpoint), stacked over layers.
# ---------------------------------------------------------------------------
def init_decoder_params(key, num_layers, d_model, dim_ff):
    L, D, FF = num_layers, d_model, dim_ff
    ks = jax.random.split(key, 16)

    def dense(k, *shape):
        return (jax.random.normal(k, shape, jnp.float32) * 0.02
                ).astype(_MM_DTYPE)

    def vec(k, *shape):
        return jax.random.normal(k, shape, jnp.float32) * 0.02

    ones = lambda *shape: jnp.ones(shape, jnp.float32)
    zeros = lambda *shape: jnp.zeros(shape, jnp.float32)

    return dict(
        sa_lnq_g=ones(L, 1, D), sa_lnq_b=zeros(L, 1, D),        # norm_q
        sa_lns_g=ones(L, 1, D), sa_lns_b=zeros(L, 1, D),        # norm_c
        sa_wq=dense(ks[0], L, D, D), sa_bq=vec(ks[1], L, 1, D),
        sa_wkv=dense(ks[2], L, D, 2 * D), sa_bkv=vec(ks[3], L, 1, 2 * D),
        sa_wo=dense(ks[4], L, D, D), sa_bo=vec(ks[5], L, 1, D),
        ca_lnq_g=ones(L, 1, D), ca_lnq_b=zeros(L, 1, D),        # norm1
        ca_wq=dense(ks[6], L, D, D), ca_bq=vec(ks[7], L, 1, D),
        ca_wkv=dense(ks[8], L, D, 2 * D), ca_bkv=vec(ks[9], L, 1, 2 * D),
        ca_wo=dense(ks[10], L, D, D), ca_bo=vec(ks[11], L, 1, D),
        ff_ln_g=ones(L, 1, D), ff_ln_b=zeros(L, 1, D),          # norm2
        w1=dense(ks[12], L, D, FF), b1=vec(ks[13], L, 1, FF),
        w2=dense(ks[14], L, FF, D), b2=vec(ks[15], L, 1, D),
        final_g=ones(1, 1, D), final_b=zeros(1, 1, D),
    )


if __name__ == "__main__":
    B, T, S, D, H, FF, L = 2, 8, 16, 32, 4, 64, 2   # small, consistent shapes
    key = jax.random.PRNGKey(0)
    kq, km, kp = jax.random.split(key, 3)
    query = jax.random.normal(kq, (B, T, D), jnp.float32)
    memory = jax.random.normal(km, (B, S, D), jnp.float32)
    params = init_decoder_params(kp, L, D, FF)
    # Causal-style bool mask (True == masked) to exercise the bias path.
    query_mask = jnp.triu(jnp.ones((T, S), jnp.bool_), k=1)

    fwd = jax.jit(functools.partial(decoder_forward, nhead=H))
    out, sa_w, ca_w = fwd(params, query, memory, query_mask)
    jax.block_until_ready((out, sa_w, ca_w))

    assert out.shape == (B, T, D)
    assert sa_w.shape == (B, T, S) and ca_w.shape == (B, T, S)
    assert bool(jnp.all(jnp.isfinite(out)))
    assert bool(jnp.all(jnp.isfinite(sa_w))) and bool(jnp.all(jnp.isfinite(ca_w)))

    ref_out, ref_sa, ref_ca = reference_forward(
        params, query, memory, query_mask, nhead=H)
    assert float(jnp.max(jnp.abs(out - ref_out))) < 3e-2
    assert float(jnp.max(jnp.abs(sa_w - ref_sa))) < 1e-2
    assert float(jnp.max(jnp.abs(ca_w - ref_ca))) < 1e-2
    print("KERNEL_OK")
</pallas_src>

<mosaic_0001>
module attributes {stable_mosaic.version = 11 : i64} {
  func.func @_decoder_kernel(%arg0: i32, %arg1: i32, %arg2: memref<2x8x32xf32, #tpu.memory_space<vmem>>, %arg3: memref<2x128x32xf32, #tpu.memory_space<vmem>>, %arg4: memref<2x8x128xf32, #tpu.memory_space<vmem>>, %arg5: memref<1x1x128xf32, #tpu.memory_space<vmem>>, %arg6: memref<1x1x32xf32, #tpu.memory_space<vmem>>, %arg7: memref<1x1x32xf32, #tpu.memory_space<vmem>>, %arg8: memref<1x1x32xf32, #tpu.memory_space<vmem>>, %arg9: memref<1x1x32xf32, #tpu.memory_space<vmem>>, %arg10: memref<1x32x32xbf16, #tpu.memory_space<vmem>>, %arg11: memref<1x1x32xf32, #tpu.memory_space<vmem>>, %arg12: memref<1x32x64xbf16, #tpu.memory_space<vmem>>, %arg13: memref<1x1x64xf32, #tpu.memory_space<vmem>>, %arg14: memref<1x32x32xbf16, #tpu.memory_space<vmem>>, %arg15: memref<1x1x32xf32, #tpu.memory_space<vmem>>, %arg16: memref<1x1x32xf32, #tpu.memory_space<vmem>>, %arg17: memref<1x1x32xf32, #tpu.memory_space<vmem>>, %arg18: memref<1x32x32xbf16, #tpu.memory_space<vmem>>, %arg19: memref<1x1x32xf32, #tpu.memory_space<vmem>>, %arg20: memref<1x32x64xbf16, #tpu.memory_space<vmem>>, %arg21: memref<1x1x64xf32, #tpu.memory_space<vmem>>, %arg22: memref<1x32x32xbf16, #tpu.memory_space<vmem>>, %arg23: memref<1x1x32xf32, #tpu.memory_space<vmem>>, %arg24: memref<1x1x32xf32, #tpu.memory_space<vmem>>, %arg25: memref<1x1x32xf32, #tpu.memory_space<vmem>>, %arg26: memref<1x32x64xbf16, #tpu.memory_space<vmem>>, %arg27: memref<1x1x64xf32, #tpu.memory_space<vmem>>, %arg28: memref<1x64x32xbf16, #tpu.memory_space<vmem>>, %arg29: memref<1x1x32xf32, #tpu.memory_space<vmem>>, %arg30: memref<1x1x32xf32, #tpu.memory_space<vmem>>, %arg31: memref<1x1x32xf32, #tpu.memory_space<vmem>>, %arg32: memref<2x8x32xf32, #tpu.memory_space<vmem>>, %arg33: memref<2x8x128xf32, #tpu.memory_space<vmem>>, %arg34: memref<2x8x128xf32, #tpu.memory_space<vmem>>, %arg35: memref<16x32xf32, #tpu.memory_space<vmem>>, %arg36: memref<2x8x32xf32, #tpu.memory_space<vmem>>) attributes {dimension_semantics = [#tpu.dimension_semantics<parallel>, #tpu.dimension_semantics<arbitrary>], iteration_bounds = array<i64: 1, 2>, scalar_prefetch = 0 : i64, scratch_operands = 2 : i64, tpu.core_type = #tpu.core_type<tc>, window_params = [{transform_indices = @transform_0, window_bounds = array<i64: 2, 8, 32>}, {transform_indices = @transform_1, window_bounds = array<i64: 2, 128, 32>}, {transform_indices = @transform_2, window_bounds = array<i64: 2, 8, 128>}, {pipeline_mode = #tpu.pipeline_mode<synchronous>, transform_indices = @transform_3, window_bounds = array<i64: 1, 1, 128>}, {transform_indices = @transform_4, window_bounds = array<i64: 1, 1, 32>}, {transform_indices = @transform_5, window_bounds = array<i64: 1, 1, 32>}, {transform_indices = @transform_6, window_bounds = array<i64: 1, 1, 32>}, {transform_indices = @transform_7, window_bounds = array<i64: 1, 1, 32>}, {transform_indices = @transform_8, window_bounds = array<i64: 1, 32, 32>}, {transform_indices = @transform_9, window_bounds = array<i64: 1, 1, 32>}, {transform_indices = @transform_10, window_bounds = array<i64: 1, 32, 64>}, {transform_indices = @transform_11, window_bounds = array<i64: 1, 1, 64>}, {transform_indices = @transform_12, window_bounds = array<i64: 1, 32, 32>}, {transform_indices = @transform_13, window_bounds = array<i64: 1, 1, 32>}, {transform_indices = @transform_14, window_bounds = array<i64: 1, 1, 32>}, {transform_indices = @transform_15, window_bounds = array<i64: 1, 1, 32>}, {transform_indices = @transform_16, window_bounds = array<i64: 1, 32, 32>}, {transform_indices = @transform_17, window_bounds = array<i64: 1, 1, 32>}, {transform_indices = @transform_18, window_bounds = array<i64: 1, 32, 64>}, {transform_indices = @transform_19, window_bounds = array<i64: 1, 1, 64>}, {transform_indices = @transform_20, window_bounds = array<i64: 1, 32, 32>}, {transform_indices = @transform_21, window_bounds = array<i64: 1, 1, 32>}, {transform_indices = @transform_22, window_bounds = array<i64: 1, 1, 32>}, {transform_indices = @transform_23, window_bounds = array<i64: 1, 1, 32>}, {transform_indices = @transform_24, window_bounds = array<i64: 1, 32, 64>}, {transform_indices = @transform_25, window_bounds = array<i64: 1, 1, 64>}, {transform_indices = @transform_26, window_bounds = array<i64: 1, 64, 32>}, {transform_indices = @transform_27, window_bounds = array<i64: 1, 1, 32>}, {pipeline_mode = #tpu.pipeline_mode<synchronous>, transform_indices = @transform_28, window_bounds = array<i64: 1, 1, 32>}, {pipeline_mode = #tpu.pipeline_mode<synchronous>, transform_indices = @transform_29, window_bounds = array<i64: 1, 1, 32>}, {transform_indices = @transform_30, window_bounds = array<i64: 2, 8, 32>}, {transform_indices = @transform_31, window_bounds = array<i64: 2, 8, 128>}, {transform_indices = @transform_32, window_bounds = array<i64: 2, 8, 128>}]} {
    %c0_i32 = arith.constant 0 : i32
    %0 = arith.cmpi eq, %arg1, %c0_i32 : i32
    %1 = arith.extui %0 : i1 to i32
    %c0_i32_0 = arith.constant 0 : i32
    %2 = arith.cmpi ne, %1, %c0_i32_0 : i32
    scf.if %2 {
      %c0_186 = arith.constant 0 : index
      %c0_187 = arith.constant 0 : index
      %c0_188 = arith.constant 0 : index
      %395 = vector.load %arg2[%c0_186, %c0_187, %c0_188] : memref<2x8x32xf32, #tpu.memory_space<vmem>>, vector<2x8x32xf32>
      %396 = vector.shape_cast %395 : vector<2x8x32xf32> to vector<16x32xf32>
      %c0_189 = arith.constant 0 : index
      %c0_190 = arith.constant 0 : index
      %397 = vector.load %arg35[%c0_189, %c0_190] : memref<16x32xf32, #tpu.memory_space<vmem>>, vector<16x32xf32>
      tpu.vector_store %arg35[%c0_189, %c0_190], %396 {strides = array<i32>} : memref<16x32xf32, #tpu.memory_space<vmem>>, vector<16x32xf32>,
    } else {
    }
    %c0 = arith.constant 0 : index
    %c0_1 = arith.constant 0 : index
    %3 = vector.load %arg35[%c0, %c0_1] : memref<16x32xf32, #tpu.memory_space<vmem>>, vector<16x32xf32>
    %c0_2 = arith.constant 0 : index
    %c0_3 = arith.constant 0 : index
    %c0_4 = arith.constant 0 : index
    %4 = vector.load %arg3[%c0_2, %c0_3, %c0_4] : memref<2x128x32xf32, #tpu.memory_space<vmem>>, vector<2x128x32xf32>
    %5 = vector.shape_cast %4 : vector<2x128x32xf32> to vector<256x32xf32>
    %c0_5 = arith.constant 0 : index
    %c0_6 = arith.constant 0 : index
    %c0_7 = arith.constant 0 : index
    %6 = vector.load %arg6[%c0_5, %c0_6, %c0_7] : memref<1x1x32xf32, #tpu.memory_space<vmem>>, vector<1x1x32xf32>
    %7 = vector.shape_cast %6 : vector<1x1x32xf32> to vector<1x32xf32>
    %c0_8 = arith.constant 0 : index
    %c0_9 = arith.constant 0 : index
    %c0_10 = arith.constant 0 : index
    %8 = vector.load %arg7[%c0_8, %c0_9, %c0_10] : memref<1x1x32xf32, #tpu.memory_space<vmem>>, vector<1x1x32xf32>
    %9 = vector.shape_cast %8 : vector<1x1x32xf32> to vector<1x32xf32>
    %cst = arith.constant dense<0.000000e+00> : vector<16xf32>
    %10 = vector.multi_reduction <add>, %3, %cst [1] : vector<16x32xf32> to vector<16xf32>
    %11 = vector.shape_cast %10 : vector<16xf32> to vector<16x1xf32>
    %cst_11 = arith.constant 3.200000e+01 : f32
    %12 = vector.broadcast %cst_11 : f32 to vector<16x1xf32>
    %13 = arith.divf %11, %12 : vector<16x1xf32>
    %14 = vector.broadcast %13 : vector<16x1xf32> to vector<16x32xf32>
    %15 = arith.subf %3, %14 : vector<16x32xf32>
    %16 = arith.mulf %15, %15 : vector<16x32xf32>
    %cst_12 = arith.constant dense<0.000000e+00> : vector<16xf32>
    %17 = vector.multi_reduction <add>, %16, %cst_12 [1] : vector<16x32xf32> to vector<16xf32>
    %18 = vector.shape_cast %17 : vector<16xf32> to vector<16x1xf32>
    %cst_13 = arith.constant 3.200000e+01 : f32
    %19 = vector.broadcast %cst_13 : f32 to vector<16x1xf32>
    %20 = arith.divf %18, %19 : vector<16x1xf32>
    %cst_14 = arith.constant 9.99999974E-6 : f32
    %21 = vector.broadcast %cst_14 : f32 to vector<16x1xf32>
    %22 = arith.addf %20, %21 : vector<16x1xf32>
    %23 = math.rsqrt %22 : vector<16x1xf32>
    %24 = vector.broadcast %23 : vector<16x1xf32> to vector<16x32xf32>
    %25 = arith.mulf %15, %24 : vector<16x32xf32>
    %26 = vector.broadcast %7 : vector<1x32xf32> to vector<16x32xf32>
    %27 = arith.mulf %25, %26 : vector<16x32xf32>
    %28 = vector.broadcast %9 : vector<1x32xf32> to vector<16x32xf32>
    %29 = arith.addf %27, %28 : vector<16x32xf32>
    %c0_15 = arith.constant 0 : index
    %c0_16 = arith.constant 0 : index
    %c0_17 = arith.constant 0 : index
    %30 = vector.load %arg8[%c0_15, %c0_16, %c0_17] : memref<1x1x32xf32, #tpu.memory_space<vmem>>, vector<1x1x32xf32>
    %31 = vector.shape_cast %30 : vector<1x1x32xf32> to vector<1x32xf32>
    %c0_18 = arith.constant 0 : index
    %c0_19 = arith.constant 0 : index
    %c0_20 = arith.constant 0 : index
    %32 = vector.load %arg9[%c0_18, %c0_19, %c0_20] : memref<1x1x32xf32, #tpu.memory_space<vmem>>, vector<1x1x32xf32>
    %33 = vector.shape_cast %32 : vector<1x1x32xf32> to vector<1x32xf32>
    %cst_21 = arith.constant dense<0.000000e+00> : vector<256xf32>
    %34 = vector.multi_reduction <add>, %5, %cst_21 [1] : vector<256x32xf32> to vector<256xf32>
    %35 = vector.shape_cast %34 : vector<256xf32> to vector<256x1xf32>
    %cst_22 = arith.constant 3.200000e+01 : f32
    %36 = vector.broadcast %cst_22 : f32 to vector<256x1xf32>
    %37 = arith.divf %35, %36 : vector<256x1xf32>
    %38 = vector.broadcast %37 : vector<256x1xf32> to vector<256x32xf32>
    %39 = arith.subf %5, %38 : vector<256x32xf32>
    %40 = arith.mulf %39, %39 : vector<256x32xf32>
    %cst_23 = arith.constant dense<0.000000e+00> : vector<256xf32>
    %41 = vector.multi_reduction <add>, %40, %cst_23 [1] : vector<256x32xf32> to vector<256xf32>
    %42 = vector.shape_cast %41 : vector<256xf32> to vector<256x1xf32>
    %cst_24 = arith.constant 3.200000e+01 : f32
    %43 = vector.broadcast %cst_24 : f32 to vector<256x1xf32>
    %44 = arith.divf %42, %43 : vector<256x1xf32>
    %cst_25 = arith.constant 9.99999974E-6 : f32
    %45 = vector.broadcast %cst_25 : f32 to vector<256x1xf32>
    %46 = arith.addf %44, %45 : vector<256x1xf32>
    %47 = math.rsqrt %46 : vector<256x1xf32>
    %48 = vector.broadcast %47 : vector<256x1xf32> to vector<256x32xf32>
    %49 = arith.mulf %39, %48 : vector<256x32xf32>
    %50 = vector.broadcast %31 : vector<1x32xf32> to vector<256x32xf32>
    %51 = arith.mulf %49, %50 : vector<256x32xf32>
    %52 = vector.broadcast %33 : vector<1x32xf32> to vector<256x32xf32>
    %53 = arith.addf %51, %52 : vector<256x32xf32>
    %c0_26 = arith.constant 0 : index
    %c0_27 = arith.constant 0 : index
    %c0_28 = arith.constant 0 : index
    %54 = vector.load %arg4[%c0_26, %c0_27, %c0_28] : memref<2x8x128xf32, #tpu.memory_space<vmem>>, vector<2x8x128xf32>
    %55 = arith.truncf %29 : vector<16x32xf32> to vector<16x32xbf16>
    %c0_29 = arith.constant 0 : index
    %c0_30 = arith.constant 0 : index
    %c0_31 = arith.constant 0 : index
    %56 = vector.load %arg10[%c0_29, %c0_30, %c0_31] : memref<1x32x32xbf16, #tpu.memory_space<vmem>>, vector<1x32x32xbf16>
    %57 = vector.shape_cast %56 : vector<1x32x32xbf16> to vector<32x32xbf16>
    %cst_32 = arith.constant dense<0.000000e+00> : vector<16x32xf32>
    %58 = tpu.matmul %55, %57, %cst_32 {dimension_numbers = #tpu.dot_dimension_numbers<[1], [0], [0], [1], [0, 0, 1, 1], [], []>} : vector<16x32xbf16>, vector<32x32xbf16>, vector<16x32xf32> -> vector<16x32xf32>
    %c0_33 = arith.constant 0 : index
    %c0_34 = arith.constant 0 : index
    %c0_35 = arith.constant 0 : index
    %59 = vector.load %arg11[%c0_33, %c0_34, %c0_35] : memref<1x1x32xf32, #tpu.memory_space<vmem>>, vector<1x1x32xf32>
    %60 = vector.shape_cast %59 : vector<1x1x32xf32> to vector<1x32xf32>
    %61 = vector.broadcast %60 : vector<1x32xf32> to vector<16x32xf32>
    %62 = arith.addf %58, %61 : vector<16x32xf32>
    %cst_36 = arith.constant 0.353553385 : f32
    %63 = vector.broadcast %cst_36 : f32 to vector<16x32xf32>
    %64 = arith.mulf %62, %63 : vector<16x32xf32>
    %65 = arith.truncf %53 : vector<256x32xf32> to vector<256x32xbf16>
    %c0_37 = arith.constant 0 : index
    %c0_38 = arith.constant 0 : index
    %c0_39 = arith.constant 0 : index
    %66 = vector.load %arg12[%c0_37, %c0_38, %c0_39] : memref<1x32x64xbf16, #tpu.memory_space<vmem>>, vector<1x32x64xbf16>
    %67 = vector.shape_cast %66 : vector<1x32x64xbf16> to vector<32x64xbf16>
    %cst_40 = arith.constant dense<0.000000e+00> : vector<256x64xf32>
    %68 = tpu.matmul %65, %67, %cst_40 {dimension_numbers = #tpu.dot_dimension_numbers<[1], [0], [0], [1], [0, 0, 1, 1], [], []>} : vector<256x32xbf16>, vector<32x64xbf16>, vector<256x64xf32> -> vector<256x64xf32>
    %c0_41 = arith.constant 0 : index
    %c0_42 = arith.constant 0 : index
    %c0_43 = arith.constant 0 : index
    %69 = vector.load %arg13[%c0_41, %c0_42, %c0_43] : memref<1x1x64xf32, #tpu.memory_space<vmem>>, vector<1x1x64xf32>
    %70 = vector.shape_cast %69 : vector<1x1x64xf32> to vector<1x64xf32>
    %71 = vector.broadcast %70 : vector<1x64xf32> to vector<256x64xf32>
    %72 = arith.addf %68, %71 : vector<256x64xf32>
    %73 = vector.shape_cast %64 : vector<16x32xf32> to vector<2x8x32xf32>
    %74 = vector.extract_strided_slice %72 {offsets = [0, 0], sizes = [256, 32], strides = [1, 1]} : vector<256x64xf32> to vector<256x32xf32>
    %75 = vector.shape_cast %74 : vector<256x32xf32> to vector<2x128x32xf32>
    %76 = vector.extract_strided_slice %72 {offsets = [0, 32], sizes = [256, 32], strides = [1, 1]} : vector<256x64xf32> to vector<256x32xf32>
    %77 = vector.shape_cast %76 : vector<256x32xf32> to vector<2x128x32xf32>
    %78 = vector.extract_strided_slice %73 {offsets = [0, 0, 0], sizes = [2, 8, 8], strides = [1, 1, 1]} : vector<2x8x32xf32> to vector<2x8x8xf32>
    %79 = arith.truncf %78 : vector<2x8x8xf32> to vector<2x8x8xbf16>
    %80 = vector.extract_strided_slice %75 {offsets = [0, 0, 0], sizes = [2, 128, 8], strides = [1, 1, 1]} : vector<2x128x32xf32> to vector<2x128x8xf32>
    %81 = arith.truncf %80 : vector<2x128x8xf32> to vector<2x128x8xbf16>
    %cst_44 = arith.constant dense<0.000000e+00> : vector<2x8x128xf32>
    %82 = tpu.matmul %79, %81, %cst_44 {dimension_numbers = #tpu.dot_dimension_numbers<[2], [2], [1], [1], [0, 0, 0, 1, 1, 1], [0], [0]>} : vector<2x8x8xbf16>, vector<2x128x8xbf16>, vector<2x8x128xf32> -> vector<2x8x128xf32>
    %83 = arith.addf %82, %54 : vector<2x8x128xf32>
    %cst_45 = arith.constant dense<0xFF800000> : vector<2x8xf32>
    %84 = vector.multi_reduction <maximumf>, %83, %cst_45 [2] : vector<2x8x128xf32> to vector<2x8xf32>
    %85 = vector.shape_cast %84 : vector<2x8xf32> to vector<2x8x1xf32>
    %86 = vector.broadcast %85 : vector<2x8x1xf32> to vector<2x8x128xf32>
    %87 = arith.subf %83, %86 : vector<2x8x128xf32>
    %88 = math.exp %87 : vector<2x8x128xf32>
    %cst_46 = arith.constant dense<0.000000e+00> : vector<2x8xf32>
    %89 = vector.multi_reduction <add>, %88, %cst_46 [2] : vector<2x8x128xf32> to vector<2x8xf32>
    %90 = vector.shape_cast %89 : vector<2x8xf32> to vector<2x8x1xf32>
    %91 = tpu.reciprocal %90 {approx = true} : vector<2x8x1xf32> -> vector<2x8x1xf32>
    %92 = vector.broadcast %91 : vector<2x8x1xf32> to vector<2x8x128xf32>
    %93 = arith.mulf %88, %92 : vector<2x8x128xf32>
    %94 = arith.truncf %93 : vector<2x8x128xf32> to vector<2x8x128xbf16>
    %95 = vector.extract_strided_slice %77 {offsets = [0, 0, 0], sizes = [2, 128, 8], strides = [1, 1, 1]} : vector<2x128x32xf32> to vector<2x128x8xf32>
    %96 = arith.truncf %95 : vector<2x128x8xf32> to vector<2x128x8xbf16>
    %cst_47 = arith.constant dense<0.000000e+00> : vector<2x8x8xf32>
    %97 = tpu.matmul %94, %96, %cst_47 {dimension_numbers = #tpu.dot_dimension_numbers<[2], [1], [1], [2], [0, 0, 0, 1, 1, 2], [0], [0]>} : vector<2x8x128xbf16>, vector<2x128x8xbf16>, vector<2x8x8xf32> -> vector<2x8x8xf32>
    %c0_48 = arith.constant 0 : index
    %c0_49 = arith.constant 0 : index
    %c0_50 = arith.constant 0 : index
    %98 = vector.load %arg36[%c0_48, %c0_49, %c0_50] : memref<2x8x32xf32, #tpu.memory_space<vmem>>, vector<2x8x8xf32>
    tpu.vector_store %arg36[%c0_48, %c0_49, %c0_50], %97 {strides = array<i32>} : memref<2x8x32xf32, #tpu.memory_space<vmem>>, vector<2x8x8xf32>,
    %99 = vector.extract_strided_slice %73 {offsets = [0, 0, 8], sizes = [2, 8, 8], strides = [1, 1, 1]} : vector<2x8x32xf32> to vector<2x8x8xf32>
    %100 = arith.truncf %99 : vector<2x8x8xf32> to vector<2x8x8xbf16>
    %101 = vector.extract_strided_slice %75 {offsets = [0, 0, 8], sizes = [2, 128, 8], strides = [1, 1, 1]} : vector<2x128x32xf32> to vector<2x128x8xf32>
    %102 = arith.truncf %101 : vector<2x128x8xf32> to vector<2x128x8xbf16>
    %cst_51 = arith.constant dense<0.000000e+00> : vector<2x8x128xf32>
    %103 = tpu.matmul %100, %102, %cst_51 {dimension_numbers = #tpu.dot_dimension_numbers<[2], [2], [1], [1], [0, 0, 0, 1, 1, 1], [0], [0]>} : vector<2x8x8xbf16>, vector<2x128x8xbf16>, vector<2x8x128xf32> -> vector<2x8x128xf32>
    %104 = arith.addf %103, %54 : vector<2x8x128xf32>
    %cst_52 = arith.constant dense<0xFF800000> : vector<2x8xf32>
    %105 = vector.multi_reduction <maximumf>, %104, %cst_52 [2] : vector<2x8x128xf32> to vector<2x8xf32>
    %106 = vector.shape_cast %105 : vector<2x8xf32> to vector<2x8x1xf32>
    %107 = vector.broadcast %106 : vector<2x8x1xf32> to vector<2x8x128xf32>
    %108 = arith.subf %104, %107 : vector<2x8x128xf32>
    %109 = math.exp %108 : vector<2x8x128xf32>
    %cst_53 = arith.constant dense<0.000000e+00> : vector<2x8xf32>
    %110 = vector.multi_reduction <add>, %109, %cst_53 [2] : vector<2x8x128xf32> to vector<2x8xf32>
    %111 = vector.shape_cast %110 : vector<2x8xf32> to vector<2x8x1xf32>
    %112 = tpu.reciprocal %111 {approx = true} : vector<2x8x1xf32> -> vector<2x8x1xf32>
    %113 = vector.broadcast %112 : vector<2x8x1xf32> to vector<2x8x128xf32>
    %114 = arith.mulf %109, %113 : vector<2x8x128xf32>
    %115 = arith.addf %93, %114 : vector<2x8x128xf32>
    %116 = arith.truncf %114 : vector<2x8x128xf32> to vector<2x8x128xbf16>
    %117 = vector.extract_strided_slice %77 {offsets = [0, 0, 8], sizes = [2, 128, 8], strides = [1, 1, 1]} : vector<2x128x32xf32> to vector<2x128x8xf32>
    %118 = arith.truncf %117 : vector<2x128x8xf32> to vector<2x128x8xbf16>
    %cst_54 = arith.constant dense<0.000000e+00> : vector<2x8x8xf32>
    %119 = tpu.matmul %116, %118, %cst_54 {dimension_numbers = #tpu.dot_dimension_numbers<[2], [1], [1], [2], [0, 0, 0, 1, 1, 2], [0], [0]>} : vector<2x8x128xbf16>, vector<2x128x8xbf16>, vector<2x8x8xf32> -> vector<2x8x8xf32>
    %c0_55 = arith.constant 0 : index
    %c0_56 = arith.constant 0 : index
    %c8 = arith.constant 8 : index
    %120 = vector.load %arg36[%c0_55, %c0_56, %c8] : memref<2x8x32xf32, #tpu.memory_space<vmem>>, vector<2x8x8xf32>
    tpu.vector_store %arg36[%c0_55, %c0_56, %c8], %119 {strides = array<i32>} : memref<2x8x32xf32, #tpu.memory_space<vmem>>, vector<2x8x8xf32>,
    %121 = vector.extract_strided_slice %73 {offsets = [0, 0, 16], sizes = [2, 8, 8], strides = [1, 1, 1]} : vector<2x8x32xf32> to vector<2x8x8xf32>
    %122 = arith.truncf %121 : vector<2x8x8xf32> to vector<2x8x8xbf16>
    %123 = vector.extract_strided_slice %75 {offsets = [0, 0, 16], sizes = [2, 128, 8], strides = [1, 1, 1]} : vector<2x128x32xf32> to vector<2x128x8xf32>
    %124 = arith.truncf %123 : vector<2x128x8xf32> to vector<2x128x8xbf16>
    %cst_57 = arith.constant dense<0.000000e+00> : vector<2x8x128xf32>
    %125 = tpu.matmul %122, %124, %cst_57 {dimension_numbers = #tpu.dot_dimension_numbers<[2], [2], [1], [1], [0, 0, 0, 1, 1, 1], [0], [0]>} : vector<2x8x8xbf16>, vector<2x128x8xbf16>, vector<2x8x128xf32> -> vector<2x8x128xf32>
    %126 = arith.addf %125, %54 : vector<2x8x128xf32>
    %cst_58 = arith.constant dense<0xFF800000> : vector<2x8xf32>
    %127 = vector.multi_reduction <maximumf>, %126, %cst_58 [2] : vector<2x8x128xf32> to vector<2x8xf32>
    %128 = vector.shape_cast %127 : vector<2x8xf32> to vector<2x8x1xf32>
    %129 = vector.broadcast %128 : vector<2x8x1xf32> to vector<2x8x128xf32>
    %130 = arith.subf %126, %129 : vector<2x8x128xf32>
    %131 = math.exp %130 : vector<2x8x128xf32>
    %cst_59 = arith.constant dense<0.000000e+00> : vector<2x8xf32>
    %132 = vector.multi_reduction <add>, %131, %cst_59 [2] : vector<2x8x128xf32> to vector<2x8xf32>
    %133 = vector.shape_cast %132 : vector<2x8xf32> to vector<2x8x1xf32>
    %134 = tpu.reciprocal %133 {approx = true} : vector<2x8x1xf32> -> vector<2x8x1xf32>
    %135 = vector.broadcast %134 : vector<2x8x1xf32> to vector<2x8x128xf32>
    %136 = arith.mulf %131, %135 : vector<2x8x128xf32>
    %137 = arith.addf %115, %136 : vector<2x8x128xf32>
    %138 = arith.truncf %136 : vector<2x8x128xf32> to vector<2x8x128xbf16>
    %139 = vector.extract_strided_slice %77 {offsets = [0, 0, 16], sizes = [2, 128, 8], strides = [1, 1, 1]} : vector<2x128x32xf32> to vector<2x128x8xf32>
    %140 = arith.truncf %139 : vector<2x128x8xf32> to vector<2x128x8xbf16>
    %cst_60 = arith.constant dense<0.000000e+00> : vector<2x8x8xf32>
    %141 = tpu.matmul %138, %140, %cst_60 {dimension_numbers = #tpu.dot_dimension_numbers<[2], [1], [1], [2], [0, 0, 0, 1, 1, 2], [0], [0]>} : vector<2x8x128xbf16>, vector<2x128x8xbf16>, vector<2x8x8xf32> -> vector<2x8x8xf32>
    %c0_61 = arith.constant 0 : index
    %c0_62 = arith.constant 0 : index
    %c16 = arith.constant 16 : index
    %142 = vector.load %arg36[%c0_61, %c0_62, %c16] : memref<2x8x32xf32, #tpu.memory_space<vmem>>, vector<2x8x8xf32>
    tpu.vector_store %arg36[%c0_61, %c0_62, %c16], %141 {strides = array<i32>} : memref<2x8x32xf32, #tpu.memory_space<vmem>>, vector<2x8x8xf32>,
    %143 = vector.extract_strided_slice %73 {offsets = [0, 0, 24], sizes = [2, 8, 8], strides = [1, 1, 1]} : vector<2x8x32xf32> to vector<2x8x8xf32>
    %144 = arith.truncf %143 : vector<2x8x8xf32> to vector<2x8x8xbf16>
    %145 = vector.extract_strided_slice %75 {offsets = [0, 0, 24], sizes = [2, 128, 8], strides = [1, 1, 1]} : vector<2x128x32xf32> to vector<2x128x8xf32>
    %146 = arith.truncf %145 : vector<2x128x8xf32> to vector<2x128x8xbf16>
    %cst_63 = arith.constant dense<0.000000e+00> : vector<2x8x128xf32>
    %147 = tpu.matmul %144, %146, %cst_63 {dimension_numbers = #tpu.dot_dimension_numbers<[2], [2], [1], [1], [0, 0, 0, 1, 1, 1], [0], [0]>} : vector<2x8x8xbf16>, vector<2x128x8xbf16>, vector<2x8x128xf32> -> vector<2x8x128xf32>
    %148 = arith.addf %147, %54 : vector<2x8x128xf32>
    %cst_64 = arith.constant dense<0xFF800000> : vector<2x8xf32>
    %149 = vector.multi_reduction <maximumf>, %148, %cst_64 [2] : vector<2x8x128xf32> to vector<2x8xf32>
    %150 = vector.shape_cast %149 : vector<2x8xf32> to vector<2x8x1xf32>
    %151 = vector.broadcast %150 : vector<2x8x1xf32> to vector<2x8x128xf32>
    %152 = arith.subf %148, %151 : vector<2x8x128xf32>
    %153 = math.exp %152 : vector<2x8x128xf32>
    %cst_65 = arith.constant dense<0.000000e+00> : vector<2x8xf32>
    %154 = vector.multi_reduction <add>, %153, %cst_65 [2] : vector<2x8x128xf32> to vector<2x8xf32>
    %155 = vector.shape_cast %154 : vector<2x8xf32> to vector<2x8x1xf32>
    %156 = tpu.reciprocal %155 {approx = true} : vector<2x8x1xf32> -> vector<2x8x1xf32>
    %157 = vector.broadcast %156 : vector<2x8x1xf32> to vector<2x8x128xf32>
    %158 = arith.mulf %153, %157 : vector<2x8x128xf32>
    %159 = arith.addf %137, %158 : vector<2x8x128xf32>
    %160 = arith.truncf %158 : vector<2x8x128xf32> to vector<2x8x128xbf16>
    %161 = vector.extract_strided_slice %77 {offsets = [0, 0, 24], sizes = [2, 128, 8], strides = [1, 1, 1]} : vector<2x128x32xf32> to vector<2x128x8xf32>
    %162 = arith.truncf %161 : vector<2x128x8xf32> to vector<2x128x8xbf16>
    %cst_66 = arith.constant dense<0.000000e+00> : vector<2x8x8xf32>
    %163 = tpu.matmul %160, %162, %cst_66 {dimension_numbers = #tpu.dot_dimension_numbers<[2], [1], [1], [2], [0, 0, 0, 1, 1, 2], [0], [0]>} : vector<2x8x128xbf16>, vector<2x128x8xbf16>, vector<2x8x8xf32> -> vector<2x8x8xf32>
    %c0_67 = arith.constant 0 : index
    %c0_68 = arith.constant 0 : index
    %c24 = arith.constant 24 : index
    %164 = vector.load %arg36[%c0_67, %c0_68, %c24] : memref<2x8x32xf32, #tpu.memory_space<vmem>>, vector<2x8x8xf32>
    tpu.vector_store %arg36[%c0_67, %c0_68, %c24], %163 {strides = array<i32>} : memref<2x8x32xf32, #tpu.memory_space<vmem>>, vector<2x8x8xf32>,
    %cst_69 = arith.constant 2.500000e-01 : f32
    %165 = vector.broadcast %cst_69 : f32 to vector<2x8x128xf32>
    %166 = arith.mulf %159, %165 : vector<2x8x128xf32>
    %c0_70 = arith.constant 0 : index
    %c0_71 = arith.constant 0 : index
    %c0_72 = arith.constant 0 : index
    %167 = vector.load %arg33[%c0_70, %c0_71, %c0_72] : memref<2x8x128xf32, #tpu.memory_space<vmem>>, vector<2x8x128xf32>
    tpu.vector_store %arg33[%c0_70, %c0_71, %c0_72], %166 {strides = array<i32>} : memref<2x8x128xf32, #tpu.memory_space<vmem>>, vector<2x8x128xf32>,
    %c0_73 = arith.constant 0 : index
    %c0_74 = arith.constant 0 : index
    %c0_75 = arith.constant 0 : index
    %168 = vector.load %arg36[%c0_73, %c0_74, %c0_75] : memref<2x8x32xf32, #tpu.memory_space<vmem>>, vector<2x8x32xf32>
    %169 = vector.shape_cast %168 : vector<2x8x32xf32> to vector<16x32xf32>
    %170 = arith.truncf %169 : vector<16x32xf32> to vector<16x32xbf16>
    %c0_76 = arith.constant 0 : index
    %c0_77 = arith.constant 0 : index
    %c0_78 = arith.constant 0 : index
    %171 = vector.load %arg14[%c0_76, %c0_77, %c0_78] : memref<1x32x32xbf16, #tpu.memory_space<vmem>>, vector<1x32x32xbf16>
    %172 = vector.shape_cast %171 : vector<1x32x32xbf16> to vector<32x32xbf16>
    %cst_79 = arith.constant dense<0.000000e+00> : vector<16x32xf32>
    %173 = tpu.matmul %170, %172, %cst_79 {dimension_numbers = #tpu.dot_dimension_numbers<[1], [0], [0], [1], [0, 0, 1, 1], [], []>} : vector<16x32xbf16>, vector<32x32xbf16>, vector<16x32xf32> -> vector<16x32xf32>
    %c0_80 = arith.constant 0 : index
    %c0_81 = arith.constant 0 : index
    %c0_82 = arith.constant 0 : index
    %174 = vector.load %arg15[%c0_80, %c0_81, %c0_82] : memref<1x1x32xf32, #tpu.memory_space<vmem>>, vector<1x1x32xf32>
    %175 = vector.shape_cast %174 : vector<1x1x32xf32> to vector<1x32xf32>
    %176 = vector.broadcast %175 : vector<1x32xf32> to vector<16x32xf32>
    %177 = arith.addf %173, %176 : vector<16x32xf32>
    %178 = arith.addf %3, %177 : vector<16x32xf32>
    %c0_83 = arith.constant 0 : index
    %c0_84 = arith.constant 0 : index
    %c0_85 = arith.constant 0 : index
    %179 = vector.load %arg16[%c0_83, %c0_84, %c0_85] : memref<1x1x32xf32, #tpu.memory_space<vmem>>, vector<1x1x32xf32>
    %180 = vector.shape_cast %179 : vector<1x1x32xf32> to vector<1x32xf32>
    %c0_86 = arith.constant 0 : index
    %c0_87 = arith.constant 0 : index
    %c0_88 = arith.constant 0 : index
    %181 = vector.load %arg17[%c0_86, %c0_87, %c0_88] : memref<1x1x32xf32, #tpu.memory_space<vmem>>, vector<1x1x32xf32>
    %182 = vector.shape_cast %181 : vector<1x1x32xf32> to vector<1x32xf32>
    %cst_89 = arith.constant dense<0.000000e+00> : vector<16xf32>
    %183 = vector.multi_reduction <add>, %178, %cst_89 [1] : vector<16x32xf32> to vector<16xf32>
    %184 = vector.shape_cast %183 : vector<16xf32> to vector<16x1xf32>
    %cst_90 = arith.constant 3.200000e+01 : f32
    %185 = vector.broadcast %cst_90 : f32 to vector<16x1xf32>
    %186 = arith.divf %184, %185 : vector<16x1xf32>
    %187 = vector.broadcast %186 : vector<16x1xf32> to vector<16x32xf32>
    %188 = arith.subf %178, %187 : vector<16x32xf32>
    %189 = arith.mulf %188, %188 : vector<16x32xf32>
    %cst_91 = arith.constant dense<0.000000e+00> : vector<16xf32>
    %190 = vector.multi_reduction <add>, %189, %cst_91 [1] : vector<16x32xf32> to vector<16xf32>
    %191 = vector.shape_cast %190 : vector<16xf32> to vector<16x1xf32>
    %cst_92 = arith.constant 3.200000e+01 : f32
    %192 = vector.broadcast %cst_92 : f32 to vector<16x1xf32>
    %193 = arith.divf %191, %192 : vector<16x1xf32>
    %cst_93 = arith.constant 9.99999974E-6 : f32
    %194 = vector.broadcast %cst_93 : f32 to vector<16x1xf32>
    %195 = arith.addf %193, %194 : vector<16x1xf32>
    %196 = math.rsqrt %195 : vector<16x1xf32>
    %197 = vector.broadcast %196 : vector<16x1xf32> to vector<16x32xf32>
    %198 = arith.mulf %188, %197 : vector<16x32xf32>
    %199 = vector.broadcast %180 : vector<1x32xf32> to vector<16x32xf32>
    %200 = arith.mulf %198, %199 : vector<16x32xf32>
    %201 = vector.broadcast %182 : vector<1x32xf32> to vector<16x32xf32>
    %202 = arith.addf %200, %201 : vector<16x32xf32>
    %c0_94 = arith.constant 0 : index
    %c0_95 = arith.constant 0 : index
    %c0_96 = arith.constant 0 : index
    %203 = vector.load %arg5[%c0_94, %c0_95, %c0_96] : memref<1x1x128xf32, #tpu.memory_space<vmem>>, vector<1x1x128xf32>
    %204 = vector.shape_cast %203 : vector<1x1x128xf32> to vector<1x128xf32>
    %205 = arith.truncf %202 : vector<16x32xf32> to vector<16x32xbf16>
    %c0_97 = arith.constant 0 : index
    %c0_98 = arith.constant 0 : index
    %c0_99 = arith.constant 0 : index
    %206 = vector.load %arg18[%c0_97, %c0_98, %c0_99] : memref<1x32x32xbf16, #tpu.memory_space<vmem>>, vector<1x32x32xbf16>
    %207 = vector.shape_cast %206 : vector<1x32x32xbf16> to vector<32x32xbf16>
    %cst_100 = arith.constant dense<0.000000e+00> : vector<16x32xf32>
    %208 = tpu.matmul %205, %207, %cst_100 {dimension_numbers = #tpu.dot_dimension_numbers<[1], [0], [0], [1], [0, 0, 1, 1], [], []>} : vector<16x32xbf16>, vector<32x32xbf16>, vector<16x32xf32> -> vector<16x32xf32>
    %c0_101 = arith.constant 0 : index
    %c0_102 = arith.constant 0 : index
    %c0_103 = arith.constant 0 : index
    %209 = vector.load %arg19[%c0_101, %c0_102, %c0_103] : memref<1x1x32xf32, #tpu.memory_space<vmem>>, vector<1x1x32xf32>
    %210 = vector.shape_cast %209 : vector<1x1x32xf32> to vector<1x32xf32>
    %211 = vector.broadcast %210 : vector<1x32xf32> to vector<16x32xf32>
    %212 = arith.addf %208, %211 : vector<16x32xf32>
    %cst_104 = arith.constant 0.353553385 : f32
    %213 = vector.broadcast %cst_104 : f32 to vector<16x32xf32>
    %214 = arith.mulf %212, %213 : vector<16x32xf32>
    %215 = arith.truncf %5 : vector<256x32xf32> to vector<256x32xbf16>
    %c0_105 = arith.constant 0 : index
    %c0_106 = arith.constant 0 : index
    %c0_107 = arith.constant 0 : index
    %216 = vector.load %arg20[%c0_105, %c0_106, %c0_107] : memref<1x32x64xbf16, #tpu.memory_space<vmem>>, vector<1x32x64xbf16>
    %217 = vector.shape_cast %216 : vector<1x32x64xbf16> to vector<32x64xbf16>
    %cst_108 = arith.constant dense<0.000000e+00> : vector<256x64xf32>
    %218 = tpu.matmul %215, %217, %cst_108 {dimension_numbers = #tpu.dot_dimension_numbers<[1], [0], [0], [1], [0, 0, 1, 1], [], []>} : vector<256x32xbf16>, vector<32x64xbf16>, vector<256x64xf32> -> vector<256x64xf32>
    %c0_109 = arith.constant 0 : index
    %c0_110 = arith.constant 0 : index
    %c0_111 = arith.constant 0 : index
    %219 = vector.load %arg21[%c0_109, %c0_110, %c0_111] : memref<1x1x64xf32, #tpu.memory_space<vmem>>, vector<1x1x64xf32>
    %220 = vector.shape_cast %219 : vector<1x1x64xf32> to vector<1x64xf32>
    %221 = vector.broadcast %220 : vector<1x64xf32> to vector<256x64xf32>
    %222 = arith.addf %218, %221 : vector<256x64xf32>
    %223 = vector.shape_cast %214 : vector<16x32xf32> to vector<2x8x32xf32>
    %224 = vector.extract_strided_slice %222 {offsets = [0, 0], sizes = [256, 32], strides = [1, 1]} : vector<256x64xf32> to vector<256x32xf32>
    %225 = vector.shape_cast %224 : vector<256x32xf32> to vector<2x128x32xf32>
    %226 = vector.extract_strided_slice %222 {offsets = [0, 32], sizes = [256, 32], strides = [1, 1]} : vector<256x64xf32> to vector<256x32xf32>
    %227 = vector.shape_cast %226 : vector<256x32xf32> to vector<2x128x32xf32>
    %228 = vector.extract_strided_slice %223 {offsets = [0, 0, 0], sizes = [2, 8, 8], strides = [1, 1, 1]} : vector<2x8x32xf32> to vector<2x8x8xf32>
    %229 = arith.truncf %228 : vector<2x8x8xf32> to vector<2x8x8xbf16>
    %230 = vector.extract_strided_slice %225 {offsets = [0, 0, 0], sizes = [2, 128, 8], strides = [1, 1, 1]} : vector<2x128x32xf32> to vector<2x128x8xf32>
    %231 = arith.truncf %230 : vector<2x128x8xf32> to vector<2x128x8xbf16>
    %cst_112 = arith.constant dense<0.000000e+00> : vector<2x8x128xf32>
    %232 = tpu.matmul %229, %231, %cst_112 {dimension_numbers = #tpu.dot_dimension_numbers<[2], [2], [1], [1], [0, 0, 0, 1, 1, 1], [0], [0]>} : vector<2x8x8xbf16>, vector<2x128x8xbf16>, vector<2x8x128xf32> -> vector<2x8x128xf32>
    %233 = vector.shape_cast %204 : vector<1x128xf32> to vector<1x1x128xf32>
    %234 = vector.broadcast %233 : vector<1x1x128xf32> to vector<2x8x128xf32>
    %235 = arith.addf %232, %234 : vector<2x8x128xf32>
    %cst_113 = arith.constant dense<0xFF800000> : vector<2x8xf32>
    %236 = vector.multi_reduction <maximumf>, %235, %cst_113 [2] : vector<2x8x128xf32> to vector<2x8xf32>
    %237 = vector.shape_cast %236 : vector<2x8xf32> to vector<2x8x1xf32>
    %238 = vector.broadcast %237 : vector<2x8x1xf32> to vector<2x8x128xf32>
    %239 = arith.subf %235, %238 : vector<2x8x128xf32>
    %240 = math.exp %239 : vector<2x8x128xf32>
    %cst_114 = arith.constant dense<0.000000e+00> : vector<2x8xf32>
    %241 = vector.multi_reduction <add>, %240, %cst_114 [2] : vector<2x8x128xf32> to vector<2x8xf32>
    %242 = vector.shape_cast %241 : vector<2x8xf32> to vector<2x8x1xf32>
    %243 = tpu.reciprocal %242 {approx = true} : vector<2x8x1xf32> -> vector<2x8x1xf32>
    %244 = vector.broadcast %243 : vector<2x8x1xf32> to vector<2x8x128xf32>
    %245 = arith.mulf %240, %244 : vector<2x8x128xf32>
    %246 = arith.truncf %245 : vector<2x8x128xf32> to vector<2x8x128xbf16>
    %247 = vector.extract_strided_slice %227 {offsets = [0, 0, 0], sizes = [2, 128, 8], strides = [1, 1, 1]} : vector<2x128x32xf32> to vector<2x128x8xf32>
    %248 = arith.truncf %247 : vector<2x128x8xf32> to vector<2x128x8xbf16>
    %cst_115 = arith.constant dense<0.000000e+00> : vector<2x8x8xf32>
    %249 = tpu.matmul %246, %248, %cst_115 {dimension_numbers = #tpu.dot_dimension_numbers<[2], [1], [1], [2], [0, 0, 0, 1, 1, 2], [0], [0]>} : vector<2x8x128xbf16>, vector<2x128x8xbf16>, vector<2x8x8xf32> -> vector<2x8x8xf32>
    %c0_116 = arith.constant 0 : index
    %c0_117 = arith.constant 0 : index
    %c0_118 = arith.constant 0 : index
    %250 = vector.load %arg36[%c0_116, %c0_117, %c0_118] : memref<2x8x32xf32, #tpu.memory_space<vmem>>, vector<2x8x8xf32>
    tpu.vector_store %arg36[%c0_116, %c0_117, %c0_118], %249 {strides = array<i32>} : memref<2x8x32xf32, #tpu.memory_space<vmem>>, vector<2x8x8xf32>,
    %251 = vector.extract_strided_slice %223 {offsets = [0, 0, 8], sizes = [2, 8, 8], strides = [1, 1, 1]} : vector<2x8x32xf32> to vector<2x8x8xf32>
    %252 = arith.truncf %251 : vector<2x8x8xf32> to vector<2x8x8xbf16>
    %253 = vector.extract_strided_slice %225 {offsets = [0, 0, 8], sizes = [2, 128, 8], strides = [1, 1, 1]} : vector<2x128x32xf32> to vector<2x128x8xf32>
    %254 = arith.truncf %253 : vector<2x128x8xf32> to vector<2x128x8xbf16>
    %cst_119 = arith.constant dense<0.000000e+00> : vector<2x8x128xf32>
    %255 = tpu.matmul %252, %254, %cst_119 {dimension_numbers = #tpu.dot_dimension_numbers<[2], [2], [1], [1], [0, 0, 0, 1, 1, 1], [0], [0]>} : vector<2x8x8xbf16>, vector<2x128x8xbf16>, vector<2x8x128xf32> -> vector<2x8x128xf32>
    %256 = vector.shape_cast %204 : vector<1x128xf32> to vector<1x1x128xf32>
    %257 = vector.broadcast %256 : vector<1x1x128xf32> to vector<2x8x128xf32>
    %258 = arith.addf %255, %257 : vector<2x8x128xf32>
    %cst_120 = arith.constant dense<0xFF800000> : vector<2x8xf32>
    %259 = vector.multi_reduction <maximumf>, %258, %cst_120 [2] : vector<2x8x128xf32> to vector<2x8xf32>
    %260 = vector.shape_cast %259 : vector<2x8xf32> to vector<2x8x1xf32>
    %261 = vector.broadcast %260 : vector<2x8x1xf32> to vector<2x8x128xf32>
    %262 = arith.subf %258, %261 : vector<2x8x128xf32>
    %263 = math.exp %262 : vector<2x8x128xf32>
    %cst_121 = arith.constant dense<0.000000e+00> : vector<2x8xf32>
    %264 = vector.multi_reduction <add>, %263, %cst_121 [2] : vector<2x8x128xf32> to vector<2x8xf32>
    %265 = vector.shape_cast %264 : vector<2x8xf32> to vector<2x8x1xf32>
    %266 = tpu.reciprocal %265 {approx = true} : vector<2x8x1xf32> -> vector<2x8x1xf32>
    %267 = vector.broadcast %266 : vector<2x8x1xf32> to vector<2x8x128xf32>
    %268 = arith.mulf %263, %267 : vector<2x8x128xf32>
    %269 = arith.addf %245, %268 : vector<2x8x128xf32>
    %270 = arith.truncf %268 : vector<2x8x128xf32> to vector<2x8x128xbf16>
    %271 = vector.extract_strided_slice %227 {offsets = [0, 0, 8], sizes = [2, 128, 8], strides = [1, 1, 1]} : vector<2x128x32xf32> to vector<2x128x8xf32>
    %272 = arith.truncf %271 : vector<2x128x8xf32> to vector<2x128x8xbf16>
    %cst_122 = arith.constant dense<0.000000e+00> : vector<2x8x8xf32>
    %273 = tpu.matmul %270, %272, %cst_122 {dimension_numbers = #tpu.dot_dimension_numbers<[2], [1], [1], [2], [0, 0, 0, 1, 1, 2], [0], [0]>} : vector<2x8x128xbf16>, vector<2x128x8xbf16>, vector<2x8x8xf32> -> vector<2x8x8xf32>
    %c0_123 = arith.constant 0 : index
    %c0_124 = arith.constant 0 : index
    %c8_125 = arith.constant 8 : index
    %274 = vector.load %arg36[%c0_123, %c0_124, %c8_125] : memref<2x8x32xf32, #tpu.memory_space<vmem>>, vector<2x8x8xf32>
    tpu.vector_store %arg36[%c0_123, %c0_124, %c8_125], %273 {strides = array<i32>} : memref<2x8x32xf32, #tpu.memory_space<vmem>>, vector<2x8x8xf32>,
    %275 = vector.extract_strided_slice %223 {offsets = [0, 0, 16], sizes = [2, 8, 8], strides = [1, 1, 1]} : vector<2x8x32xf32> to vector<2x8x8xf32>
    %276 = arith.truncf %275 : vector<2x8x8xf32> to vector<2x8x8xbf16>
    %277 = vector.extract_strided_slice %225 {offsets = [0, 0, 16], sizes = [2, 128, 8], strides = [1, 1, 1]} : vector<2x128x32xf32> to vector<2x128x8xf32>
    %278 = arith.truncf %277 : vector<2x128x8xf32> to vector<2x128x8xbf16>
    %cst_126 = arith.constant dense<0.000000e+00> : vector<2x8x128xf32>
    %279 = tpu.matmul %276, %278, %cst_126 {dimension_numbers = #tpu.dot_dimension_numbers<[2], [2], [1], [1], [0, 0, 0, 1, 1, 1], [0], [0]>} : vector<2x8x8xbf16>, vector<2x128x8xbf16>, vector<2x8x128xf32> -> vector<2x8x128xf32>
    %280 = vector.shape_cast %204 : vector<1x128xf32> to vector<1x1x128xf32>
    %281 = vector.broadcast %280 : vector<1x1x128xf32> to vector<2x8x128xf32>
    %282 = arith.addf %279, %281 : vector<2x8x128xf32>
    %cst_127 = arith.constant dense<0xFF800000> : vector<2x8xf32>
    %283 = vector.multi_reduction <maximumf>, %282, %cst_127 [2] : vector<2x8x128xf32> to vector<2x8xf32>
    %284 = vector.shape_cast %283 : vector<2x8xf32> to vector<2x8x1xf32>
    %285 = vector.broadcast %284 : vector<2x8x1xf32> to vector<2x8x128xf32>
    %286 = arith.subf %282, %285 : vector<2x8x128xf32>
    %287 = math.exp %286 : vector<2x8x128xf32>
    %cst_128 = arith.constant dense<0.000000e+00> : vector<2x8xf32>
    %288 = vector.multi_reduction <add>, %287, %cst_128 [2] : vector<2x8x128xf32> to vector<2x8xf32>
    %289 = vector.shape_cast %288 : vector<2x8xf32> to vector<2x8x1xf32>
    %290 = tpu.reciprocal %289 {approx = true} : vector<2x8x1xf32> -> vector<2x8x1xf32>
    %291 = vector.broadcast %290 : vector<2x8x1xf32> to vector<2x8x128xf32>
    %292 = arith.mulf %287, %291 : vector<2x8x128xf32>
    %293 = arith.addf %269, %292 : vector<2x8x128xf32>
    %294 = arith.truncf %292 : vector<2x8x128xf32> to vector<2x8x128xbf16>
    %295 = vector.extract_strided_slice %227 {offsets = [0, 0, 16], sizes = [2, 128, 8], strides = [1, 1, 1]} : vector<2x128x32xf32> to vector<2x128x8xf32>
    %296 = arith.truncf %295 : vector<2x128x8xf32> to vector<2x128x8xbf16>
    %cst_129 = arith.constant dense<0.000000e+00> : vector<2x8x8xf32>
    %297 = tpu.matmul %294, %296, %cst_129 {dimension_numbers = #tpu.dot_dimension_numbers<[2], [1], [1], [2], [0, 0, 0, 1, 1, 2], [0], [0]>} : vector<2x8x128xbf16>, vector<2x128x8xbf16>, vector<2x8x8xf32> -> vector<2x8x8xf32>
    %c0_130 = arith.constant 0 : index
    %c0_131 = arith.constant 0 : index
    %c16_132 = arith.constant 16 : index
    %298 = vector.load %arg36[%c0_130, %c0_131, %c16_132] : memref<2x8x32xf32, #tpu.memory_space<vmem>>, vector<2x8x8xf32>
    tpu.vector_store %arg36[%c0_130, %c0_131, %c16_132], %297 {strides = array<i32>} : memref<2x8x32xf32, #tpu.memory_space<vmem>>, vector<2x8x8xf32>,
    %299 = vector.extract_strided_slice %223 {offsets = [0, 0, 24], sizes = [2, 8, 8], strides = [1, 1, 1]} : vector<2x8x32xf32> to vector<2x8x8xf32>
    %300 = arith.truncf %299 : vector<2x8x8xf32> to vector<2x8x8xbf16>
    %301 = vector.extract_strided_slice %225 {offsets = [0, 0, 24], sizes = [2, 128, 8], strides = [1, 1, 1]} : vector<2x128x32xf32> to vector<2x128x8xf32>
    %302 = arith.truncf %301 : vector<2x128x8xf32> to vector<2x128x8xbf16>
    %cst_133 = arith.constant dense<0.000000e+00> : vector<2x8x128xf32>
    %303 = tpu.matmul %300, %302, %cst_133 {dimension_numbers = #tpu.dot_dimension_numbers<[2], [2], [1], [1], [0, 0, 0, 1, 1, 1], [0], [0]>} : vector<2x8x8xbf16>, vector<2x128x8xbf16>, vector<2x8x128xf32> -> vector<2x8x128xf32>
    %304 = vector.shape_cast %204 : vector<1x128xf32> to vector<1x1x128xf32>
    %305 = vector.broadcast %304 : vector<1x1x128xf32> to vector<2x8x128xf32>
    %306 = arith.addf %303, %305 : vector<2x8x128xf32>
    %cst_134 = arith.constant dense<0xFF800000> : vector<2x8xf32>
    %307 = vector.multi_reduction <maximumf>, %306, %cst_134 [2] : vector<2x8x128xf32> to vector<2x8xf32>
    %308 = vector.shape_cast %307 : vector<2x8xf32> to vector<2x8x1xf32>
    %309 = vector.broadcast %308 : vector<2x8x1xf32> to vector<2x8x128xf32>
    %310 = arith.subf %306, %309 : vector<2x8x128xf32>
    %311 = math.exp %310 : vector<2x8x128xf32>
    %cst_135 = arith.constant dense<0.000000e+00> : vector<2x8xf32>
    %312 = vector.multi_reduction <add>, %311, %cst_135 [2] : vector<2x8x128xf32> to vector<2x8xf32>
    %313 = vector.shape_cast %312 : vector<2x8xf32> to vector<2x8x1xf32>
    %314 = tpu.reciprocal %313 {approx = true} : vector<2x8x1xf32> -> vector<2x8x1xf32>
    %315 = vector.broadcast %314 : vector<2x8x1xf32> to vector<2x8x128xf32>
    %316 = arith.mulf %311, %315 : vector<2x8x128xf32>
    %317 = arith.addf %293, %316 : vector<2x8x128xf32>
    %318 = arith.truncf %316 : vector<2x8x128xf32> to vector<2x8x128xbf16>
    %319 = vector.extract_strided_slice %227 {offsets = [0, 0, 24], sizes = [2, 128, 8], strides = [1, 1, 1]} : vector<2x128x32xf32> to vector<2x128x8xf32>
    %320 = arith.truncf %319 : vector<2x128x8xf32> to vector<2x128x8xbf16>
    %cst_136 = arith.constant dense<0.000000e+00> : vector<2x8x8xf32>
    %321 = tpu.matmul %318, %320, %cst_136 {dimension_numbers = #tpu.dot_dimension_numbers<[2], [1], [1], [2], [0, 0, 0, 1, 1, 2], [0], [0]>} : vector<2x8x128xbf16>, vector<2x128x8xbf16>, vector<2x8x8xf32> -> vector<2x8x8xf32>
    %c0_137 = arith.constant 0 : index
    %c0_138 = arith.constant 0 : index
    %c24_139 = arith.constant 24 : index
    %322 = vector.load %arg36[%c0_137, %c0_138, %c24_139] : memref<2x8x32xf32, #tpu.memory_space<vmem>>, vector<2x8x8xf32>
    tpu.vector_store %arg36[%c0_137, %c0_138, %c24_139], %321 {strides = array<i32>} : memref<2x8x32xf32, #tpu.memory_space<vmem>>, vector<2x8x8xf32>,
    %cst_140 = arith.constant 2.500000e-01 : f32
    %323 = vector.broadcast %cst_140 : f32 to vector<2x8x128xf32>
    %324 = arith.mulf %317, %323 : vector<2x8x128xf32>
    %c0_141 = arith.constant 0 : index
    %c0_142 = arith.constant 0 : index
    %c0_143 = arith.constant 0 : index
    %325 = vector.load %arg34[%c0_141, %c0_142, %c0_143] : memref<2x8x128xf32, #tpu.memory_space<vmem>>, vector<2x8x128xf32>
    tpu.vector_store %arg34[%c0_141, %c0_142, %c0_143], %324 {strides = array<i32>} : memref<2x8x128xf32, #tpu.memory_space<vmem>>, vector<2x8x128xf32>,
    %c0_144 = arith.constant 0 : index
    %c0_145 = arith.constant 0 : index
    %c0_146 = arith.constant 0 : index
    %326 = vector.load %arg36[%c0_144, %c0_145, %c0_146] : memref<2x8x32xf32, #tpu.memory_space<vmem>>, vector<2x8x32xf32>
    %327 = vector.shape_cast %326 : vector<2x8x32xf32> to vector<16x32xf32>
    %328 = arith.truncf %327 : vector<16x32xf32> to vector<16x32xbf16>
    %c0_147 = arith.constant 0 : index
    %c0_148 = arith.constant 0 : index
    %c0_149 = arith.constant 0 : index
    %329 = vector.load %arg22[%c0_147, %c0_148, %c0_149] : memref<1x32x32xbf16, #tpu.memory_space<vmem>>, vector<1x32x32xbf16>
    %330 = vector.shape_cast %329 : vector<1x32x32xbf16> to vector<32x32xbf16>
    %cst_150 = arith.constant dense<0.000000e+00> : vector<16x32xf32>
    %331 = tpu.matmul %328, %330, %cst_150 {dimension_numbers = #tpu.dot_dimension_numbers<[1], [0], [0], [1], [0, 0, 1, 1], [], []>} : vector<16x32xbf16>, vector<32x32xbf16>, vector<16x32xf32> -> vector<16x32xf32>
    %c0_151 = arith.constant 0 : index
    %c0_152 = arith.constant 0 : index
    %c0_153 = arith.constant 0 : index
    %332 = vector.load %arg23[%c0_151, %c0_152, %c0_153] : memref<1x1x32xf32, #tpu.memory_space<vmem>>, vector<1x1x32xf32>
    %333 = vector.shape_cast %332 : vector<1x1x32xf32> to vector<1x32xf32>
    %334 = vector.broadcast %333 : vector<1x32xf32> to vector<16x32xf32>
    %335 = arith.addf %331, %334 : vector<16x32xf32>
    %336 = arith.addf %178, %335 : vector<16x32xf32>
    %c0_154 = arith.constant 0 : index
    %c0_155 = arith.constant 0 : index
    %c0_156 = arith.constant 0 : index
    %337 = vector.load %arg24[%c0_154, %c0_155, %c0_156] : memref<1x1x32xf32, #tpu.memory_space<vmem>>, vector<1x1x32xf32>
    %338 = vector.shape_cast %337 : vector<1x1x32xf32> to vector<1x32xf32>
    %c0_157 = arith.constant 0 : index
    %c0_158 = arith.constant 0 : index
    %c0_159 = arith.constant 0 : index
    %339 = vector.load %arg25[%c0_157, %c0_158, %c0_159] : memref<1x1x32xf32, #tpu.memory_space<vmem>>, vector<1x1x32xf32>
    %340 = vector.shape_cast %339 : vector<1x1x32xf32> to vector<1x32xf32>
    %cst_160 = arith.constant dense<0.000000e+00> : vector<16xf32>
    %341 = vector.multi_reduction <add>, %336, %cst_160 [1] : vector<16x32xf32> to vector<16xf32>
    %342 = vector.shape_cast %341 : vector<16xf32> to vector<16x1xf32>
    %cst_161 = arith.constant 3.200000e+01 : f32
    %343 = vector.broadcast %cst_161 : f32 to vector<16x1xf32>
    %344 = arith.divf %342, %343 : vector<16x1xf32>
    %345 = vector.broadcast %344 : vector<16x1xf32> to vector<16x32xf32>
    %346 = arith.subf %336, %345 : vector<16x32xf32>
    %347 = arith.mulf %346, %346 : vector<16x32xf32>
    %cst_162 = arith.constant dense<0.000000e+00> : vector<16xf32>
    %348 = vector.multi_reduction <add>, %347, %cst_162 [1] : vector<16x32xf32> to vector<16xf32>
    %349 = vector.shape_cast %348 : vector<16xf32> to vector<16x1xf32>
    %cst_163 = arith.constant 3.200000e+01 : f32
    %350 = vector.broadcast %cst_163 : f32 to vector<16x1xf32>
    %351 = arith.divf %349, %350 : vector<16x1xf32>
    %cst_164 = arith.constant 9.99999974E-6 : f32
    %352 = vector.broadcast %cst_164 : f32 to vector<16x1xf32>
    %353 = arith.addf %351, %352 : vector<16x1xf32>
    %354 = math.rsqrt %353 : vector<16x1xf32>
    %355 = vector.broadcast %354 : vector<16x1xf32> to vector<16x32xf32>
    %356 = arith.mulf %346, %355 : vector<16x32xf32>
    %357 = vector.broadcast %338 : vector<1x32xf32> to vector<16x32xf32>
    %358 = arith.mulf %356, %357 : vector<16x32xf32>
    %359 = vector.broadcast %340 : vector<1x32xf32> to vector<16x32xf32>
    %360 = arith.addf %358, %359 : vector<16x32xf32>
    %361 = arith.truncf %360 : vector<16x32xf32> to vector<16x32xbf16>
    %c0_165 = arith.constant 0 : index
    %c0_166 = arith.constant 0 : index
    %c0_167 = arith.constant 0 : index
    %362 = vector.load %arg26[%c0_165, %c0_166, %c0_167] : memref<1x32x64xbf16, #tpu.memory_space<vmem>>, vector<1x32x64xbf16>
    %363 = vector.shape_cast %362 : vector<1x32x64xbf16> to vector<32x64xbf16>
    %cst_168 = arith.constant dense<0.000000e+00> : vector<16x64xf32>
    %364 = tpu.matmul %361, %363, %cst_168 {dimension_numbers = #tpu.dot_dimension_numbers<[1], [0], [0], [1], [0, 0, 1, 1], [], []>} : vector<16x32xbf16>, vector<32x64xbf16>, vector<16x64xf32> -> vector<16x64xf32>
    %c0_169 = arith.constant 0 : index
    %c0_170 = arith.constant 0 : index
    %c0_171 = arith.constant 0 : index
    %365 = vector.load %arg27[%c0_169, %c0_170, %c0_171] : memref<1x1x64xf32, #tpu.memory_space<vmem>>, vector<1x1x64xf32>
    %366 = vector.shape_cast %365 : vector<1x1x64xf32> to vector<1x64xf32>
    %367 = vector.broadcast %366 : vector<1x64xf32> to vector<16x64xf32>
    %368 = arith.addf %364, %367 : vector<16x64xf32>
    %369 = arith.mulf %368, %368 : vector<16x64xf32>
    %370 = arith.mulf %368, %369 : vector<16x64xf32>
    %cst_172 = arith.constant 4.471500e-02 : f32
    %371 = vector.broadcast %cst_172 : f32 to vector<16x64xf32>
    %372 = arith.mulf %371, %370 : vector<16x64xf32>
    %373 = arith.addf %368, %372 : vector<16x64xf32>
    %cst_173 = arith.constant 0.797884583 : f32
    %374 = vector.broadcast %cst_173 : f32 to vector<16x64xf32>
    %375 = arith.mulf %374, %373 : vector<16x64xf32>
    %376 = math.tanh %375 : vector<16x64xf32>
    %cst_174 = arith.constant 1.000000e+00 : f32
    %377 = vector.broadcast %cst_174 : f32 to vector<16x64xf32>
    %378 = arith.addf %377, %376 : vector<16x64xf32>
    %cst_175 = arith.constant 5.000000e-01 : f32
    %379 = vector.broadcast %cst_175 : f32 to vector<16x64xf32>
    %380 = arith.mulf %379, %378 : vector<16x64xf32>
    %381 = arith.mulf %368, %380 : vector<16x64xf32>
    %382 = arith.truncf %381 : vector<16x64xf32> to vector<16x64xbf16>
    %c0_176 = arith.constant 0 : index
    %c0_177 = arith.constant 0 : index
    %c0_178 = arith.constant 0 : index
    %383 = vector.load %arg28[%c0_176, %c0_177, %c0_178] : memref<1x64x32xbf16, #tpu.memory_space<vmem>>, vector<1x64x32xbf16>
    %384 = vector.shape_cast %383 : vector<1x64x32xbf16> to vector<64x32xbf16>
    %cst_179 = arith.constant dense<0.000000e+00> : vector<16x32xf32>
    %385 = tpu.matmul %382, %384, %cst_179 {dimension_numbers = #tpu.dot_dimension_numbers<[1], [0], [0], [1], [0, 0, 1, 1], [], []>} : vector<16x64xbf16>, vector<64x32xbf16>, vector<16x32xf32> -> vector<16x32xf32>
    %c0_180 = arith.constant 0 : index
    %c0_181 = arith.constant 0 : index
    %c0_182 = arith.constant 0 : index
    %386 = vector.load %arg29[%c0_180, %c0_181, %c0_182] : memref<1x1x32xf32, #tpu.memory_space<vmem>>, vector<1x1x32xf32>
    %387 = vector.shape_cast %386 : vector<1x1x32xf32> to vector<1x32xf32>
    %388 = vector.broadcast %387 : vector<1x32xf32> to vector<16x32xf32>
    %389 = arith.addf %385, %388 : vector<16x32xf32>
    %390 = arith.addf %336, %389 : vector<16x32xf32>
    %c0_183 = arith.constant 0 : index
    %c0_184 = arith.constant 0 : index
    %391 = vector.load %arg35[%c0_183, %c0_184] : memref<16x32xf32, #tpu.memory_space<vmem>>, vector<16x32xf32>
    tpu.vector_store %arg35[%c0_183, %c0_184], %390 {strides = array<i32>} : memref<16x32xf32, #tpu.memory_space<vmem>>, vector<16x32xf32>,
    %c1_i32 = arith.constant 1 : i32
    %392 = arith.cmpi eq, %arg1, %c1_i32 : i32
    %393 = arith.extui %392 : i1 to i32
    %c0_i32_185 = arith.constant 0 : i32
    %394 = arith.cmpi ne, %393, %c0_i32_185 : i32
    scf.if %394 {
      %c0_186 = arith.constant 0 : index
      %c0_187 = arith.constant 0 : index
      %c0_188 = arith.constant 0 : index
      %395 = vector.load %arg30[%c0_186, %c0_187, %c0_188] : memref<1x1x32xf32, #tpu.memory_space<vmem>>, vector<1x1x32xf32>
      %396 = vector.shape_cast %395 : vector<1x1x32xf32> to vector<1x32xf32>
      %c0_189 = arith.constant 0 : index
      %c0_190 = arith.constant 0 : index
      %c0_191 = arith.constant 0 : index
      %397 = vector.load %arg31[%c0_189, %c0_190, %c0_191] : memref<1x1x32xf32, #tpu.memory_space<vmem>>, vector<1x1x32xf32>
      %398 = vector.shape_cast %397 : vector<1x1x32xf32> to vector<1x32xf32>
      %cst_192 = arith.constant dense<0.000000e+00> : vector<16xf32>
      %399 = vector.multi_reduction <add>, %390, %cst_192 [1] : vector<16x32xf32> to vector<16xf32>
      %400 = vector.shape_cast %399 : vector<16xf32> to vector<16x1xf32>
      %cst_193 = arith.constant 3.200000e+01 : f32
      %401 = vector.broadcast %cst_193 : f32 to vector<16x1xf32>
      %402 = arith.divf %400, %401 : vector<16x1xf32>
      %403 = vector.broadcast %402 : vector<16x1xf32> to vector<16x32xf32>
      %404 = arith.subf %390, %403 : vector<16x32xf32>
      %405 = arith.mulf %404, %404 : vector<16x32xf32>
      %cst_194 = arith.constant dense<0.000000e+00> : vector<16xf32>
      %406 = vector.multi_reduction <add>, %405, %cst_194 [1] : vector<16x32xf32> to vector<16xf32>
      %407 = vector.shape_cast %406 : vector<16xf32> to vector<16x1xf32>
      %cst_195 = arith.constant 3.200000e+01 : f32
      %408 = vector.broadcast %cst_195 : f32 to vector<16x1xf32>
      %409 = arith.divf %407, %408 : vector<16x1xf32>
      %cst_196 = arith.constant 9.99999974E-6 : f32
      %410 = vector.broadcast %cst_196 : f32 to vector<16x1xf32>
      %411 = arith.addf %409, %410 : vector<16x1xf32>
      %412 = math.rsqrt %411 : vector<16x1xf32>
      %413 = vector.broadcast %412 : vector<16x1xf32> to vector<16x32xf32>
      %414 = arith.mulf %404, %413 : vector<16x32xf32>
      %415 = vector.broadcast %396 : vector<1x32xf32> to vector<16x32xf32>
      %416 = arith.mulf %414, %415 : vector<16x32xf32>
      %417 = vector.broadcast %398 : vector<1x32xf32> to vector<16x32xf32>
      %418 = arith.addf %416, %417 : vector<16x32xf32>
      %419 = vector.shape_cast %418 : vector<16x32xf32> to vector<2x8x32xf32>
      %c0_197 = arith.constant 0 : index
      %c0_198 = arith.constant 0 : index
      %c0_199 = arith.constant 0 : index
      %420 = vector.load %arg32[%c0_197, %c0_198, %c0_199] : memref<2x8x32xf32, #tpu.memory_space<vmem>>, vector<2x8x32xf32>
      tpu.vector_store %arg32[%c0_197, %c0_198, %c0_199], %419 {strides = array<i32>} : memref<2x8x32xf32, #tpu.memory_space<vmem>>, vector<2x8x32xf32>,
    } else {
    }
    return
  }
  func.func @transform_0(%arg0: i32, %arg1: i32) -> (i32, i32, i32) {
    %c0_i32 = arith.constant 0 : i32
    %c0_i32_0 = arith.constant 0 : i32
    %c0_i32_1 = arith.constant 0 : i32
    return %arg0, %c0_i32, %c0_i32_0 : i32, i32, i32
  }
  func.func @transform_1(%arg0: i32, %arg1: i32) -> (i32, i32, i32) {
    %c0_i32 = arith.constant 0 : i32
    %c0_i32_0 = arith.constant 0 : i32
    %c0_i32_1 = arith.constant 0 : i32
    return %arg0, %c0_i32, %c0_i32_0 : i32, i32, i32
  }
  func.func @transform_2(%arg0: i32, %arg1: i32) -> (i32, i32, i32) {
    %c0_i32 = arith.constant 0 : i32
    %c0_i32_0 = arith.constant 0 : i32
    %c0_i32_1 = arith.constant 0 : i32
    return %arg0, %c0_i32, %c0_i32_0 : i32, i32, i32
  }
  func.func @transform_3(%arg0: i32, %arg1: i32) -> (i32, i32, i32) {
    %c0_i32 = arith.constant 0 : i32
    %c0_i32_0 = arith.constant 0 : i32
    %c0_i32_1 = arith.constant 0 : i32
    %c0_i32_2 = arith.constant 0 : i32
    return %c0_i32, %c0_i32_0, %c0_i32_1 : i32, i32, i32
  }
  func.func @transform_4(%arg0: i32, %arg1: i32) -> (i32, i32, i32) {
    %c0_i32 = arith.constant 0 : i32
    %c0_i32_0 = arith.constant 0 : i32
    %c0_i32_1 = arith.constant 0 : i32
    return %arg1, %c0_i32, %c0_i32_0 : i32, i32, i32
  }
  func.func @transform_5(%arg0: i32, %arg1: i32) -> (i32, i32, i32) {
    %c0_i32 = arith.constant 0 : i32
    %c0_i32_0 = arith.constant 0 : i32
    %c0_i32_1 = arith.constant 0 : i32
    return %arg1, %c0_i32, %c0_i32_0 : i32, i32, i32
  }
  func.func @transform_6(%arg0: i32, %arg1: i32) -> (i32, i32, i32) {
    %c0_i32 = arith.constant 0 : i32
    %c0_i32_0 = arith.constant 0 : i32
    %c0_i32_1 = arith.constant 0 : i32
    return %arg1, %c0_i32, %c0_i32_0 : i32, i32, i32
  }
  func.func @transform_7(%arg0: i32, %arg1: i32) -> (i32, i32, i32) {
    %c0_i32 = arith.constant 0 : i32
    %c0_i32_0 = arith.constant 0 : i32
    %c0_i32_1 = arith.constant 0 : i32
    return %arg1, %c0_i32, %c0_i32_0 : i32, i32, i32
  }
  func.func @transform_8(%arg0: i32, %arg1: i32) -> (i32, i32, i32) {
    %c0_i32 = arith.constant 0 : i32
    %c0_i32_0 = arith.constant 0 : i32
    %c0_i32_1 = arith.constant 0 : i32
    return %arg1, %c0_i32, %c0_i32_0 : i32, i32, i32
  }
  func.func @transform_9(%arg0: i32, %arg1: i32) -> (i32, i32, i32) {
    %c0_i32 = arith.constant 0 : i32
    %c0_i32_0 = arith.constant 0 : i32
    %c0_i32_1 = arith.constant 0 : i32
    return %arg1, %c0_i32, %c0_i32_0 : i32, i32, i32
  }
  func.func @transform_10(%arg0: i32, %arg1: i32) -> (i32, i32, i32) {
    %c0_i32 = arith.constant 0 : i32
    %c0_i32_0 = arith.constant 0 : i32
    %c0_i32_1 = arith.constant 0 : i32
    return %arg1, %c0_i32, %c0_i32_0 : i32, i32, i32
  }
  func.func @transform_11(%arg0: i32, %arg1: i32) -> (i32, i32, i32) {
    %c0_i32 = arith.constant 0 : i32
    %c0_i32_0 = arith.constant 0 : i32
    %c0_i32_1 = arith.constant 0 : i32
    return %arg1, %c0_i32, %c0_i32_0 : i32, i32, i32
  }
  func.func @transform_12(%arg0: i32, %arg1: i32) -> (i32, i32, i32) {
    %c0_i32 = arith.constant 0 : i32
    %c0_i32_0 = arith.constant 0 : i32
    %c0_i32_1 = arith.constant 0 : i32
    return %arg1, %c0_i32, %c0_i32_0 : i32, i32, i32
  }
  func.func @transform_13(%arg0: i32, %arg1: i32) -> (i32, i32, i32) {
    %c0_i32 = arith.constant 0 : i32
    %c0_i32_0 = arith.constant 0 : i32
    %c0_i32_1 = arith.constant 0 : i32
    return %arg1, %c0_i32, %c0_i32_0 : i32, i32, i32
  }
  func.func @transform_14(%arg0: i32, %arg1: i32) -> (i32, i32, i32) {
    %c0_i32 = arith.constant 0 : i32
    %c0_i32_0 = arith.constant 0 : i32
    %c0_i32_1 = arith.constant 0 : i32
    return %arg1, %c0_i32, %c0_i32_0 : i32, i32, i32
  }
  func.func @transform_15(%arg0: i32, %arg1: i32) -> (i32, i32, i32) {
    %c0_i32 = arith.constant 0 : i32
    %c0_i32_0 = arith.constant 0 : i32
    %c0_i32_1 = arith.constant 0 : i32
    return %arg1, %c0_i32, %c0_i32_0 : i32, i32, i32
  }
  func.func @transform_16(%arg0: i32, %arg1: i32) -> (i32, i32, i32) {
    %c0_i32 = arith.constant 0 : i32
    %c0_i32_0 = arith.constant 0 : i32
    %c0_i32_1 = arith.constant 0 : i32
    return %arg1, %c0_i32, %c0_i32_0 : i32, i32, i32
  }
  func.func @transform_17(%arg0: i32, %arg1: i32) -> (i32, i32, i32) {
    %c0_i32 = arith.constant 0 : i32
    %c0_i32_0 = arith.constant 0 : i32
    %c0_i32_1 = arith.constant 0 : i32
    return %arg1, %c0_i32, %c0_i32_0 : i32, i32, i32
  }
  func.func @transform_18(%arg0: i32, %arg1: i32) -> (i32, i32, i32) {
    %c0_i32 = arith.constant 0 : i32
    %c0_i32_0 = arith.constant 0 : i32
    %c0_i32_1 = arith.constant 0 : i32
    return %arg1, %c0_i32, %c0_i32_0 : i32, i32, i32
  }
  func.func @transform_19(%arg0: i32, %arg1: i32) -> (i32, i32, i32) {
    %c0_i32 = arith.constant 0 : i32
    %c0_i32_0 = arith.constant 0 : i32
    %c0_i32_1 = arith.constant 0 : i32
    return %arg1, %c0_i32, %c0_i32_0 : i32, i32, i32
  }
  func.func @transform_20(%arg0: i32, %arg1: i32) -> (i32, i32, i32) {
    %c0_i32 = arith.constant 0 : i32
    %c0_i32_0 = arith.constant 0 : i32
    %c0_i32_1 = arith.constant 0 : i32
    return %arg1, %c0_i32, %c0_i32_0 : i32, i32, i32
  }
  func.func @transform_21(%arg0: i32, %arg1: i32) -> (i32, i32, i32) {
    %c0_i32 = arith.constant 0 : i32
    %c0_i32_0 = arith.constant 0 : i32
    %c0_i32_1 = arith.constant 0 : i32
    return %arg1, %c0_i32, %c0_i32_0 : i32, i32, i32
  }
  func.func @transform_22(%arg0: i32, %arg1: i32) -> (i32, i32, i32) {
    %c0_i32 = arith.constant 0 : i32
    %c0_i32_0 = arith.constant 0 : i32
    %c0_i32_1 = arith.constant 0 : i32
    return %arg1, %c0_i32, %c0_i32_0 : i32, i32, i32
  }
  func.func @transform_23(%arg0: i32, %arg1: i32) -> (i32, i32, i32) {
    %c0_i32 = arith.constant 0 : i32
    %c0_i32_0 = arith.constant 0 : i32
    %c0_i32_1 = arith.constant 0 : i32
    return %arg1, %c0_i32, %c0_i32_0 : i32, i32, i32
  }
  func.func @transform_24(%arg0: i32, %arg1: i32) -> (i32, i32, i32) {
    %c0_i32 = arith.constant 0 : i32
    %c0_i32_0 = arith.constant 0 : i32
    %c0_i32_1 = arith.constant 0 : i32
    return %arg1, %c0_i32, %c0_i32_0 : i32, i32, i32
  }
  func.func @transform_25(%arg0: i32, %arg1: i32) -> (i32, i32, i32) {
    %c0_i32 = arith.constant 0 : i32
    %c0_i32_0 = arith.constant 0 : i32
    %c0_i32_1 = arith.constant 0 : i32
    return %arg1, %c0_i32, %c0_i32_0 : i32, i32, i32
  }
  func.func @transform_26(%arg0: i32, %arg1: i32) -> (i32, i32, i32) {
    %c0_i32 = arith.constant 0 : i32
    %c0_i32_0 = arith.constant 0 : i32
    %c0_i32_1 = arith.constant 0 : i32
    return %arg1, %c0_i32, %c0_i32_0 : i32, i32, i32
  }
  func.func @transform_27(%arg0: i32, %arg1: i32) -> (i32, i32, i32) {
    %c0_i32 = arith.constant 0 : i32
    %c0_i32_0 = arith.constant 0 : i32
    %c0_i32_1 = arith.constant 0 : i32
    return %arg1, %c0_i32, %c0_i32_0 : i32, i32, i32
  }
  func.func @transform_28(%arg0: i32, %arg1: i32) -> (i32, i32, i32) {
    %c0_i32 = arith.constant 0 : i32
    %c0_i32_0 = arith.constant 0 : i32
    %c0_i32_1 = arith.constant 0 : i32
    %c0_i32_2 = arith.constant 0 : i32
    return %c0_i32, %c0_i32_0, %c0_i32_1 : i32, i32, i32
  }
  func.func @transform_29(%arg0: i32, %arg1: i32) -> (i32, i32, i32) {
    %c0_i32 = arith.constant 0 : i32
    %c0_i32_0 = arith.constant 0 : i32
    %c0_i32_1 = arith.constant 0 : i32
    %c0_i32_2 = arith.constant 0 : i32
    return %c0_i32, %c0_i32_0, %c0_i32_1 : i32, i32, i32
  }
  func.func @transform_30(%arg0: i32, %arg1: i32) -> (i32, i32, i32) {
    %c0_i32 = arith.constant 0 : i32
    %c0_i32_0 = arith.constant 0 : i32
    %c0_i32_1 = arith.constant 0 : i32
    return %arg0, %c0_i32, %c0_i32_0 : i32, i32, i32
  }
  func.func @transform_31(%arg0: i32, %arg1: i32) -> (i32, i32, i32) {
    %c0_i32 = arith.constant 0 : i32
    %c0_i32_0 = arith.constant 0 : i32
    %c0_i32_1 = arith.constant 0 : i32
    return %arg0, %c0_i32, %c0_i32_0 : i32, i32, i32
  }
  func.func @transform_32(%arg0: i32, %arg1: i32) -> (i32, i32, i32) {
    %c0_i32 = arith.constant 0 : i32
    %c0_i32_0 = arith.constant 0 : i32
    %c0_i32_1 = arith.constant 0 : i32
    return %arg0, %c0_i32, %c0_i32_0 : i32, i32, i32
  }
}

</mosaic_0001>

<bundles_post_ra>
// kernel: decoder_forward.1
= control target key start
LH: loop header
LB: loop body
LE: loop exit
PB: predicated region body
PF: predicated region fallthrough
CT: control target
= control target key end

     0   :  { %s6082_s6 = smov 1   ;;  %s6083_s10 = smov 2   ;;  %s8992_s0 = inlined_call_operand.smem [shape: u32[33], index: -1, kind: input, shape index: {}] }
   0x1   :  { %s6137_s5 = sld [smem:[%s8992_s0]]   ;;  %s6084_s14 = smov 3  }
   0x2   :  { %s6142_s9 = sld [smem:[%s8992_s0 + %s6082_s6]]   ;;  %s6085_s18 = smov 4  }
   0x3   :  { %s6147_s13 = sld [smem:[%s8992_s0 + %s6083_s10]]   ;;  %s6086_s22 = smov 5  }
   0x4   :  { %s6152_s17 = sld [smem:[%s8992_s0 + %s6084_s14]]   ;;  %s6087_s26 = smov 6  }
   0x5   :  { %s6157_s21 = sld [smem:[%s8992_s0 + %s6085_s18]]   ;;  %s6088_s30 = smov 7  }
   0x6   :  { %s6162_s25 = sld [smem:[%s8992_s0 + %s6086_s22]]   ;;  %s6089_s4 = smov 8  }
   0x7   :  { %9016 = sst [smem:[#allocation11_spill]] %s6137_s5  ;;  %s6090_s10 = smov 9  }
   0x8   :  { %9017 = sst [smem:[#allocation12_spill]] %s6142_s9  ;;  %s6091_s15 = smov 10  }
   0x9   :  { %9018 = sst [smem:[#allocation13_spill]] %s6147_s13  ;;  %s6092_s20 = smov 11  }
   0xa   :  { %9019 = sst [smem:[#allocation14_spill]] %s6152_s17  ;;  %s6094_s1 = smov 13  }
   0xb   :  { %9020 = sst [smem:[#allocation15_spill]] %s6157_s21  ;;  %s6095_s7 = smov 14  }
   0xc   :  { %9021 = sst [smem:[#allocation16_spill]] %s6162_s25  ;;  %s6097_s22 = smov 16  }
   0xd   :  { %s6167_s29 = sld [smem:[%s8992_s0 + %s6087_s26]]   ;;  %s6093_s26 = smov 12  }
   0xe   :  { %s6172_s3 = sld [smem:[%s8992_s0 + %s6088_s30]]   ;;  %s6098_s28 = smov 17  }
   0xf   :  { %s6177_s8 = sld [smem:[%s8992_s0 + %s6089_s4]]  }
  0x10   :  { %s6182_s14 = sld [smem:[%s8992_s0 + %s6090_s10]]  }
  0x11   :  { %s6187_s19 = sld [smem:[%s8992_s0 + %s6091_s15]]   ;;  %s6096_s15 = smov 15  }
  0x12   :  { %s6192_s24 = sld [smem:[%s8992_s0 + %s6092_s20]]  }
  0x13   :  { %9022 = sst [smem:[#allocation17_spill]] %s6167_s29 }
  0x14   :  { %9023 = sst [smem:[#allocation18_spill]] %s6172_s3 }
  0x15   :  { %9024 = sst [smem:[#allocation19_spill]] %s6177_s8 }
  0x16   :  { %9025 = sst [smem:[#allocation20_spill]] %s6182_s14 }
  0x17   :  { %9026 = sst [smem:[#allocation21_spill]] %s6187_s19 }
  0x18   :  { %9027 = sst [smem:[#allocation22_spill]] %s6192_s24 }
  0x19   :  { %s6197_s30 = sld [smem:[%s8992_s0 + %s6093_s26]]  }
  0x1a   :  { %s6202_s6 = sld [smem:[%s8992_s0 + %s6094_s1]]  }
  0x1b   :  { %s6207_s12 = sld [smem:[%s8992_s0 + %s6095_s7]]   ;;  %s6099_s7 = smov 18  }
  0x1c   :  { %s6212_s20 = sld [smem:[%s8992_s0 + %s6096_s15]]   ;;  %s6100_s15 = smov 19  }
  0x1d   :  { %s6217_s27 = sld [smem:[%s8992_s0 + %s6097_s22]]   ;;  %s6101_s22 = smov 20  }
  0x1e   :  { %s6222_s4 = sld [smem:[%s8992_s0 + %s6098_s28]]   ;;  %s6102_s28 = smov 21  }
  0x1f   :  { %9028 = sst [smem:[#allocation23_spill]] %s6197_s30 }
  0x20   :  { %9029 = sst [smem:[#allocation24_spill]] %s6202_s6 }
  0x21   :  { %s6227_s17 = sld [smem:[%s8992_s0 + %s6099_s7]]   ;;  %s6103_s7 = smov 22  }
  0x22   :  { %s6232_s13 = sld [smem:[%s8992_s0 + %s6100_s15]]   ;;  %s6104_s15 = smov 23  }
  0x23   :  { %s6237_s9 = sld [smem:[%s8992_s0 + %s6101_s22]]   ;;  %s6105_s22 = smov 24  }
  0x24   :  { %s6242_s5 = sld [smem:[%s8992_s0 + %s6102_s28]]   ;;  %s6106_s28 = smov 25  }
  0x27   :  { %9030 = sst [smem:[#allocation25_spill]] %s6227_s17 }
  0x28   :  { %9031 = sst [smem:[#allocation26_spill]] %s6232_s13 }
  0x29   :  { %9032 = sst [smem:[#allocation27_spill]] %s6237_s9 }
  0x2a   :  { %9033 = sst [smem:[#allocation28_spill]] %s6242_s5 }
  0x2b   :  { %s6247_s17 = sld [smem:[%s8992_s0 + %s6103_s7]]   ;;  %s6107_s7 = smov 26  }
  0x2c   :  { %s6252_s13 = sld [smem:[%s8992_s0 + %s6104_s15]]   ;;  %s6108_s15 = smov 27  }
  0x2d   :  { %s6257_s9 = sld [smem:[%s8992_s0 + %s6105_s22]]   ;;  %s6109_s22 = smov 28  }
  0x2e   :  { %s6262_s5 = sld [smem:[%s8992_s0 + %s6106_s28]]   ;;  %s6110_s28 = smov 29  }
  0x31   :  { %9034 = sst [smem:[#allocation29_spill]] %s6247_s17 }
  0x32   :  { %9035 = sst [smem:[#allocation30_spill]] %s6252_s13 }
  0x33   :  { %9036 = sst [smem:[#allocation31_spill]] %s6257_s9 }
  0x34   :  { %9037 = sst [smem:[#allocation32_spill]] %s6262_s5 }
  0x35   :  { %s6267_s17 = sld [smem:[%s8992_s0 + %s6107_s7]]   ;;  %s6111_s7 = smov 30  }
  0x36   :  { %s6272_s13 = sld [smem:[%s8992_s0 + %s6108_s15]]   ;;  %s6112_s15 = smov 31  }
  0x37   :  { %s6277_s9 = sld [smem:[%s8992_s0 + %s6109_s22]]   ;;  %s6113_s22 = smov 32  }
  0x38   :  { %s6282_s5 = sld [smem:[%s8992_s0 + %s6110_s28]]  }
  0x3b   :  { %9038 = sst [smem:[#allocation33_spill]] %s6267_s17 }
  0x3c   :  { %9039 = sst [smem:[#allocation34_spill]] %s6272_s13 }
  0x3d   :  { %9040 = sst [smem:[#allocation35_spill]] %s6277_s9 }
  0x3e   :  { %9041 = sst [smem:[#allocation36_spill]] %s6282_s5 }
  0x3f   :  { %s6287_s17 = sld [smem:[%s8992_s0 + %s6111_s7]]  }
  0x40   :  { %s6292_s13 = sld [smem:[%s8992_s0 + %s6112_s15]]  }
  0x41   :  { %s6297_s9 = sld [smem:[%s8992_s0 + %s6113_s22]]  }
  0x45   :  { %9042 = sst [smem:[#allocation37_spill]] %s6287_s17 }
  0x46   :  { %9043 = sst [smem:[#allocation38_spill]] %s6292_s13 }
  0x47   :  { %9044 = sst [smem:[#allocation39_spill]] %s6297_s9 }
  0x48   :  { %71 = vsyncpa [#allocation5], 0 }
  0x49   :  { %72 = vsyncpa [#allocation7], 0  ;;  %s6299_s28 = smov 0   ;;  %s6301_s1 = smov 0  }
  0x4a   :  { %s6303_s2 = smov 0  }
  0x4b LB: > { %9045 = sst [smem:[#allocation40_spill]] %s6072_s28  ;;  %s87_s7 = sadd.s32 1, %s6076_s1  ;;  %s6080_s2 = sphi %s6303_s2, %s78_s2   ;;  %s6076_s1 = sphi %s6301_s1, %s9166_s1   ;;  %s6072_s28 = sphi %s6299_s28, %s9165_s28  }
  0x4c   : > { %9046 = sst [smem:[#allocation41_spill]] %s6076_s1  ;;  %p88_p0 = scmp.ge.s32.totalorder %s87_s7, 2 }
  0x4d   : > { %9047 = sst [smem:[#allocation42_spill]] %s6080_s2  ;;  %p5493_p1 = scmp.ge.s32.totalorder %s6080_s2, 1 }
  0x4e   : > { %p1146_p2 = scmp.lt.s32.totalorder %s6080_s2, 3  ;;  %s9168_s7 = smov (%p88_p0, %s87_s7), 0 }
  0x4f   : > { %9048 = sst [smem:[#allocation43_spill]] %s9168_s7 }
  0x50   : > { %p1147_p3 = pnand %p5493_p1, %p1146_p2 }
  0x52   : > { %1150 = sbr.rel (%p1147_p3) target bundleno = 4654 (0x122e), region = 140 }
  0x57   : > { %s9051_s29 = sld [smem:[#allocation17_spill]]  ;;  %p1341_p4 = scmp.lt.s32.totalorder %s6072_s28, 1 }
  0x58   : > { %s9052_s3 = sld [smem:[#allocation18_spill]] }
  0x59   : > { %s9054_s8 = sld [smem:[#allocation19_spill]] }
  0x5a   : > { %s9055_s19 = sld [smem:[#allocation21_spill]] }
  0x5b   : > { %s9057_s30 = sld [smem:[#allocation23_spill]] }
  0x5c   : > { %s6322_s10 = scalar_select %p1341_p4, %s6072_s28, 1 }
  0x5d   : > { %s9059_s11 = sld [smem:[#allocation25_spill]] }
  0x5e   : > { %s9060_s16 = sld [smem:[#allocation26_spill]]  ;;  %s6330_s23 = scalar_lea.vmem %s9051_s29, %s6322_s10 }
  0x5f   : > { %s9061_s22 = sld [smem:[#allocation27_spill]]  ;;  %s6334_s0 = scalar_lea.vmem %s9052_s3, %s6322_s10 }
  0x60   : > { %9062 = sst [smem:[#allocation44_spill]] %s6330_s23  ;;  %s5646_s1 = sshll.u32 %s6322_s10, 4 }
  0x61   : > { %s9063_s26 = sld [smem:[#allocation28_spill]]  ;;  %s6340_s2 = scalar_lea.vmem %s9054_s8, %s5646_s1 }
  0x62   : > { %9064 = sst [smem:[#allocation45_spill]] %s6334_s0  ;;  %s6343_s5 = scalar_lea.vmem %s9055_s19, %s5646_s1 }
  0x63   : > { %s9065_s7 = sld [smem:[#allocation29_spill]]  ;;  %s6348_s25 = scalar_lea.vmem %s9057_s30, %s5646_s1 }
  0x64   : > { %s9066_s9 = sld [smem:[#allocation30_spill]]  ;;  %s6357_s28 = scalar_lea.vmem %s6217_s27, %s5646_s1 }
  0x65   : > { %s9067_s13 = sld [smem:[#allocation31_spill]]  ;;  %s1390_s17 = scalar_lea.vmem %s6222_s4, %s6322_s10 }
  0x66   : > { %9068 = sst [smem:[#allocation46_spill]] %s6340_s2  ;;  %s6362_s14 = scalar_lea.vmem %s9059_s11, %s5646_s1 }
  0x67   : > { %s9069_s15 = sld [smem:[#allocation32_spill]]  ;;  %s1398_s8 = scalar_lea.vmem %s9060_s16, %s6322_s10 }
  0x68   : > { %9070 = sst [smem:[#allocation47_spill]] %s6343_s5  ;;  %s6367_s2 = scalar_lea.vmem %s9061_s22, %s5646_s1 }
  0x69   : > { %s9071_s29 = sld [smem:[#allocation33_spill]]  ;;  %s1406_s19 = scalar_lea.vmem %s9063_s26, %s6322_s10 }
  0x6a   : > { %9072 = sst [smem:[#allocation48_spill]] %s6348_s25  ;;  %s1409_s5 = scalar_lea.vmem %s9065_s7, %s6322_s10 }
  0x6b   : > { %s9073_s3 = sld [smem:[#allocation34_spill]]  ;;  %s1412_s18 = scalar_lea.vmem %s9066_s9, %s6322_s10 }
  0x6c   : > { %s6376_s24 = scalar_lea.vmem %s9067_s13, %s5646_s1  ;;  %s5653_s25 = sshll.u32 %s6322_s10, 5 }
  0x6d   : > { %s1420_s30 = scalar_lea.vmem %s9069_s15, %s6322_s10  ;;  %s9074_s0 = sld [smem:[#allocation40_spill]] }
  0x6f   : > { %s6382_s6 = scalar_lea.vmem %s9071_s29, %s5653_s25 }
  0x71   : > { %s1428_s21 = scalar_lea.vmem %s9073_s3, %s6322_s10 }
  0x73   : > { %p5510_p5 = scmp.ne.s32.totalorder %s9074_s0, 0 }
  0x74   : > { %s9075_s23 = sld [smem:[#allocation11_spill]] (!%p5510_p5) }
  0x75   : > { %1436 = sbr.rel (%p5510_p5) target bundleno = 125 (0x7d), region = 144 }
  0x7a   : > { %v1437_v0 = vld [vmem:[%s9075_s23] sm:$0xff]  ;;  %vm1439_vm0 = vcmask 261120   ;;  %v1438_v1 = vld [vmem:[%s9075_s23 + $0x8] sm:$0xff] }
  0x7b   : > { %1440 = vst.msk [vmem:[#allocation2] sm:$0xff] %vm1439_vm0, %v1437_v0 }
  0x7c   : > { %1441 = vst.msk [vmem:[#allocation2 + $0x8] sm:$0xff] %vm1439_vm0, %v1438_v1 }
  0x7d PF: > { %s9076_s7 = sld [smem:[#allocation12_spill]]  ;;  %vm1478_vm1 = vcmask 261120   ;;  %v6114_v16 = vmov 32.0   ;;  %s6115_s1 = smov 120  }
  0x7e   : > { %5778 = vrcp.f32 %v6114_v16  ;;  %s9078_s9 = sld [smem:[#allocation47_spill]]  ;;  %s6116_s0 = smov 112  }
  0x7f   : > { %s9081_s13 = sld [smem:[#allocation44_spill]]  ;;  %s6117_s11 = smov 104  }
  0x80   : > { %s9082_s25 = sld [smem:[#allocation45_spill]] }
  0x81   : > { %s9103_s29 = sld [smem:[#allocation22_spill]] }
  0x82   : > { %s9116_s15 = sld [smem:[#allocation46_spill]] }
  0x83   : > { %v1446_v2 = vld [vmem:[%s9076_s7 + $0x10] sm:$0xff]  ;;  %v1444_v3 = vld [vmem:[%s9076_s7] sm:$0xff]  ;;  %v1447_v4 = vld [vmem:[%s9076_s7 + $0x18] sm:$0xff]  ;;  %s9118_s16 = sld [smem:[#allocation15_spill]] }
  0x84   : > { %v1548_v5 = vsel %vm1478_vm1, %v1446_v2, 0.0  ;;  %v1542_v6 = vsel %vm1478_vm1, %v1444_v3, 0.0  ;;  %v1445_v7 = vld [vmem:[%s9076_s7 + $0x8] sm:$0xff]  ;;  %v1448_v8 = vld [vmem:[%s9076_s7 + $0x20] sm:$0xff]  ;;  %v1551_v9 = vsel %vm1478_vm1, %v1447_v4, 0.0  ;;  %v1450_v14 = vld [vmem:[%s9076_s7 + $0x30] sm:$0xff]  ;;  %v5779_v17 = vpop.eup %5778 }
  0x85   : > { %1549 = vadd.xlane.f32.xlu1 %v1548_v5  ;;  %1543 = vadd.xlane.f32.xlu0 %v1542_v6  ;;  %v1554_v10 = vsel %vm1478_vm1, %v1448_v8, 0.0  ;;  %v1545_v11 = vsel %vm1478_vm1, %v1445_v7, 0.0  ;;  %v1449_v12 = vld [vmem:[%s9076_s7 + $0x28] sm:$0xff]  ;;  %v1560_v15 = vsel %vm1478_vm1, %v1450_v14, 0.0  ;;  %v1486_v18 = vmul.f32 32.0, %v5779_v17  ;;  %v6416_v36 = vld [vmem:[%s9076_s7 + $0x38] sm:$0xff] }
  0x86   : > { %1555 = vadd.xlane.f32.xlu2 %v1554_v10  ;;  %v1557_v13 = vsel %vm1478_vm1, %v1449_v12, 0.0  ;;  %vm1490_vm2 = vweird.f32 %v5779_v17  ;;  %v1563_v42 = vsel %vm1478_vm1, %v6416_v36, 0.0  ;;  %v6438_v49 = vld [vmem:[%s9076_s7 + $0x40] sm:$0xff]  ;;  %v6452_v58 = vld [vmem:[%s9076_s7 + $0x58] sm:$0xff]  ;;  %v6455_v59 = vld [vmem:[%s9076_s7 + $0x48] sm:$0xff]  ;;  %s9119_s22 = sld [smem:[#allocation16_spill]] }
  0x87   : > { %v1487_v19 = vsub.f32 1.0, %v1486_v18  ;;  %v1566_v53 = vsel %vm1478_vm1, %v6438_v49, 0.0  ;;  %v1575_v61 = vsel %vm1478_vm1, %v6452_v58, 0.0  ;;  %v1569_v63 = vsel %vm1478_vm1, %v6455_v59, 0.0  ;;  %v6467_v1 = vld [vmem:[%s9076_s7 + $0x60] sm:$0xff]  ;;  %v6478_v6 = vld [vmem:[%s9076_s7 + $0x68] sm:$0xff]  ;;  %s9106_s3 = scalar_lea.vmem %s9103_s29, %s6322_s10 }
  0x88   : > { %s6119_s29 = smov 88  }
  0x89   : > { %v1488_v20 = vmul.f32 %v5779_v17, %v1487_v19  ;;  %s9120_s26 = scalar_lea.vmem %s9118_s16, %s6322_s10  ;;  %s6121_s16 = smov 72  }
  0x8b   : > { %v1489_v21 = vadd.f32 %v5779_v17, %v1488_v20 }
  0x8d   : > { %1552 = vadd.xlane.f32.xlu1 %v1551_v9  ;;  %1546 = vadd.xlane.f32.xlu0 %v1545_v11  ;;  %v6403_v22 = vsel %vm1490_vm2, %v5779_v17, %v1489_v21  ;;  %v5657_v11 = vld [vmem:[%s9078_s9 + $0x8] sm:$0xff] }
  0x8e   : > { %1558 = vadd.xlane.f32.xlu2 %v1557_v13  ;;  %9077 = vst [vmem:[#allocation49_spill] sm:$0xff] %v6403_v22  ;;  %2448 = vmatpush.bf16.msra.mxu1 %v5657_v11 }
  0x96   : > { %1561 = vadd.xlane.f32.xlu2 %v1560_v15 }
  0xf8   : > { %v1550_v23 = vpop.xlane.xlu1 %1549  ;;  %v1544_v24 = vpop.xlane.xlu0 %1543 }
  0xf9   : > { %v1638_v25 = vmul.f32 %v1544_v24, %v6403_v22  ;;  %v1556_v26 = vpop.xlane.xlu2 %1555  ;;  %v1640_v35 = vmul.f32 %v1550_v23, %v6403_v22 }
  0xfa   : > { %v1642_v34 = vmul.f32 %v1556_v26, %v6403_v22 }
  0xfb   : > { %v6406_v27 = vsub.f32 %v1444_v3, %v1638_v25  ;;  %v6430_v44 = vsub.f32 %v1446_v2, %v1640_v35  ;;  %v6470_v2 = vld [vmem:[%s9076_s7 + $0x50] sm:$0xff]  ;;  %v1578_v3 = vsel %vm1478_vm1, %v6467_v1, 0.0 }
  0xfc   : > { %v6422_v40 = vsub.f32 %v1448_v8, %v1642_v34  ;;  %v1572_v5 = vsel %vm1478_vm1, %v6470_v2, 0.0  ;;  %v6483_v8 = vld [vmem:[%s9076_s7 + $0x70] sm:$0xff] }
  0xfd   : > { %v1702_v28 = vmul.f32 %v6406_v27, %v6406_v27  ;;  %v1704_v50 = vmul.f32 %v6430_v44, %v6430_v44  ;;  %v1584_v9 = vsel %vm1478_vm1, %v6483_v8, 0.0 }
  0xfe   : > { %v1706_v48 = vmul.f32 %v6422_v40, %v6422_v40 }
  0xff   : > { %v1734_v29 = vsel %vm1478_vm1, %v1702_v28, 0.0  ;;  %v1740_v54 = vsel %vm1478_vm1, %v1704_v50, 0.0 }
 0x100   : > { %v1553_v30 = vpop.xlane.xlu1 %1552  ;;  %1735 = vadd.xlane.f32.xlu0 %v1734_v29  ;;  %v1547_v31 = vpop.xlane.xlu0 %1546  ;;  %v1746_v52 = vsel %vm1478_vm1, %v1706_v48, 0.0 }
 0x101   : > { %v1641_v32 = vmul.f32 %v1553_v30, %v6403_v22  ;;  %v1639_v33 = vmul.f32 %v1547_v31, %v6403_v22  ;;  %v1559_v39 = vpop.xlane.xlu2 %1558 }
 0x102   : > { %v1643_v47 = vmul.f32 %v1559_v39, %v6403_v22 }
 0x103   : > { %v6418_v37 = vsub.f32 %v1447_v4, %v1641_v32  ;;  %v6420_v38 = vsub.f32 %v1445_v7, %v1639_v33  ;;  %v1581_v7 = vsel %vm1478_vm1, %v6478_v6, 0.0 }
 0x104   : > { %v6442_v51 = vsub.f32 %v1449_v12, %v1643_v47 }
 0x105   : > { %v1705_v41 = vmul.f32 %v6418_v37, %v6418_v37  ;;  %v1703_v43 = vmul.f32 %v6420_v38, %v6420_v38 }
 0x106   : > { %v1707_v57 = vmul.f32 %v6442_v51, %v6442_v51 }
 0x107   : > { %v1743_v45 = vsel %vm1478_vm1, %v1705_v41, 0.0  ;;  %v1737_v46 = vsel %vm1478_vm1, %v1703_v43, 0.0 }
 0x108   : > { %1744 = vadd.xlane.f32.xlu2 %v1743_v45  ;;  %1564 = vadd.xlane.f32.xlu0 %v1563_v42  ;;  %v1749_v62 = vsel %vm1478_vm1, %v1707_v57, 0.0 }
 0x109   : > { %1738 = vadd.xlane.f32.xlu1 %v1737_v46  ;;  %v1562_v55 = vpop.xlane.xlu2 %1561 }
 0x10a   : > { %v1644_v56 = vmul.f32 %v1562_v55, %v6403_v22 }
 0x10c   : > { %v6457_v60 = vsub.f32 %v1450_v14, %v1644_v56  ;;  %v5656_v14 = vld [vmem:[%s9078_s9] sm:$0xff]  ;;  %s9122_s9 = scalar_lea.vmem %s9119_s22, %s6322_s10  ;;  %s9126_s22 = sld [smem:[#allocation13_spill]] }
 0x10d   : > { %2449 = vmatpush.bf16.msra.mxu1 %v5656_v14 }
 0x10e   : > { %v1708_v0 = vmul.f32 %v6457_v60, %v6457_v60 }
 0x110   : > { %1747 = vadd.xlane.f32.xlu2 %v1746_v52  ;;  %1567 = vadd.xlane.f32.xlu0 %v1566_v53  ;;  %v1752_v4 = vsel %vm1478_vm1, %v1708_v0, 0.0 }
 0x111   : > { %1741 = vadd.xlane.f32.xlu1 %v1740_v54 }
 0x118   : > { %1576 = vadd.xlane.f32.xlu2 %v1575_v61  ;;  %1750 = vadd.xlane.f32.xlu0 %v1749_v62 }
 0x119   : > { %1570 = vadd.xlane.f32.xlu1 %v1569_v63 }
 0x120   : > { %1579 = vadd.xlane.f32.xlu2 %v1578_v3  ;;  %1753 = vadd.xlane.f32.xlu0 %v1752_v4 }
 0x121   : > { %1573 = vadd.xlane.f32.xlu1 %v1572_v5 }
 0x128   : > { %1582 = vadd.xlane.f32.xlu0 %v1581_v7 }
 0x130   : > { %1585 = vadd.xlane.f32.xlu0 %v1584_v9 }
 0x173   : > { %v1736_v10 = vpop.xlane.xlu0 %1735 }
 0x174   : > { %v1830_v12 = vmul.f32 %v1736_v10, %v6403_v22 }
 0x176   : > { %v1862_v13 = vadd.f32 1e-05, %v1830_v12 }
 0x178   : > { %5780 = vrsqrt.f32 %v1862_v13  ;;  %vm1900_vm4 = vweird.f32 %v1862_v13 }
 0x17b   : > { %v1745_v15 = vpop.xlane.xlu2 %1744  ;;  %v1565_v16 = vpop.xlane.xlu0 %1564 }
 0x17c   : > { %v1833_v17 = vmul.f32 %v1745_v15, %v6403_v22  ;;  %v1739_v18 = vpop.xlane.xlu1 %1738  ;;  %v1645_v19 = vmul.f32 %v1565_v16, %v6403_v22  ;;  %v6549_v16 = vld [vmem:[%s9081_s13] ss:$0 sm:$0xff] }
 0x17d   : > { %v1831_v20 = vmul.f32 %v1739_v18, %v6403_v22 }
 0x17e   : > { %v5781_v21 = vpop.eup %5780  ;;  %v6493_v23 = vadd.f32 1e-05, %v1833_v17  ;;  %v6496_v24 = vsub.f32 %v6416_v36, %v1645_v19 }
 0x17f   : > { %v1895_v25 = vmul.f32 %v5781_v21, %v1862_v13  ;;  %v1863_v26 = vadd.f32 1e-05, %v1831_v20  ;;  %vm1901_vm3 = vweird.f32 %v5781_v21  ;;  %v6542_v13 = vld [vmem:[%s9076_s7 + $0x78] sm:$0xff] }
 0x180   : > { %5782 = vrsqrt.f32 %v6493_v23  ;;  %v1709_v28 = vmul.f32 %v6496_v24, %v6496_v24  ;;  %vm6519_vm5 = vmor %vm1900_vm4, %vm1901_vm3  ;;  %vm1930_vm9 = vweird.f32 %v6493_v23 }
 0x181   : > { %v1896_v29 = vmul.f32 %v5781_v21, %v1895_v25  ;;  %5784 = vrsqrt.f32 %v1863_v26  ;;  %vm1910_vm6 = vweird.f32 %v1863_v26 }
 0x182   : > { %v1755_v30 = vsel %vm1478_vm1, %v1709_v28, 0.0 }
 0x183   : > { %v1897_v31 = vmul.f32 0.5, %v1896_v29  ;;  %v1748_v32 = vpop.xlane.xlu2 %1747  ;;  %1756 = vadd.xlane.f32.xlu1 %v1755_v30  ;;  %v1568_v33 = vpop.xlane.xlu0 %1567 }
 0x184   : > { %v1742_v34 = vpop.xlane.xlu1 %1741  ;;  %v1646_v35 = vmul.f32 %v1568_v33, %v6403_v22  ;;  %v1834_v45 = vmul.f32 %v1748_v32, %v6403_v22 }
 0x185   : > { %v1898_v36 = vsub.f32 1.5, %v1897_v31  ;;  %v1832_v39 = vmul.f32 %v1742_v34, %v6403_v22  ;;  %v6567_v34 = vld [vmem:[%s9082_s25] ss:$0 sm:$0xff] }
 0x186   : > { %v6504_v41 = vpop.eup %5782  ;;  %v6507_v42 = vsub.f32 %v6438_v49, %v1646_v35  ;;  %v6517_v49 = vadd.f32 1e-05, %v1834_v45 }
 0x187   : > { %v5785_v43 = vpop.eup %5784  ;;  %v6510_v46 = vadd.f32 1e-05, %v1832_v39  ;;  %v1899_v48 = vmul.f32 %v5781_v21, %v1898_v36  ;;  %v1925_v50 = vmul.f32 %v6504_v41, %v6493_v23  ;;  %vm1931_vm10 = vweird.f32 %v6504_v41 }
 0x188   : > { %v1905_v47 = vmul.f32 %v5785_v43, %v1863_v26  ;;  %v1710_v53 = vmul.f32 %v6507_v42, %v6507_v42  ;;  %vm1911_vm7 = vweird.f32 %v5785_v43  ;;  %vm6594_vm13 = vmor %vm1930_vm9, %vm1931_vm10  ;;  %vm1940_vm4 = vweird.f32 %v6517_v49 }
 0x189   : > { %5786 = vrsqrt.f32 %v6510_v46  ;;  %v1903_v3 = vsel %vm6519_vm5, %v5781_v21, %v1899_v48  ;;  %v1926_v4 = vmul.f32 %v6504_v41, %v1925_v50  ;;  %vm1912_vm8 = vmor %vm1910_vm6, %vm1911_vm7  ;;  %v1587_v21 = vsel %vm1478_vm1, %v6542_v13, 0.0 }
 0x18a   : > { %v1906_v52 = vmul.f32 %v5785_v43, %v1905_v47  ;;  %v1758_v63 = vsel %vm1478_vm1, %v1710_v53, 0.0  ;;  %5788 = vrsqrt.f32 %v6517_v49  ;;  %vm1920_vm12 = vweird.f32 %v6510_v46 }
 0x18b   : > { %v1577_v54 = vpop.xlane.xlu2 %1576  ;;  %v1751_v55 = vpop.xlane.xlu0 %1750  ;;  %1759 = vadd.xlane.f32.xlu1 %v1758_v63  ;;  %v1927_v17 = vmul.f32 0.5, %v1926_v4 }
 0x18c   : > { %v1907_v57 = vmul.f32 0.5, %v1906_v52  ;;  %v1649_v61 = vmul.f32 %v1577_v54, %v6403_v22  ;;  %v1571_v62 = vpop.xlane.xlu1 %1570  ;;  %v1835_v0 = vmul.f32 %v1751_v55, %v6403_v22  ;;  %v6587_v52 = vld [vmem:[%s9076_s7 + $0x80] sm:$0xff] }
 0x18d   : > { %v1647_v5 = vmul.f32 %v1571_v62, %v6403_v22  ;;  %v1928_v36 = vsub.f32 1.5, %v1927_v17  ;;  %v1590_v62 = vsel %vm1478_vm1, %v6587_v52, 0.0 }
 0x18e   : > { %v1908_v7 = vsub.f32 1.5, %v1907_v57  ;;  %v6531_v9 = vsub.f32 %v6452_v58, %v1649_v61  ;;  %v6533_v10 = vadd.f32 1e-05, %v1835_v0  ;;  %v2214_v58 = vmul.f32 %v1903_v3, %v6406_v27 }
 0x18f   : > { %v6535_v11 = vpop.eup %5786  ;;  %v6539_v12 = vsub.f32 %v6455_v59, %v1647_v5 }
 0x190   : > { %v1909_v14 = vmul.f32 %v5785_v43, %v1908_v7  ;;  %v1915_v15 = vmul.f32 %v6535_v11, %v6510_v46  ;;  %5790 = vrsqrt.f32 %v6533_v10  ;;  %v1713_v59 = vmul.f32 %v6531_v9, %v6531_v9  ;;  %v6569_v35 = vpop.eup %5788 }
 0x191   : > { %v1711_v20 = vmul.f32 %v6539_v12, %v6539_v12  ;;  %v2249_v33 = vmul.f32 %v6549_v16, %v2214_v58  ;;  %vm1921_vm11 = vweird.f32 %v6535_v11  ;;  %v6626_v58 = vld [vmem:[%s9076_s7 + $0x98] sm:$0xff]  ;;  %vm1941_vm0 = vweird.f32 %v6569_v35 }
 0x192   : > { %v1913_v18 = vsel %vm1912_vm8, %v5785_v43, %v1909_v14  ;;  %v1916_v19 = vmul.f32 %v6535_v11, %v1915_v15  ;;  %v1767_v27 = vsel %vm1478_vm1, %v1713_v59, 0.0  ;;  %vm6604_vm14 = vmor %vm1920_vm12, %vm1921_vm11  ;;  %vm1950_vm2 = vweird.f32 %v6533_v10 }
 0x193   : > { %v1580_v25 = vpop.xlane.xlu2 %1579  ;;  %v6560_v28 = vpop.xlane.xlu0 %1753  ;;  %v2215_v26 = vmul.f32 %v1913_v18, %v6420_v38  ;;  %1768 = vadd.xlane.f32.xlu0 %v1767_v27  ;;  %v1761_v31 = vsel %vm1478_vm1, %v1711_v20, 0.0  ;;  %1588 = vadd.xlane.f32.xlu1 %v1587_v21  ;;  %v2284_v23 = vadd.f32 %v6567_v34, %v2249_v33  ;;  %v6630_v18 = vld [vmem:[%s9076_s7 + $0x88] sm:$0xff]  ;;  %v1599_v21 = vsel %vm1478_vm1, %v6626_v58, 0.0  ;;  %v6648_v33 = vld [vmem:[%s9076_s7 + $0xa0] sm:$0xff]  ;;  %vm1942_vm5 = vmor %vm1940_vm4, %vm1941_vm0 }
 0x194   : > { %v1917_v29 = vmul.f32 0.5, %v1916_v19  ;;  %v1650_v30 = vmul.f32 %v1580_v25, %v6403_v22  ;;  %v1574_v32 = vpop.xlane.xlu1 %1573  ;;  %1762 = vadd.xlane.f32.xlu2 %v1761_v31 }
 0x195   : > { %v1648_v39 = vmul.f32 %v1574_v32, %v6403_v22  ;;  %v2250_v38 = vmul.f32 %v6549_v16, %v2215_v26 }
 0x196   : > { %v6573_v43 = vpop.eup %5790  ;;  %v1918_v45 = vsub.f32 1.5, %v1917_v29  ;;  %v6578_v47 = vsub.f32 %v6467_v1, %v1650_v30  ;;  %v1929_v1 = vmul.f32 %v6504_v41, %v1928_v36 }
 0x197   : > { %v1945_v48 = vmul.f32 %v6573_v43, %v6533_v10  ;;  %v6584_v50 = vsub.f32 %v6470_v2, %v1648_v39  ;;  %v2285_v54 = vadd.f32 %v6567_v34, %v2250_v38  ;;  %v1935_v2 = vmul.f32 %v6569_v35, %v6517_v49  ;;  %v6653_v39 = vld [vmem:[%s9076_s7 + $0x90] sm:$0xff] }
 0x198   : > { %v1919_v53 = vmul.f32 %v6535_v11, %v1918_v45  ;;  %v1714_v56 = vmul.f32 %v6578_v47, %v6578_v47  ;;  %v1933_v14 = vsel %vm6594_vm13, %v6504_v41, %v1929_v1  ;;  %vm1951_vm15 = vweird.f32 %v6573_v43 }
 0x199   : > { %v1712_v57 = vmul.f32 %v6584_v50, %v6584_v50  ;;  %v2358_v61 = vpack.c.bf16 %v2285_v54, %v2284_v23  ;;  %v1946_v0 = vmul.f32 %v6573_v43, %v1945_v48  ;;  %v1936_v15 = vmul.f32 %v6569_v35, %v1935_v2  ;;  %vm1952_vm3 = vmor %vm1950_vm2, %vm1951_vm15  ;;  %v6672_v2 = vld [vmem:[%s9076_s7 + $0xa8] sm:$0xff] }
 0x19a   : > { %v1923_v63 = vsel %vm6604_vm14, %v6535_v11, %v1919_v53  ;;  %v1770_v3 = vsel %vm1478_vm1, %v1714_v56, 0.0  ;;  %v2217_v20 = vmul.f32 %v1933_v14, %v6418_v37  ;;  %v1596_v23 = vsel %vm1478_vm1, %v6653_v39, 0.0 }
 0x19b   : > { %v1764_v4 = vsel %vm1478_vm1, %v1712_v57, 0.0  ;;  %v1583_v5 = vpop.xlane.xlu0 %1582  ;;  %5528 = vmatmul.msk.bf16.vlgmr.msra.gmra.mxu1 %vm1478_vm1, %v2358_v61  ;;  %1771 = vadd.xlane.f32.xlu0 %v1770_v3  ;;  %v2216_v17 = vmul.f32 %v1923_v63, %v6430_v44  ;;  %v1947_v59 = vmul.f32 0.5, %v1946_v0  ;;  %v1937_v41 = vmul.f32 0.5, %v1936_v15  ;;  %v6681_v61 = vld [vmem:[%s9076_s7 + $0xb0] sm:$0xff] }
 0x19c   : > { %v1651_v7 = vmul.f32 %v1583_v5, %v6403_v22  ;;  %1765 = vadd.xlane.f32.xlu2 %v1764_v4  ;;  %1591 = vadd.xlane.f32.xlu1 %v1590_v62  ;;  %v2252_v37 = vmul.f32 %v6549_v16, %v2217_v20  ;;  %v1605_v49 = vsel %vm1478_vm1, %v6672_v2, 0.0 }
 0x19d   : > { %v2251_v44 = vmul.f32 %v6549_v16, %v2216_v17  ;;  %v1948_v27 = vsub.f32 1.5, %v1947_v59  ;;  %v1938_v30 = vsub.f32 1.5, %v1937_v41 }
 0x19e   : > { %v6623_v11 = vsub.f32 %v6478_v6, %v1651_v7  ;;  %v1593_v6 = vsel %vm1478_vm1, %v6630_v18, 0.0  ;;  %v2287_v38 = vadd.f32 %v6567_v34, %v2252_v37 }
 0x19f   : > { %v2286_v32 = vadd.f32 %v6567_v34, %v2251_v44  ;;  %v1949_v36 = vmul.f32 %v6573_v43, %v1948_v27  ;;  %v1939_v48 = vmul.f32 %v6569_v35, %v1938_v30 }
 0x1a0   : > { %v1715_v19 = vmul.f32 %v6623_v11, %v6623_v11 }
 0x1a1   : > { %v2359_v53 = vpack.c.bf16 %v2287_v38, %v2286_v32  ;;  %v1953_v1 = vsel %vm1952_vm3, %v6573_v43, %v1949_v36  ;;  %v1943_v10 = vsel %vm1942_vm5, %v6569_v35, %v1939_v48 }
 0x1a2   : > { %v1773_v25 = vsel %vm1478_vm1, %v1715_v19, 0.0  ;;  %v2219_v55 = vmul.f32 %v1953_v1, %v6442_v51  ;;  %v2218_v56 = vmul.f32 %v1943_v10, %v6422_v40  ;;  %v1608_v51 = vsel %vm1478_vm1, %v6681_v61, 0.0 }
 0x1a3   : > { %v1586_v26 = vpop.xlane.xlu0 %1585  ;;  %1600 = vadd.xlane.f32.xlu0 %v1599_v21  ;;  %v1836_v40 = vmul.f32 %v6560_v28, %v6403_v22 }
 0x1a4   : > { %v1652_v29 = vmul.f32 %v1586_v26, %v6403_v22  ;;  %1594 = vadd.xlane.f32.xlu2 %v1593_v6  ;;  %1774 = vadd.xlane.f32.xlu1 %v1773_v25  ;;  %v2254_v57 = vmul.f32 %v6549_v16, %v2219_v55  ;;  %v2253_v43 = vmul.f32 %v6549_v16, %v2218_v56 }
 0x1a5   : > { %v1868_v63 = vadd.f32 1e-05, %v1836_v40 }
 0x1a6   : > { %v6644_v31 = vsub.f32 %v6483_v8, %v1652_v29  ;;  %v1602_v8 = vsel %vm1478_vm1, %v6648_v33, 0.0  ;;  %v2289_v46 = vadd.f32 %v6567_v34, %v2254_v57  ;;  %v2288_v35 = vadd.f32 %v6567_v34, %v2253_v43 }
 0x1a7   : > { %5792 = vrsqrt.f32 %v1868_v63  ;;  %vm1960_vm7 = vweird.f32 %v1868_v63 }
 0x1a8   : > { %v1716_v45 = vmul.f32 %v6644_v31, %v6644_v31  ;;  %v2360_v62 = vpack.c.bf16 %v2289_v46, %v2288_v35 }
 0x1aa   : > { %v1776_v54 = vsel %vm1478_vm1, %v1716_v45, 0.0 }
 0x1ab   : > { %5529 = vmatmul.msk.bf16.gmra.mxu1 %vm1478_vm1, %v2359_v53  ;;  %1603 = vadd.xlane.f32.xlu0 %v1602_v8 }
 0x1ac   : > { %1597 = vadd.xlane.f32.xlu2 %v1596_v23  ;;  %1777 = vadd.xlane.f32.xlu1 %v1776_v54 }
 0x1ad   : > { %v5793_v0 = vpop.eup %5792 }
 0x1ae   : > { %v1955_v3 = vmul.f32 %v5793_v0, %v1868_v63  ;;  %vm1961_vm6 = vweird.f32 %v5793_v0 }
 0x1af   : > { %vm6691_vm8 = vmor %vm1960_vm7, %vm1961_vm6 }
 0x1b0   : > { %v1956_v7 = vmul.f32 %v5793_v0, %v1955_v3 }
 0x1b2   : > { %v1957_v15 = vmul.f32 0.5, %v1956_v7 }
 0x1b4   : > { %1606 = vadd.xlane.f32.xlu1 %v1605_v49  ;;  %v1958_v19 = vsub.f32 1.5, %v1957_v15 }
 0x1b6   : > { %v1959_v28 = vmul.f32 %v5793_v0, %v1958_v19 }
 0x1b8   : > { %v1963_v32 = vsel %vm6691_vm8, %v5793_v0, %v1959_v28 }
 0x1b9   : > { %v2220_v10 = vmul.f32 %v1963_v32, %v6457_v60 }
 0x1bb   : > { %5530 = vmatmul.msk.bf16.gmra.mxu1 %vm1478_vm1, %v2360_v62  ;;  %v2255_v62 = vmul.f32 %v6549_v16, %v2220_v10 }
 0x1bc   : > { %1609 = vadd.xlane.f32.xlu1 %v1608_v51 }
 0x1bd   : > { %v2290_v15 = vadd.f32 %v6567_v34, %v2255_v62 }
 0x1f6   : > { %v1757_v4 = vpop.xlane.xlu1 %1756 }
 0x1f7   : > { %v1837_v5 = vmul.f32 %v1757_v4, %v6403_v22 }
 0x1f9   : > { %v1869_v14 = vadd.f32 1e-05, %v1837_v5 }
 0x1fb   : > { %5794 = vrsqrt.f32 %v1869_v14  ;;  %vm1970_vm10 = vweird.f32 %v1869_v14 }
 0x1fe   : > { %v1760_v17 = vpop.xlane.xlu1 %1759 }
 0x1ff   : > { %v1838_v20 = vmul.f32 %v1760_v17, %v6403_v22 }
 0x201   : > { %v5795_v59 = vpop.eup %5794  ;;  %v1870_v21 = vadd.f32 1e-05, %v1838_v20 }
 0x202   : > { %v1965_v41 = vmul.f32 %v5795_v59, %v1869_v14  ;;  %vm1971_vm9 = vweird.f32 %v5795_v59 }
 0x203   : > { %5796 = vrsqrt.f32 %v1870_v21  ;;  %vm1972_vm11 = vmor %vm1970_vm10, %vm1971_vm9  ;;  %vm1980_vm13 = vweird.f32 %v1870_v21 }
 0x204   : > { %v1966_v6 = vmul.f32 %v5795_v59, %v1965_v41 }
 0x206   : > { %v1967_v25 = vmul.f32 0.5, %v1966_v6  ;;  %v1769_v44 = vpop.xlane.xlu0 %1768  ;;  %v1589_v37 = vpop.xlane.xlu1 %1588 }
 0x207   : > { %v1763_v29 = vpop.xlane.xlu2 %1762  ;;  %v1841_v30 = vmul.f32 %v1769_v44, %v6403_v22  ;;  %v1653_v38 = vmul.f32 %v1589_v37, %v6403_v22 }
 0x208   : > { %v1968_v26 = vsub.f32 1.5, %v1967_v25  ;;  %v1839_v36 = vmul.f32 %v1763_v29, %v6403_v22 }
 0x209   : > { %v6700_v48 = vadd.f32 1e-05, %v1841_v30  ;;  %v6702_v8 = vpop.eup %5796  ;;  %v6707_v23 = vsub.f32 %v6542_v13, %v1653_v38 }
 0x20a   : > { %v1969_v45 = vmul.f32 %v5795_v59, %v1968_v26  ;;  %v6704_v53 = vadd.f32 1e-05, %v1839_v36  ;;  %v1975_v1 = vmul.f32 %v6702_v8, %v1870_v21  ;;  %vm1981_vm12 = vweird.f32 %v6702_v8 }
 0x20b   : > { %5798 = vrsqrt.f32 %v6700_v48  ;;  %v1717_v55 = vmul.f32 %v6707_v23, %v6707_v23  ;;  %vm6742_vm14 = vmor %vm1980_vm13, %vm1981_vm12  ;;  %vm2010_vm3 = vweird.f32 %v6700_v48 }
 0x20c   : > { %v1973_v54 = vsel %vm1972_vm11, %v5795_v59, %v1969_v45  ;;  %5800 = vrsqrt.f32 %v6704_v53  ;;  %v1976_v56 = vmul.f32 %v6702_v8, %v1975_v1  ;;  %vm1990_vm15 = vweird.f32 %v6704_v53 }
 0x20d   : > { %v2221_v49 = vmul.f32 %v1973_v54, %v6496_v24  ;;  %v1779_v57 = vsel %vm1478_vm1, %v1717_v55, 0.0  ;;  %v6766_v54 = vld [vmem:[%s9076_s7 + $0xb8] sm:$0xff] }
 0x20e   : > { %v1772_v13 = vpop.xlane.xlu0 %1771  ;;  %v1977_v43 = vmul.f32 0.5, %v1976_v56  ;;  %1780 = vadd.xlane.f32.xlu2 %v1779_v57 }
 0x20f   : > { %v1766_v46 = vpop.xlane.xlu2 %1765  ;;  %v1592_v35 = vpop.xlane.xlu1 %1591  ;;  %v2256_v60 = vmul.f32 %v6549_v16, %v2221_v49  ;;  %v1842_v7 = vmul.f32 %v1772_v13, %v6403_v22 }
 0x210   : > { %v1840_v51 = vmul.f32 %v1766_v46, %v6403_v22  ;;  %v1654_v40 = vmul.f32 %v1592_v35, %v6403_v22  ;;  %v1978_v0 = vsub.f32 1.5, %v1977_v43 }
 0x211   : > { %v6722_v63 = vpop.eup %5798  ;;  %v2291_v24 = vadd.f32 %v6567_v34, %v2256_v60  ;;  %v6740_v41 = vadd.f32 1e-05, %v1842_v7 }
 0x212   : > { %v5801_v3 = vpop.eup %5800  ;;  %v6725_v4 = vadd.f32 1e-05, %v1840_v51  ;;  %v6728_v5 = vsub.f32 %v6587_v52, %v1654_v40  ;;  %v1979_v17 = vmul.f32 %v6702_v8, %v1978_v0  ;;  %v2005_v59 = vmul.f32 %v6722_v63, %v6700_v48 }
 0x213   : > { %v1985_v14 = vmul.f32 %v5801_v3, %v6704_v53  ;;  %v2361_v20 = vpack.c.bf16 %v2291_v24, %v2290_v15  ;;  %vm1991_vm0 = vweird.f32 %v5801_v3  ;;  %vm2011_vm4 = vweird.f32 %v6722_v63 }
 0x214   : > { %5802 = vrsqrt.f32 %v6725_v4  ;;  %v1718_v52 = vmul.f32 %v6728_v5, %v6728_v5  ;;  %v1983_v21 = vsel %vm6742_vm14, %v6702_v8, %v1979_v17  ;;  %v2006_v37 = vmul.f32 %v6722_v63, %v2005_v59  ;;  %vm1992_vm2 = vmor %vm1990_vm15, %vm1991_vm0  ;;  %v6803_v59 = vld [vmem:[%s9076_s7 + $0xc0] sm:$0xff] }
 0x215   : > { %v1986_v19 = vmul.f32 %v5801_v3, %v1985_v14  ;;  %5531 = vmatmul.msk.bf16.gmra.mxu1 %vm1478_vm1, %v2361_v20  ;;  %5804 = vrsqrt.f32 %v6740_v41  ;;  %v2222_v53 = vmul.f32 %v1983_v21, %v6507_v42  ;;  %vm2000_vm5 = vweird.f32 %v6725_v4  ;;  %vm6817_vm7 = vmor %vm2010_vm3, %vm2011_vm4 }
 0x216   : > { %v1601_v6 = vpop.xlane.xlu0 %1600  ;;  %v1782_v27 = vsel %vm1478_vm1, %v1718_v52, 0.0  ;;  %v2007_v56 = vmul.f32 0.5, %v2006_v37  ;;  %vm2020_vm9 = vweird.f32 %v6740_v41 }
 0x217   : > { %v1987_v25 = vmul.f32 0.5, %v1986_v19  ;;  %v1595_v44 = vpop.xlane.xlu2 %1594  ;;  %v1775_v26 = vpop.xlane.xlu1 %1774  ;;  %v1657_v29 = vmul.f32 %v1601_v6, %v6403_v22  ;;  %1783 = vadd.xlane.f32.xlu2 %v1782_v27  ;;  %v2257_v40 = vmul.f32 %v6549_v16, %v2222_v53 }
 0x218   : > { %v1655_v30 = vmul.f32 %v1595_v44, %v6403_v22  ;;  %v1843_v32 = vmul.f32 %v1775_v26, %v6403_v22  ;;  %v2008_v24 = vsub.f32 1.5, %v2007_v56  ;;  %v1614_v26 = vsel %vm1478_vm1, %v6803_v59, 0.0 }
 0x219   : > { %v1988_v36 = vsub.f32 1.5, %v1987_v25  ;;  %v6763_v8 = vsub.f32 %v6626_v58, %v1657_v29  ;;  %v1611_v58 = vsel %vm1478_vm1, %v6766_v54, 0.0  ;;  %v2292_v52 = vadd.f32 %v6567_v34, %v2257_v40 }
 0x21a   : > { %v6756_v38 = vpop.eup %5802  ;;  %v6760_v45 = vsub.f32 %v6630_v18, %v1655_v30  ;;  %v6770_v55 = vadd.f32 1e-05, %v1843_v32 }
 0x21b   : > { %v1989_v1 = vmul.f32 %v5801_v3, %v1988_v36  ;;  %v1995_v10 = vmul.f32 %v6756_v38, %v6725_v4  ;;  %v1721_v43 = vmul.f32 %v6763_v8, %v6763_v8  ;;  %v6787_v0 = vpop.eup %5804  ;;  %vm2001_vm6 = vweird.f32 %v6756_v38 }
 0x21c   : > { %v1719_v49 = vmul.f32 %v6760_v45, %v6760_v45  ;;  %5806 = vrsqrt.f32 %v6770_v55  ;;  %v2009_v4 = vmul.f32 %v6722_v63, %v2008_v24  ;;  %v2015_v28 = vmul.f32 %v6787_v0, %v6740_v41  ;;  %vm6825_vm8 = vmor %vm2000_vm5, %vm2001_vm6 }
 0x21d   : > { %v1993_v18 = vsel %vm1992_vm2, %v5801_v3, %v1989_v1  ;;  %v1996_v57 = vmul.f32 %v6756_v38, %v1995_v10  ;;  %v1791_v7 = vsel %vm1478_vm1, %v1721_v43, 0.0  ;;  %vm2021_vm10 = vweird.f32 %v6787_v0 }
 0x21e   : > { %v1785_v13 = vsel %vm1478_vm1, %v1719_v49, 0.0  ;;  %v1604_v46 = vpop.xlane.xlu0 %1603  ;;  %v2223_v51 = vmul.f32 %v1993_v18, %v6539_v12  ;;  %1792 = vadd.xlane.f32.xlu1 %v1791_v7  ;;  %v2013_v32 = vsel %vm6817_vm7, %v6722_v63, %v2009_v4  ;;  %v2016_v36 = vmul.f32 %v6787_v0, %v2015_v28  ;;  %v6850_v49 = vld [vmem:[%s9076_s7 + $0xc8] sm:$0xff]  ;;  %v6853_v18 = vld [vmem:[%s9076_s7 + $0xd8] sm:$0xff]  ;;  %v6876_v7 = vld [vmem:[%s9076_s7 + $0xd0] sm:$0xff] }
 0x21f   : > { %v1997_v42 = vmul.f32 0.5, %v1996_v57  ;;  %1786 = vadd.xlane.f32.xlu0 %v1785_v13  ;;  %v1598_v35 = vpop.xlane.xlu2 %1597  ;;  %v6782_v62 = vpop.xlane.xlu1 %1777  ;;  %v1658_v60 = vmul.f32 %v1604_v46, %v6403_v22  ;;  %1612 = vadd.xlane.f32.xlu2 %v1611_v58  ;;  %v2225_v63 = vmul.f32 %v2013_v32, %v6531_v9  ;;  %vm6882_vm12 = vmor %vm2020_vm9, %vm2021_vm10  ;;  %vm2030_vm13 = vweird.f32 %v6770_v55 }
 0x220   : > { %v1656_v3 = vmul.f32 %v1598_v35, %v6403_v22  ;;  %v2258_v12 = vmul.f32 %v6549_v16, %v2223_v51  ;;  %v2017_v57 = vmul.f32 0.5, %v2016_v36 }
 0x221   : > { %v1998_v14 = vsub.f32 1.5, %v1997_v42  ;;  %v6794_v15 = vsub.f32 %v6648_v33, %v1658_v60  ;;  %v2260_v9 = vmul.f32 %v6549_v16, %v2225_v63 }
 0x222   : > { %v6800_v17 = vsub.f32 %v6653_v39, %v1656_v3  ;;  %v6805_v19 = vpop.eup %5806  ;;  %v2293_v33 = vadd.f32 %v6567_v34, %v2258_v12  ;;  %v2018_v35 = vsub.f32 1.5, %v2017_v57  ;;  %v6901_v39 = vld [vmem:[%s9076_s7 + $0xe8] sm:$0xff] }
 0x223   : > { %v1999_v20 = vmul.f32 %v6756_v38, %v1998_v14  ;;  %v1722_v6 = vmul.f32 %v6794_v15, %v6794_v15  ;;  %v2025_v25 = vmul.f32 %v6805_v19, %v6770_v55  ;;  %vm2031_vm11 = vweird.f32 %v6805_v19  ;;  %v6879_v14 = vld [vmem:[%s9076_s7 + $0xe0] sm:$0xff] }
 0x224   : > { %v2362_v27 = vpack.c.bf16 %v2293_v33, %v2292_v52  ;;  %v1720_v21 = vmul.f32 %v6800_v17, %v6800_v17  ;;  %v2295_v3 = vadd.f32 %v6567_v34, %v2260_v9  ;;  %v2019_v41 = vmul.f32 %v6787_v0, %v2018_v35  ;;  %vm2032_vm14 = vmor %vm2030_vm13, %vm2031_vm11 }
 0x225   : > { %v2003_v48 = vsel %vm6825_vm8, %v6756_v38, %v1999_v20  ;;  %v2026_v29 = vmul.f32 %v6805_v19, %v2025_v25  ;;  %v1794_v37 = vsel %vm1478_vm1, %v1722_v6, 0.0  ;;  %v1620_v33 = vsel %vm1478_vm1, %v6876_v7, 0.0 }
 0x226   : > { %5532 = vmatmul.msk.bf16.gmra.mxu1 %vm1478_vm1, %v2362_v27  ;;  %v1788_v38 = vsel %vm1478_vm1, %v1720_v21, 0.0  ;;  %1795 = vadd.xlane.f32.xlu1 %v1794_v37  ;;  %v2224_v10 = vmul.f32 %v2003_v48, %v6584_v50  ;;  %v1617_v50 = vsel %vm1478_vm1, %v6850_v49, 0.0  ;;  %v1626_v4 = vsel %vm1478_vm1, %v6879_v14, 0.0 }
 0x227   : > { %v1607_v30 = vpop.xlane.xlu1 %1606  ;;  %1615 = vadd.xlane.f32.xlu2 %v1614_v26  ;;  %1789 = vadd.xlane.f32.xlu0 %v1788_v38  ;;  %v2027_v53 = vmul.f32 0.5, %v2026_v29  ;;  %v2023_v55 = vsel %vm6882_vm12, %v6787_v0, %v2019_v41  ;;  %v1629_v25 = vsel %vm1478_vm1, %v6901_v39, 0.0  ;;  %v6910_v0 = vld [vmem:[%s9076_s7 + $0xf0] sm:$0xff] }
 0x228   : > { %v1659_v1 = vmul.f32 %v1607_v30, %v6403_v22  ;;  %v2259_v13 = vmul.f32 %v6549_v16, %v2224_v10  ;;  %v2226_v28 = vmul.f32 %v2023_v55, %v6578_v47  ;;  %v1844_v47 = vmul.f32 %v6782_v62, %v6403_v22 }
 0x229   : > { %v2028_v43 = vsub.f32 1.5, %v2027_v53 }
 0x22a   : > { %v6847_v56 = vsub.f32 %v6672_v2, %v1659_v1  ;;  %v1623_v2 = vsel %vm1478_vm1, %v6853_v18, 0.0  ;;  %v2294_v51 = vadd.f32 %v6567_v34, %v2259_v13  ;;  %v2261_v27 = vmul.f32 %v6549_v16, %v2226_v28 }
 0x22b   : > { %v2029_v40 = vmul.f32 %v6805_v19, %v2028_v43  ;;  %v1876_v21 = vadd.f32 1e-05, %v1844_v47 }
 0x22c   : > { %v1723_v58 = vmul.f32 %v6847_v56, %v6847_v56  ;;  %v2296_v48 = vadd.f32 %v6567_v34, %v2261_v27 }
 0x22d   : > { %v2033_v52 = vsel %vm2032_vm14, %v6805_v19, %v2029_v40  ;;  %5808 = vrsqrt.f32 %v1876_v21  ;;  %vm2040_vm0 = vweird.f32 %v1876_v21 }
 0x22e   : > { %v1797_v46 = vsel %vm1478_vm1, %v1723_v58, 0.0  ;;  %1624 = vadd.xlane.f32.xlu1 %v1623_v2  ;;  %v2227_v19 = vmul.f32 %v2033_v52, %v6623_v11  ;;  %v1632_v11 = vsel %vm1478_vm1, %v6910_v0, 0.0 }
 0x22f   : > { %v1610_v42 = vpop.xlane.xlu1 %1609  ;;  %1798 = vadd.xlane.f32.xlu2 %v1797_v46  ;;  %1618 = vadd.xlane.f32.xlu0 %v1617_v50 }
 0x230   : > { %v1660_v60 = vmul.f32 %v1610_v42, %v6403_v22  ;;  %v2262_v44 = vmul.f32 %v6549_v16, %v2227_v19 }
 0x232   : > { %v6872_v24 = vsub.f32 %v6681_v61, %v1660_v60  ;;  %v2363_v61 = vpack.c.bf16 %v2295_v3, %v2294_v51  ;;  %v2297_v26 = vadd.f32 %v6567_v34, %v2262_v44 }
 0x233   : > { %v5809_v37 = vpop.eup %5808 }
 0x234   : > { %v1724_v20 = vmul.f32 %v6872_v24, %v6872_v24  ;;  %v2364_v29 = vpack.c.bf16 %v2297_v26, %v2296_v48  ;;  %v2035_v30 = vmul.f32 %v5809_v37, %v1876_v21  ;;  %vm2041_vm15 = vweird.f32 %v5809_v37 }
 0x235   : > { %vm2042_vm2 = vmor %vm2040_vm0, %vm2041_vm15 }
 0x236   : > { %v1800_v6 = vsel %vm1478_vm1, %v1724_v20, 0.0  ;;  %5533 = vmatmul.msk.bf16.gmra.mxu1 %vm1478_vm1, %v2363_v61  ;;  %1627 = vadd.xlane.f32.xlu1 %v1626_v4  ;;  %v2036_v32 = vmul.f32 %v5809_v37, %v2035_v30  ;;  %v6931_v61 = vpop.f32.mrf.mxu1 }
 0x237   : > { %1801 = vadd.xlane.f32.xlu2 %v1800_v6  ;;  %1621 = vadd.xlane.f32.xlu0 %v1620_v33 }
 0x238   : > { %v2037_v10 = vmul.f32 0.5, %v2036_v32 }
 0x23a   : > { %v2038_v53 = vsub.f32 1.5, %v2037_v10 }
 0x23c   : > { %v2039_v13 = vmul.f32 %v5809_v37, %v2038_v53 }
 0x23e   : > { %v2043_v46 = vsel %vm2042_vm2, %v5809_v37, %v2039_v13  ;;  %v6961_v53 = vpop.f32.mrf.mxu1 }
 0x23f   : > { %1630 = vadd.xlane.f32.xlu2 %v1629_v25  ;;  %v2228_v12 = vmul.f32 %v2043_v46, %v6644_v31 }
 0x246   : > { %5534 = vmatmul.msk.bf16.gmra.mxu1 %vm1478_vm1, %v2364_v29 }
 0x247   : > { %1633 = vadd.xlane.f32.xlu2 %v1632_v11 }
 0x281   : > { %v1781_v36 = vpop.xlane.xlu2 %1780 }
 0x282   : > { %v1845_v38 = vmul.f32 %v1781_v36, %v6403_v22 }
 0x284   : > { %v1877_v1 = vadd.f32 1e-05, %v1845_v38 }
 0x286   : > { %5810 = vrsqrt.f32 %v1877_v1  ;;  %vm2050_vm4 = vweird.f32 %v1877_v1 }
 0x28a   : > { %v1784_v63 = vpop.xlane.xlu2 %1783 }
 0x28b   : > { %v1846_v57 = vmul.f32 %v1784_v63, %v6403_v22 }
 0x28c   : > { %v5811_v58 = vpop.eup %5810 }
 0x28d   : > { %v2045_v43 = vmul.f32 %v5811_v58, %v1877_v1  ;;  %v6920_v62 = vadd.f32 1e-05, %v1846_v57  ;;  %vm2051_vm3 = vweird.f32 %v5811_v58 }
 0x28e   : > { %vm2052_vm5 = vmor %vm2050_vm4, %vm2051_vm3 }
 0x28f   : > { %v2046_v50 = vmul.f32 %v5811_v58, %v2045_v43  ;;  %5812 = vrsqrt.f32 %v6920_v62  ;;  %vm2060_vm7 = vweird.f32 %v6920_v62 }
 0x291   : > { %v2047_v2 = vmul.f32 0.5, %v2046_v50  ;;  %v1793_v40 = vpop.xlane.xlu1 %1792 }
 0x292   : > { %v1787_v42 = vpop.xlane.xlu0 %1786  ;;  %v1613_v9 = vpop.xlane.xlu2 %1612  ;;  %v1849_v3 = vmul.f32 %v1793_v40, %v6403_v22 }
 0x293   : > { %v1847_v35 = vmul.f32 %v1787_v42, %v6403_v22  ;;  %v2048_v60 = vsub.f32 1.5, %v2047_v2  ;;  %v1661_v51 = vmul.f32 %v1613_v9, %v6403_v22 }
 0x294   : > { %v6938_v4 = vadd.f32 1e-05, %v1849_v3 }
 0x295   : > { %v6926_v41 = vadd.f32 1e-05, %v1847_v35  ;;  %v6929_v20 = vpop.eup %5812  ;;  %v2049_v52 = vmul.f32 %v5811_v58, %v2048_v60  ;;  %v6934_v33 = vsub.f32 %v6766_v54, %v1661_v51  ;;  %v2263_v54 = vmul.f32 %v6549_v16, %v2228_v12 }
 0x296   : > { %v2055_v6 = vmul.f32 %v6929_v20, %v6920_v62  ;;  %vm2061_vm6 = vweird.f32 %v6929_v20  ;;  %vm2090_vm12 = vweird.f32 %v6938_v4 }
 0x297   : > { %5814 = vrsqrt.f32 %v6926_v41  ;;  %v2053_v55 = vsel %vm2052_vm5, %v5811_v58, %v2049_v52  ;;  %v1725_v31 = vmul.f32 %v6934_v33, %v6934_v33  ;;  %v2298_v30 = vadd.f32 %v6567_v34, %v2263_v54  ;;  %vm6974_vm9 = vmor %vm2060_vm7, %vm2061_vm6  ;;  %v7006_v54 = vld [vmem:[%s9076_s7 + $0xf8] sm:$0xff] }
 0x298   : > { %v2056_v19 = vmul.f32 %v6929_v20, %v2055_v6  ;;  %5816 = vrsqrt.f32 %v6938_v4  ;;  %v2229_v28 = vmul.f32 %v2053_v55, %v6707_v23  ;;  %vm2070_vm8 = vweird.f32 %v6926_v41 }
 0x299   : > { %v1803_v25 = vsel %vm1478_vm1, %v1725_v31, 0.0  ;;  %v1796_v29 = vpop.xlane.xlu1 %1795 }
 0x29a   : > { %v2057_v44 = vmul.f32 0.5, %v2056_v19  ;;  %1804 = vadd.xlane.f32.xlu0 %v1803_v25  ;;  %v1616_v27 = vpop.xlane.xlu2 %1615  ;;  %v2264_v26 = vmul.f32 %v6549_v16, %v2229_v28  ;;  %v1790_v11 = vpop.xlane.xlu0 %1789  ;;  %v1850_v57 = vmul.f32 %v1796_v29, %v6403_v22 }
 0x29b   : > { %v1662_v48 = vmul.f32 %v1616_v27, %v6403_v22  ;;  %v1848_v37 = vmul.f32 %v1790_v11, %v6403_v22 }
 0x29c   : > { %v2058_v21 = vsub.f32 1.5, %v2057_v44  ;;  %v2299_v23 = vadd.f32 %v6567_v34, %v2264_v26  ;;  %v6978_v42 = vadd.f32 1e-05, %v1850_v57  ;;  %v7011_v44 = vpop.f32.mrf.mxu1  ;;  %v1635_v26 = vsel %vm1478_vm1, %v7006_v54, 0.0 }
 0x29d   : > { %v5815_v47 = vpop.eup %5814  ;;  %v6957_v38 = vsub.f32 %v6803_v59, %v1662_v48  ;;  %v6959_v1 = vadd.f32 1e-05, %v1848_v37 }
 0x29e   : > { %v2065_v32 = vmul.f32 %v5815_v47, %v6926_v41  ;;  %v6954_v36 = vpop.eup %5816  ;;  %v2365_v10 = vpack.c.bf16 %v2299_v23, %v2298_v30  ;;  %v2059_v58 = vmul.f32 %v6929_v20, %v2058_v21  ;;  %vm2071_vm10 = vweird.f32 %v5815_v47 }
 0x29f   : > { %v2085_v13 = vmul.f32 %v6954_v36, %v6938_v4  ;;  %5818 = vrsqrt.f32 %v6959_v1  ;;  %v1726_v59 = vmul.f32 %v6957_v38, %v6957_v38  ;;  %vm6992_vm11 = vmor %vm2070_vm8, %vm2071_vm10  ;;  %vm2091_vm13 = vweird.f32 %v6954_v36 }
 0x2a0   : > { %v2066_v63 = vmul.f32 %v5815_v47, %v2065_v32  ;;  %5535 = vmatmul.msk.bf16.gmra.mxu1 %vm1478_vm1, %v2365_v10  ;;  %v2063_v62 = vsel %vm6974_vm9, %v6929_v20, %v2059_v58  ;;  %5820 = vrsqrt.f32 %v6978_v42  ;;  %vm2080_vm14 = vweird.f32 %v6959_v1  ;;  %vm7048_vm0 = vmor %vm2090_vm12, %vm2091_vm13 }
 0x2a1   : > { %v1625_v35 = vpop.xlane.xlu1 %1624  ;;  %v1806_v51 = vsel %vm1478_vm1, %v1726_v59, 0.0  ;;  %v2086_v12 = vmul.f32 %v6954_v36, %v2085_v13  ;;  %v2230_v41 = vmul.f32 %v2063_v62, %v6728_v5  ;;  %vm2100_vm3 = vweird.f32 %v6978_v42 }
 0x2a2   : > { %v2067_v43 = vmul.f32 0.5, %v2066_v63  ;;  %v1799_v50 = vpop.xlane.xlu2 %1798  ;;  %v1619_v60 = vpop.xlane.xlu0 %1618  ;;  %v1665_v40 = vmul.f32 %v1625_v35, %v6403_v22  ;;  %1807 = vadd.xlane.f32.xlu0 %v1806_v51 }
 0x2a3   : > { %v1851_v9 = vmul.f32 %v1799_v50, %v6403_v22  ;;  %v1663_v3 = vmul.f32 %v1619_v60, %v6403_v22  ;;  %v2265_v37 = vmul.f32 %v6549_v16, %v2230_v41 }
 0x2a4   : > { %v2068_v2 = vsub.f32 1.5, %v2067_v43  ;;  %v6997_v20 = vsub.f32 %v6853_v18, %v1665_v40  ;;  %v2087_v18 = vmul.f32 0.5, %v2086_v12 }
 0x2a5   : > { %v6988_v6 = vadd.f32 1e-05, %v1851_v9  ;;  %v7000_v31 = vsub.f32 %v6850_v49, %v1663_v3  ;;  %v5819_v19 = vpop.eup %5818  ;;  %v7059_v3 = vpop.f32.mrf.mxu1 }
 0x2a6   : > { %v2069_v52 = vmul.f32 %v5815_v47, %v2068_v2  ;;  %v2075_v25 = vmul.f32 %v5819_v19, %v6959_v1  ;;  %v1729_v49 = vmul.f32 %v6997_v20, %v6997_v20  ;;  %v7027_v63 = vpop.eup %5820  ;;  %v2088_v57 = vsub.f32 1.5, %v2087_v18 }
 0x2a7   : > { %5822 = vrsqrt.f32 %v6988_v6  ;;  %v1727_v29 = vmul.f32 %v7000_v31, %v7000_v31  ;;  %vm2081_vm15 = vweird.f32 %v5819_v19  ;;  %v2300_v2 = vadd.f32 %v6567_v34, %v2265_v37 }
 0x2a8   : > { %v2073_v28 = vsel %vm6992_vm11, %v5815_v47, %v2069_v52  ;;  %v2076_v27 = vmul.f32 %v5819_v19, %v2075_v25  ;;  %v1815_v11 = vsel %vm1478_vm1, %v1729_v49, 0.0  ;;  %v2089_v35 = vmul.f32 %v6954_v36, %v2088_v57  ;;  %vm2082_vm2 = vmor %vm2080_vm14, %vm2081_vm15 }
 0x2a9   : > { %v2231_v5 = vmul.f32 %v2073_v28, %v6760_v45  ;;  %v1628_v47 = vpop.xlane.xlu1 %1627  ;;  %1816 = vadd.xlane.f32.xlu2 %v1815_v11  ;;  %v1809_v32 = vsel %vm1478_vm1, %v1727_v29, 0.0  ;;  %vm2101_vm4 = vweird.f32 %v7027_v63  ;;  %vm2110_vm7 = vweird.f32 %v6988_v6 }
 0x2aa   : > { %v7017_v48 = vpop.xlane.xlu2 %1801  ;;  %v1622_v21 = vpop.xlane.xlu0 %1621  ;;  %v2077_v30 = vmul.f32 0.5, %v2076_v27  ;;  %v1666_v23 = vmul.f32 %v1628_v47, %v6403_v22  ;;  %1636 = vadd.xlane.f32.xlu0 %v1635_v26  ;;  %1810 = vadd.xlane.f32.xlu1 %v1809_v32  ;;  %v2093_v28 = vsel %vm7048_vm0, %v6954_v36, %v2089_v35  ;;  %vm2102_vm6 = vmor %vm2100_vm3, %vm2101_vm4  ;;  %vm2605_vm0 = vcmask 64512  }
 0x2ab   : > { %v1664_v10 = vmul.f32 %v1622_v21, %v6403_v22  ;;  %v2266_v45 = vmul.f32 %v6549_v16, %v2231_v5  ;;  %v2233_v27 = vmul.f32 %v2093_v28, %v6763_v8 }
 0x2ac   : > { %v2078_v13 = vsub.f32 1.5, %v2077_v30  ;;  %v7035_v43 = vsub.f32 %v6879_v14, %v1666_v23  ;;  %v7092_v23 = vld [vmem:[#allocation2] sm:$0xff] }
 0x2ad   : > { %v7031_v58 = vpop.eup %5822  ;;  %v7038_v59 = vsub.f32 %v6876_v7, %v1664_v10  ;;  %v2301_v9 = vadd.f32 %v6567_v34, %v2266_v45  ;;  %v2095_v7 = vmul.f32 %v7027_v63, %v6978_v42  ;;  %v2268_v47 = vmul.f32 %v6549_v16, %v2233_v27  ;;  %v7080_v21 = vpop.f32.mrf.mxu1  ;;  %v7117_v14 = vld [vmem:[%s9082_s25] ss:$0 sm:$0xff]  ;;  %s9124_s25 = sld [smem:[#allocation20_spill]] }
 0x2ae   : > { %v2105_v50 = vmul.f32 %v7031_v58, %v6988_v6  ;;  %v2079_v46 = vmul.f32 %v5819_v19, %v2078_v13  ;;  %v1730_v1 = vmul.f32 %v7035_v43, %v7035_v43  ;;  %vm2111_vm5 = vweird.f32 %v7031_v58 }
 0x2af   : > { %v1728_v60 = vmul.f32 %v7038_v59, %v7038_v59  ;;  %v2366_v51 = vpack.c.bf16 %v2301_v9, %v2300_v2  ;;  %v2096_v41 = vmul.f32 %v7027_v63, %v2095_v7  ;;  %v2303_v32 = vadd.f32 %v6567_v34, %v2268_v47  ;;  %vm2112_vm8 = vmor %vm2110_vm7, %vm2111_vm5  ;;  %v7112_v9 = vld [vmem:[%s9081_s13] ss:$0 sm:$0xff]  ;;  %s6118_s13 = smov 96  }
 0x2b0   : > { %v2106_v62 = vmul.f32 %v7031_v58, %v2105_v50  ;;  %v2083_v4 = vsel %vm2082_vm2, %v5819_v19, %v2079_v46  ;;  %v1818_v52 = vsel %vm1478_vm1, %v1730_v1, 0.0  ;;  %v1479_v57 = vsel %vm1478_vm1, %v7092_v23, 0.0 }
 0x2b1   : > { %v1812_v55 = vsel %vm1478_vm1, %v1728_v60, 0.0  ;;  %5536 = vmatmul.msk.bf16.gmra.mxu1 %vm1478_vm1, %v2366_v51  ;;  %v2232_v19 = vmul.f32 %v2083_v4, %v6800_v17  ;;  %v2097_v26 = vmul.f32 0.5, %v2096_v41 }
 0x2b2   : > { %v1631_v40 = vpop.xlane.xlu2 %1630  ;;  %1819 = vadd.xlane.f32.xlu0 %v1818_v52  ;;  %1813 = vadd.xlane.f32.xlu1 %v1812_v55  ;;  %v2107_v18 = vmul.f32 0.5, %v2106_v62 }
 0x2b3   : > { %v1667_v12 = vmul.f32 %v1631_v40, %v6403_v22  ;;  %v2267_v36 = vmul.f32 %v6549_v16, %v2232_v19  ;;  %v2098_v17 = vsub.f32 1.5, %v2097_v26  ;;  %v1852_v40 = vmul.f32 %v7017_v48, %v6403_v22 }
 0x2b4   : > { %v2108_v11 = vsub.f32 1.5, %v2107_v18 }
 0x2b5   : > { %v7070_v25 = vsub.f32 %v6901_v39, %v1667_v12  ;;  %v2302_v8 = vadd.f32 %v6567_v34, %v2267_v36  ;;  %v7102_v34 = vld [vmem:[#allocation2 + $0x8] sm:$0xff]  ;;  %v7106_v50 = vpop.f32.mrf.mxu1  ;;  %v1884_v4 = vadd.f32 1e-05, %v1852_v40 }
 0x2b6   : > { %v2109_v30 = vmul.f32 %v7031_v58, %v2108_v11  ;;  %v1482_v46 = vsel %vm1478_vm1, %v7102_v34, 0.0 }
 0x2b7   : > { %v1731_v49 = vmul.f32 %v7070_v25, %v7070_v25  ;;  %v2367_v10 = vpack.c.bf16 %v2303_v32, %v2302_v8  ;;  %5824 = vrsqrt.f32 %v1884_v4  ;;  %vm2120_vm10 = vweird.f32 %v1884_v4 }
 0x2b8   : > { %v2113_v45 = vsel %vm2112_vm8, %v7031_v58, %v2109_v30 }
 0x2b9   : > { %v1821_v5 = vsel %vm1478_vm1, %v1731_v49, 0.0  ;;  %v2235_v6 = vmul.f32 %v2113_v45, %v6847_v56 }
 0x2ba   : > { %v1634_v29 = vpop.xlane.xlu2 %1633  ;;  %1822 = vadd.xlane.f32.xlu1 %v1821_v5 }
 0x2bb   : > { %v1668_v39 = vmul.f32 %v1634_v29, %v6403_v22  ;;  %v2270_v58 = vmul.f32 %v7112_v9, %v2235_v6 }
 0x2bd   : > { %v7083_v37 = vsub.f32 %v6910_v0, %v1668_v39  ;;  %v2099_v0 = vmul.f32 %v7027_v63, %v2098_v17  ;;  %v7120_v7 = vpop.f32.mrf.mxu1  ;;  %v5825_v52 = vpop.eup %5824 }
 0x2be   : > { %v2115_v28 = vmul.f32 %v5825_v52, %v1884_v4  ;;  %vm2121_vm9 = vweird.f32 %v5825_v52 }
 0x2bf   : > { %v1732_v16 = vmul.f32 %v7083_v37, %v7083_v37  ;;  %v2103_v13 = vsel %vm2102_vm6, %v7027_v63, %v2099_v0  ;;  %v2305_v63 = vadd.f32 %v7117_v14, %v2270_v58  ;;  %vm7141_vm11 = vmor %vm2120_vm10, %vm2121_vm9 }
 0x2c0   : > { %v2234_v2 = vmul.f32 %v2103_v13, %v6794_v15  ;;  %v2116_v18 = vmul.f32 %v5825_v52, %v2115_v28 }
 0x2c1   : > { %v1824_v42 = vsel %vm1478_vm1, %v1732_v16, 0.0  ;;  %5537 = vmatmul.msk.bf16.gmra.mxu1 %vm1478_vm1, %v2367_v10 }
 0x2c2   : > { %1825 = vadd.xlane.f32.xlu2 %v1824_v42  ;;  %1480 = vadd.xlane.f32.xlu1 %v1479_v57  ;;  %v2269_v35 = vmul.f32 %v7112_v9, %v2234_v2  ;;  %v2117_v27 = vmul.f32 0.5, %v2116_v18  ;;  %v7148_v42 = vld [vmem:[%s9106_s3] ss:$0 sm:$0xff]  ;;  %s9125_s3 = scalar_lea.vmem %s9124_s25, %s6322_s10  ;;  %s6123_s25 = smov 16  }
 0x2c4   : > { %v2304_v56 = vadd.f32 %v7117_v14, %v2269_v35  ;;  %v2118_v5 = vsub.f32 1.5, %v2117_v27 }
 0x2c5   : > { %v7124_v60 = vpop.f32.mrf.mxu1 }
 0x2c6   : > { %v2368_v1 = vpack.c.bf16 %v2305_v63, %v2304_v56  ;;  %v2119_v17 = vmul.f32 %v5825_v52, %v2118_v5 }
 0x2c8   : > { %v2123_v10 = vsel %vm7141_vm11, %v5825_v52, %v2119_v17 }
 0x2c9   : > { %v2236_v52 = vmul.f32 %v2123_v10, %v6872_v24 }
 0x2ca   : > { %1483 = vadd.xlane.f32.xlu2 %v1482_v46 }
 0x2cd   : > { %v7126_v15 = vpop.f32.mrf.mxu1 }
 0x2d1   : > { %5538 = vmatmul.msk.bf16.gmra.mxu1 %vm1478_vm1, %v2368_v1 }
 0x2d5   : > { %v7128_v62 = vpop.f32.mrf.mxu1 }
 0x2dd   : > { %v7130_v51 = vpop.f32.mrf.mxu1 }
 0x2e5   : > { %v7134_v12 = vpop.f32.mrf.mxu1 }
 0x2ed   : > { %v2481_v55 = vpop.f32.mrf.mxu1 }
 0x2f5   : > { %v2483_v26 = vpop.f32.mrf.mxu1 }
 0x2f6   : > { %v2484_v27 = vadd.f32 %v7148_v42, %v2483_v26 }
 0x2f8   : > { %v2546_v10 = vpack.c.bf16 %v2484_v27, %v2484_v27 }
 0x30d   : > { %v1805_v41 = vpop.xlane.xlu0 %1804 }
 0x30e   : > { %v1853_v19 = vmul.f32 %v1805_v41, %v6403_v22 }
 0x310   : > { %v1885_v49 = vadd.f32 1e-05, %v1853_v19 }
 0x312   : > { %5826 = vrsqrt.f32 %v1885_v49  ;;  %vm2130_vm13 = vweird.f32 %v1885_v49 }
 0x315   : > { %v1808_v48 = vpop.xlane.xlu0 %1807 }
 0x316   : > { %v1854_v11 = vmul.f32 %v1808_v48, %v6403_v22 }
 0x318   : > { %v5827_v29 = vpop.eup %5826  ;;  %v7138_v47 = vadd.f32 1e-05, %v1854_v11  ;;  %v2271_v11 = vmul.f32 %v7112_v9, %v2236_v52  ;;  %v2479_v52 = vadd.f32 %v7148_v42, %v7134_v12 }
 0x319   : > { %v2125_v36 = vmul.f32 %v5827_v29, %v1885_v49  ;;  %vm2131_vm12 = vweird.f32 %v5827_v29 }
 0x31a   : > { %5828 = vrsqrt.f32 %v7138_v47  ;;  %vm2132_vm14 = vmor %vm2130_vm13, %vm2131_vm12  ;;  %vm2140_vm2 = vweird.f32 %v7138_v47 }
 0x31b   : > { %v2126_v39 = vmul.f32 %v5827_v29, %v2125_v36 }
 0x31c   : > { %v1817_v0 = vpop.xlane.xlu2 %1816 }
 0x31d   : > { %v2127_v8 = vmul.f32 0.5, %v2126_v39  ;;  %v2486_v30 = vpop.f32.mrf.mxu1  ;;  %v1857_v57 = vmul.f32 %v1817_v0, %v6403_v22  ;;  %v1811_v45 = vpop.xlane.xlu1 %1810  ;;  %v2482_v39 = vadd.f32 %v7148_v42, %v2481_v55  ;;  %v2306_v55 = vadd.f32 %v7117_v14, %v2271_v11 }
 0x31e   : > { %v1637_v13 = vpop.xlane.xlu0 %1636  ;;  %v1855_v46 = vmul.f32 %v1811_v45, %v6403_v22  ;;  %v2487_v35 = vadd.f32 %v7148_v42, %v2486_v30 }
 0x31f   : > { %v2128_v32 = vsub.f32 1.5, %v2127_v8  ;;  %v1669_v2 = vmul.f32 %v1637_v13, %v6403_v22  ;;  %v7155_v58 = vadd.f32 1e-05, %v1857_v57 }
 0x320   : > { %v7158_v63 = vpop.eup %5828  ;;  %v7160_v1 = vadd.f32 1e-05, %v1855_v46  ;;  %v2547_v49 = vpack.c.bf16 %v2487_v35, %v2487_v35  ;;  %v2545_v46 = vpack.c.bf16 %v2482_v39, %v2482_v39 }
 0x321   : > { %v2129_v6 = vmul.f32 %v5827_v29, %v2128_v32  ;;  %v7163_v40 = vsub.f32 %v7006_v54, %v1669_v2  ;;  %v2135_v4 = vmul.f32 %v7158_v63, %v7138_v47  ;;  %5830 = vrsqrt.f32 %v7155_v58 }
 0x322   : > { %5832 = vrsqrt.f32 %v7160_v1  ;;  %v2595_v16 = vunpack.c.l.b16 %v2547_v49  ;;  %vm2141_vm15 = vweird.f32 %v7158_v63  ;;  %v2593_v27 = vunpack.c.l.b16 %v2545_v46 }
 0x323   : > { %v2133_v56 = vsel %vm2132_vm14, %v5827_v29, %v2129_v6  ;;  %v1733_v28 = vmul.f32 %v7163_v40, %v7163_v40  ;;  %v2136_v18 = vmul.f32 %v7158_v63, %v2135_v4  ;;  %vm2142_vm3 = vmor %vm2140_vm2, %vm2141_vm15  ;;  %vm2150_vm4 = vweird.f32 %v7160_v1 }
 0x324   : > { %v2237_v19 = vmul.f32 %v2133_v56, %v6934_v33  ;;  %vm2170_vm7 = vweird.f32 %v7155_v58 }
 0x325   : > { %v2488_v41 = vpop.f32.mrf.mxu1  ;;  %v1827_v29 = vsel %vm1478_vm1, %v1733_v28, 0.0  ;;  %v2137_v24 = vmul.f32 0.5, %v2136_v18  ;;  %v1814_v48 = vpop.xlane.xlu1 %1813  ;;  %v2594_v28 = vunpack.c.l.b16 %v2546_v10 }
 0x326   : > { %v2489_v54 = vadd.f32 %v7148_v42, %v2488_v41  ;;  %v2272_v5 = vmul.f32 %v7112_v9, %v2237_v19  ;;  %1828 = vadd.xlane.f32.xlu0 %v1827_v29  ;;  %v1856_v33 = vmul.f32 %v1814_v48, %v6403_v22  ;;  %v1820_v17 = vpop.xlane.xlu0 %1819  ;;  %v2544_v48 = vpack.c.bf16 %v2479_v52, %v2479_v52 }
 0x327   : > { %v7181_v8 = vpop.eup %5830  ;;  %v2138_v30 = vsub.f32 1.5, %v2137_v24  ;;  %v1858_v13 = vmul.f32 %v1820_v17, %v6403_v22 }
 0x328   : > { %v2548_v36 = vpack.c.bf16 %v2489_v54, %v2489_v54  ;;  %v2307_v32 = vadd.f32 %v7117_v14, %v2272_v5  ;;  %v5833_v0 = vpop.eup %5832  ;;  %v7184_v57 = vadd.f32 1e-05, %v1856_v33  ;;  %v2165_v35 = vmul.f32 %v7181_v8, %v7155_v58 }
 0x329   : > { %v2145_v45 = vmul.f32 %v5833_v0, %v7160_v1  ;;  %v2139_v2 = vmul.f32 %v7158_v63, %v2138_v30  ;;  %v7201_v18 = vadd.f32 1e-05, %v1858_v13  ;;  %v2477_v54 = vadd.f32 %v7148_v42, %v7130_v51 }
 0x32a   : > { %v2596_v26 = vunpack.c.l.b16 %v2548_v36  ;;  %5834 = vrsqrt.f32 %v7184_v57  ;;  %v2369_v4 = vpack.c.bf16 %v2307_v32, %v2306_v55  ;;  %v2166_v29 = vmul.f32 %v7181_v8, %v2165_v35 }
 0x32b   : > { %v2146_v56 = vmul.f32 %v5833_v0, %v2145_v45  ;;  %v2143_v47 = vsel %vm2142_vm3, %v7158_v63, %v2139_v2  ;;  %vm2151_vm5 = vweird.f32 %v5833_v0  ;;  %v7214_v36 = vpack.c.b16 %v2594_v28, %v2593_v27 }
 0x32c   : > { %v7188_v6 = vpack.c.b16 %v2596_v26, %v2595_v16  ;;  %5539 = vmatmul.msk.bf16.gmra.mxu1 %vm1478_vm1, %v2369_v4  ;;  %5836 = vrsqrt.f32 %v7201_v18  ;;  %v2543_v33 = vpack.c.bf16 %v2477_v54, %v2477_v54  ;;  %v2238_v63 = vmul.f32 %v2143_v47, %v6957_v38  ;;  %vm2152_vm6 = vmor %vm2150_vm4, %vm2151_vm5 }
 0x32d   : > { %v2147_v19 = vmul.f32 0.5, %v2146_v56  ;;  %v1823_v49 = vpop.xlane.xlu1 %1822  ;;  %v2474_v30 = vadd.f32 %v7148_v42, %v7128_v62  ;;  %v2167_v16 = vmul.f32 0.5, %v2166_v29  ;;  %v2592_v10 = vunpack.c.l.b16 %v2544_v48 }
 0x32e   : > { %v2631_v41 = vsel %vm2605_vm0, %v7188_v6, 0  ;;  %v1859_v12 = vmul.f32 %v1823_v49, %v6403_v22  ;;  %v2628_v38 = vsel %vm2605_vm0, %v7214_v36, 0  ;;  %v2472_v1 = vadd.f32 %v7148_v42, %v7126_v15 }
 0x32f   : > { %2633 = vmatpush.bf16.xpose.msra.mxu2 %v2631_v41  ;;  %v2148_v5 = vsub.f32 1.5, %v2147_v19  ;;  %v2591_v46 = vunpack.c.l.b16 %v2543_v33  ;;  %v2273_v62 = vmul.f32 %v7112_v9, %v2238_v63  ;;  %v2542_v56 = vpack.c.bf16 %v2474_v30, %v2474_v30 }
 0x330   : > { %v7212_v24 = vpop.eup %5834  ;;  %v7216_v51 = vadd.f32 1e-05, %v1859_v12  ;;  %vm2171_vm8 = vweird.f32 %v7181_v8  ;;  %vm2160_vm9 = vweird.f32 %v7184_v57  ;;  %v2541_v49 = vpack.c.bf16 %v2472_v1, %v2472_v1 }
 0x331   : > { %v2149_v11 = vmul.f32 %v5833_v0, %v2148_v5  ;;  %v2155_v39 = vmul.f32 %v7212_v24, %v7184_v57  ;;  %v7242_v28 = vpack.c.b16 %v2592_v10, %v2591_v46  ;;  %vm2161_vm10 = vweird.f32 %v7212_v24  ;;  %vm7261_vm11 = vmor %vm2170_vm7, %vm2171_vm8 }
 0x332   : > { %5838 = vrsqrt.f32 %v7216_v51  ;;  %v7238_v35 = vpop.eup %5836  ;;  %v2308_v54 = vadd.f32 %v7117_v14, %v2273_v62  ;;  %v2590_v48 = vunpack.c.l.b16 %v2542_v56  ;;  %vm7268_vm12 = vmor %vm2160_vm9, %vm2161_vm10  ;;  %vm2180_vm13 = vweird.f32 %v7201_v18 }
 0x333   : > { %v2153_v26 = vsel %vm2152_vm6, %v5833_v0, %v2149_v11  ;;  %v2156_v32 = vmul.f32 %v7212_v24, %v2155_v39  ;;  %v2175_v29 = vmul.f32 %v7238_v35, %v7201_v18  ;;  %vm2181_vm14 = vweird.f32 %v7238_v35 }
 0x334   : > { %v2239_v45 = vmul.f32 %v2153_v26, %v7000_v31  ;;  %v2168_v31 = vsub.f32 1.5, %v2167_v16  ;;  %v2467_v26 = vadd.f32 %v7148_v42, %v7120_v7  ;;  %vm7317_vm2 = vmor %vm2180_vm13, %vm2181_vm14  ;;  %vm2190_vm3 = vweird.f32 %v7216_v51 }
 0x335   : > { %v7225_v17 = vpop.xlane.xlu2 %1825  ;;  %v2157_v13 = vmul.f32 0.5, %v2156_v32  ;;  %v1481_v55 = vpop.xlane.xlu1 %1480  ;;  %v2589_v32 = vunpack.c.l.b16 %v2541_v49  ;;  %v2459_v18 = vadd.f32 %v7148_v42, %v7059_v3 }
 0x336   : > { %v1492_v2 = vmul.f32 %v6403_v22, %v1481_v55  ;;  %v2274_v0 = vmul.f32 %v7112_v9, %v2239_v45  ;;  %v2169_v47 = vmul.f32 %v7181_v8, %v2168_v31  ;;  %v2176_v45 = vmul.f32 %v7238_v35, %v2175_v29 }
 0x337   : > { %2634 = vmatpush.bf16.xpose.msra.mxu2 %v2628_v38  ;;  %v2158_v4 = vsub.f32 1.5, %v2157_v13  ;;  %v7289_v38 = vpack.c.b16 %v2590_v48, %v2589_v32  ;;  %v2539_v55 = vpack.c.bf16 %v2467_v26, %v2467_v26  ;;  %v2452_v31 = vadd.f32 %v7148_v42, %v6931_v61 }
 0x338   : > { %v7240_v52 = vpop.eup %5838  ;;  %v7247_v15 = vsub.f32 %v7092_v23, %v1492_v2  ;;  %v2309_v27 = vadd.f32 %v7117_v14, %v2274_v0  ;;  %v2469_v23 = vadd.f32 %v7148_v42, %v7124_v60  ;;  %v2625_v60 = vsel %vm2605_vm0, %v7242_v28, 0 }
 0x339   : > { %v2159_v41 = vmul.f32 %v7212_v24, %v2158_v4  ;;  %v2185_v19 = vmul.f32 %v7240_v52, %v7216_v51  ;;  %v2173_v10 = vsel %vm7261_vm11, %v7181_v8, %v2169_v47  ;;  %v2454_v2 = vadd.f32 %v7148_v42, %v6961_v53 }
 0x33a   : > { %v1496_v12 = vmul.f32 %v7247_v15, %v7247_v15  ;;  %v2370_v39 = vpack.c.bf16 %v2309_v27, %v2308_v54  ;;  %v2241_v7 = vmul.f32 %v2173_v10, %v6997_v20  ;;  %v2464_v8 = vadd.f32 %v7148_v42, %v7106_v50 }
 0x33b   : > { %v2163_v63 = vsel %vm7268_vm12, %v7212_v24, %v2159_v41  ;;  %v2186_v30 = vmul.f32 %v7240_v52, %v2185_v19  ;;  %v2540_v24 = vpack.c.bf16 %v2469_v23, %v2469_v23  ;;  %v2177_v62 = vmul.f32 0.5, %v2176_v45 }
 0x33c   : > { %v1498_v33 = vsel %vm1478_vm1, %v1496_v12, 0.0  ;;  %5540 = vmatmul.msk.bf16.gmra.mxu1 %vm1478_vm1, %v2370_v39  ;;  %v2462_v4 = vadd.f32 %v7148_v42, %v7080_v21  ;;  %v2587_v53 = vunpack.c.l.b16 %v2539_v55  ;;  %v2276_v41 = vmul.f32 %v7112_v9, %v2241_v7  ;;  %v2491_v55 = vpop.f32.mrf.mxu1 }
 0x33d   : > { %v1484_v58 = vpop.xlane.xlu2 %1483  ;;  %1499 = vadd.xlane.f32.xlu0 %v1498_v33  ;;  %v2187_v13 = vmul.f32 0.5, %v2186_v30  ;;  %v2588_v0 = vunpack.c.l.b16 %v2540_v24  ;;  %v2534_v50 = vpack.c.bf16 %v2454_v2, %v2454_v2  ;;  %v2538_v19 = vpack.c.bf16 %v2464_v8, %v2464_v8 }
 0x33e   : > { %v1493_v5 = vmul.f32 %v6403_v22, %v1484_v58  ;;  %v2178_v49 = vsub.f32 1.5, %v2177_v62  ;;  %v2533_v61 = vpack.c.bf16 %v2452_v31, %v2452_v31  ;;  %vm2191_vm15 = vweird.f32 %v7240_v52 }
 0x33f   : > { %2635 = vmatpush.bf16.xpose.msra.mxu2 %v2625_v60  ;;  %v2188_v20 = vsub.f32 1.5, %v2187_v13  ;;  %v7308_v54 = vpack.c.b16 %v2588_v0, %v2587_v53  ;;  %v2537_v21 = vpack.c.bf16 %v2462_v4, %v2462_v4  ;;  %v2311_v12 = vadd.f32 %v7117_v14, %v2276_v41  ;;  %vm2192_vm4 = vmor %vm2190_vm3, %vm2191_vm15 }
 0x340   : > { %v7280_v16 = vsub.f32 %v7102_v34, %v1493_v5  ;;  %v2240_v34 = vmul.f32 %v2163_v63, %v7038_v59  ;;  %v2622_v59 = vsel %vm2605_vm0, %v7289_v38, 0  ;;  %v2582_v23 = vunpack.c.l.b16 %v2534_v50 }
 0x341   : > { %v2189_v58 = vmul.f32 %v7240_v52, %v2188_v20  ;;  %v2179_v47 = vmul.f32 %v7238_v35, %v2178_v49  ;;  %v2586_v29 = vunpack.c.l.b16 %v2538_v19  ;;  %v2619_v48 = vsel %vm2605_vm0, %v7308_v54, 0 }
 0x342   : > { %v1497_v1 = vmul.f32 %v7280_v16, %v7280_v16  ;;  %v2275_v56 = vmul.f32 %v7112_v9, %v2240_v34  ;;  %v2581_v11 = vunpack.c.l.b16 %v2533_v61  ;;  %v2457_v33 = vadd.f32 %v7148_v42, %v7011_v44 }
 0x343   : > { %v2193_v39 = vsel %vm2192_vm4, %v7240_v52, %v2189_v58  ;;  %v2585_v60 = vunpack.c.l.b16 %v2537_v21  ;;  %v2183_v3 = vsel %vm7317_vm2, %v7238_v35, %v2179_v47  ;;  %v2536_v63 = vpack.c.bf16 %v2459_v18, %v2459_v18 }
 0x344   : > { %v1501_v46 = vsel %vm1478_vm1, %v1497_v1, 0.0  ;;  %v2310_v27 = vadd.f32 %v7117_v14, %v2275_v56  ;;  %v7330_v51 = vpack.c.b16 %v2582_v23, %v2581_v11  ;;  %v2243_v26 = vmul.f32 %v2193_v39, %v7070_v25 }
 0x345   : > { %1502 = vadd.xlane.f32.xlu1 %v1501_v46  ;;  %v7335_v30 = vpack.c.b16 %v2586_v29, %v2585_v60  ;;  %v2535_v52 = vpack.c.bf16 %v2457_v33, %v2457_v33  ;;  %v2242_v44 = vmul.f32 %v2183_v3, %v7035_v43  ;;  %v2584_v32 = vunpack.c.l.b16 %v2536_v63  ;;  %v2493_v46 = vpop.f32.mrf.mxu1 }
 0x346   : > { %v2371_v5 = vpack.c.bf16 %v2311_v12, %v2310_v27  ;;  %9113 = vst [vmem:[#allocation50_spill] sm:$0xff] %v7330_v51  ;;  %v2278_v45 = vmul.f32 %v7112_v9, %v2243_v26  ;;  %v2610_v7 = vsel %vm2605_vm0, %v7330_v51, 0  ;;  %v2494_v2 = vadd.f32 %v7148_v42, %v2493_v46 }
 0x347   : > { %2636 = vmatpush.bf16.xpose.msra.mxu2 %v2622_v59  ;;  %9114 = vst [vmem:[#allocation51_spill] sm:$0xff] %v7335_v30  ;;  %v2616_v10 = vsel %vm2605_vm0, %v7335_v30, 0  ;;  %v2583_v35 = vunpack.c.l.b16 %v2535_v52  ;;  %v2277_v24 = vmul.f32 %v7112_v9, %v2242_v44  ;;  %v2492_v8 = vadd.f32 %v7148_v42, %v2491_v55 }
 0x348   : > { %v2313_v25 = vadd.f32 %v7117_v14, %v2278_v45  ;;  %v2550_v62 = vpack.c.bf16 %v2494_v2, %v2494_v2  ;;  %v1860_v4 = vmul.f32 %v7225_v17, %v6403_v22  ;;  %vm3048_vm3 = vcmask 130112  }
 0x349   : > { %v7345_v34 = vpack.c.b16 %v2584_v32, %v2583_v35  ;;  %v2312_v43 = vadd.f32 %v7117_v14, %v2277_v24  ;;  %v2549_v0 = vpack.c.bf16 %v2492_v8, %v2492_v8  ;;  %vm3271_vm4 = vcmask 195712  }
 0x34a   : > { %v2663_v59 = vunpack.c.l.b16 %v2550_v62  ;;  %v1892_v41 = vadd.f32 1e-05, %v1860_v4 }
 0x34b   : > { %9115 = vst [vmem:[#allocation52_spill] sm:$0xff] %v7345_v34  ;;  %v2372_v1 = vpack.c.bf16 %v2313_v25, %v2312_v43  ;;  %v2613_v13 = vsel %vm2605_vm0, %v7345_v34, 0  ;;  %v2662_v56 = vunpack.c.l.b16 %v2549_v0 }
 0x34c   : > { %5541 = vmatmul.msk.bf16.gmra.mxu1 %vm1478_vm1, %v2371_v5  ;;  %5840 = vrsqrt.f32 %v1892_v41  ;;  %vm2200_vm6 = vweird.f32 %v1892_v41 }
 0x34d   : > { %v7372_v31 = vpack.c.b16 %v2663_v59, %v2662_v56  ;;  %v2496_v20 = vpop.f32.mrf.mxu1 }
 0x34e   : > { %v2497_v19 = vadd.f32 %v7148_v42, %v2496_v20 }
 0x34f   : > { %2637 = vmatpush.bf16.xpose.msra.mxu2 %v2619_v48 }
 0x350   : > { %v2551_v27 = vpack.c.bf16 %v2497_v19, %v2497_v19 }
 0x351   : > { %2827 = vrot.lane.b32.xlu0 %v7330_v51, %s6115_s1 }
 0x352   : > { %v5841_v58 = vpop.eup %5840  ;;  %v2664_v21 = vunpack.c.l.b16 %v2551_v27 }
 0x353   : > { %v2195_v17 = vmul.f32 %v5841_v58, %v1892_v41  ;;  %vm2201_vm5 = vweird.f32 %v5841_v58  ;;  %v5654_v41 = vld [vmem:[%s9116_s15] sm:$0xff] }
 0x354   : > { %vm2202_vm7 = vmor %vm2200_vm6, %vm2201_vm5  ;;  %vm3494_vm5 = vcmask 261312  }
 0x355   : > { %v2498_v53 = vpop.f32.mrf.mxu1  ;;  %v2196_v23 = vmul.f32 %v5841_v58, %v2195_v17 }
 0x356   : > { %v2499_v50 = vadd.f32 %v7148_v42, %v2498_v53 }
 0x357   : > { %2638 = vmatpush.bf16.xpose.msra.mxu2 %v2616_v10  ;;  %v2197_v29 = vmul.f32 0.5, %v2196_v23 }
 0x358   : > { %v2552_v49 = vpack.c.bf16 %v2499_v50, %v2499_v50 }
 0x359   : > { %3059 = vrot.lane.b32.xlu0 %v7308_v54, %s6116_s0  ;;  %v2198_v48 = vsub.f32 1.5, %v2197_v29 }
 0x35a   : > { %v2665_v61 = vunpack.c.l.b16 %v2552_v49 }
 0x35b   : > { %v2199_v33 = vmul.f32 %v5841_v58, %v2198_v48 }
 0x35c   : > { %5542 = vmatmul.msk.bf16.gmra.mxu1 %vm1478_vm1, %v2372_v1  ;;  %v7386_v12 = vpack.c.b16 %v2665_v61, %v2664_v21  ;;  %v5655_v1 = vld [vmem:[%s9116_s15 + $0x8] sm:$0xff]  ;;  %s6120_s15 = smov 80  }
 0x35d   : > { %v7390_v47 = vpop.f32.mrf.mxu1  ;;  %v2203_v63 = vsel %vm2202_vm7, %v5841_v58, %v2199_v33  ;;  %2348 = vmatpush.bf16.msra.mxu0 %v5655_v1 }
 0x35e   : > { %2829 = vrot.lane.b32.xlu1 %v7345_v34, %s6115_s1  ;;  %v2244_v52 = vmul.f32 %v2203_v63, %v7083_v37 }
 0x35f   : > { %2639 = vmatpush.bf16.xpose.msra.mxu2 %v2613_v13 }
 0x360   : > { %v2279_v35 = vmul.f32 %v7112_v9, %v2244_v52  ;;  %v5764_v52 = vld [vmem:[%s9120_s26] ss:$0 sm:$0xff]  ;;  %s9141_s26 = sld [smem:[#allocation48_spill]] }
 0x361   : > { %2835 = vrot.lane.b32.xlu0 %v7289_v38, %s6115_s1  ;;  %2349 = vmatpush.bf16.msra.mxu0 %v5654_v41 }
 0x362   : > { %v2314_v37 = vadd.f32 %v7117_v14, %v2279_v35 }
 0x365   : > { %v7393_v11 = vpop.f32.mrf.mxu1 }
 0x366   : > { %3055 = vrot.lane.b32.xlu1 %v7345_v34, %s6116_s0 }
 0x367   : > { %2640 = vmatpush.bf16.xpose.msra.mxu2 %v2610_v7 }
 0x369   : > { %2839 = vrot.lane.b32.xlu0 %v7214_v36, %s6115_s1 }
 0x36e   : > { %2831 = vrot.lane.b32.xlu1 %v7335_v30, %s6115_s1 }
 0x371   : > { %3288 = vrot.lane.b32.xlu0 %v7214_v36, %s6117_s11 }
 0x376   : > { %2833 = vrot.lane.b32.xlu1 %v7308_v54, %s6115_s1 }
 0x379   : > { %2888 = vrot.lane.b32.xlu0 %v7372_v31, %s6115_s1 }
 0x37e   : > { %3061 = vrot.lane.b32.xlu1 %v7289_v38, %s6116_s0 }
 0x386   : > { %2837 = vrot.lane.b32.xlu1 %v7242_v28, %s6115_s1 }
 0x38e   : > { %3290 = vrot.lane.b32.xlu1 %v7188_v6, %s6117_s11 }
 0x396   : > { %2890 = vrot.lane.b32.xlu1 %v7386_v12, %s6115_s1 }
 0x399   : > { %v1829_v57 = vpop.xlane.xlu0 %1828 }
 0x39a   : > { %v1861_v18 = vmul.f32 %v1829_v57, %v6403_v22 }
 0x39c   : > { %v1893_v5 = vadd.f32 1e-05, %v1861_v18 }
 0x39e   : > { %5842 = vrsqrt.f32 %v1893_v5  ;;  %vm2210_vm8 = vweird.f32 %v1893_v5 }
 0x3a4   : > { %v5843_v39 = vpop.eup %5842 }
 0x3a5   : > { %v2205_v60 = vmul.f32 %v5843_v39, %v1893_v5  ;;  %vm2211_vm9 = vweird.f32 %v5843_v39 }
 0x3a6   : > { %vm2212_vm10 = vmor %vm2210_vm8, %vm2211_vm9 }
 0x3a7   : > { %v2206_v3 = vmul.f32 %v5843_v39, %v2205_v60 }
 0x3a9   : > { %v2207_v26 = vmul.f32 0.5, %v2206_v3  ;;  %v2506_v32 = vpop.f32.mrf.mxu1 }
 0x3aa   : > { %v2507_v25 = vadd.f32 %v7148_v42, %v2506_v32 }
 0x3ab   : > { %v2208_v44 = vsub.f32 1.5, %v2207_v26 }
 0x3ac   : > { %v2555_v46 = vpack.c.bf16 %v2507_v25, %v2507_v25 }
 0x3ad   : > { %v2209_v10 = vmul.f32 %v5843_v39, %v2208_v44 }
 0x3ae   : > { %v2668_v56 = vunpack.c.l.b16 %v2555_v46 }
 0x3af   : > { %v2213_v45 = vsel %vm2212_vm10, %v5843_v39, %v2209_v10 }
 0x3b0   : > { %v2245_v24 = vmul.f32 %v2213_v45, %v7163_v40  ;;  %v1500_v43 = vpop.xlane.xlu0 %1499 }
 0x3b1   : > { %v1504_v13 = vmul.f32 %v1500_v43, %v6403_v22  ;;  %v2508_v7 = vpop.f32.mrf.mxu1 }
 0x3b2   : > { %v2280_v55 = vmul.f32 %v7112_v9, %v2245_v24  ;;  %v2509_v8 = vadd.f32 %v7148_v42, %v2508_v7 }
 0x3b3   : > { %v1506_v2 = vadd.f32 1e-05, %v1504_v13 }
 0x3b4   : > { %v2315_v62 = vadd.f32 %v7117_v14, %v2280_v55  ;;  %v2556_v40 = vpack.c.bf16 %v2509_v8, %v2509_v8 }
 0x3b5   : > { %5844 = vrsqrt.f32 %v1506_v2  ;;  %vm1514_vm11 = vweird.f32 %v1506_v2 }
 0x3b6   : > { %v2373_v0 = vpack.c.bf16 %v2315_v62, %v2314_v37  ;;  %v2669_v20 = vunpack.c.l.b16 %v2556_v40 }
 0x3b8   : > { %v1503_v59 = vpop.xlane.xlu1 %1502  ;;  %5543 = vmatmul.msk.bf16.gmra.mxu1 %vm1478_vm1, %v2373_v0  ;;  %v7407_v4 = vpack.c.b16 %v2669_v20, %v2668_v56 }
 0x3b9   : > { %v1505_v9 = vmul.f32 %v1503_v59, %v6403_v22  ;;  %v2511_v19 = vpop.f32.mrf.mxu1 }
 0x3ba   : > { %9117 = vst [vmem:[#allocation53_spill] sm:$0xff] %v7407_v4  ;;  %2894 = vrot.lane.b32.xlu0 %v7407_v4, %s6115_s1  ;;  %v2512_v61 = vadd.f32 %v7148_v42, %v2511_v19  ;;  %v2504_v19 = vadd.f32 %v7148_v42, %v7393_v11 }
 0x3bb   : > { %v1507_v53 = vadd.f32 1e-05, %v1505_v9  ;;  %v5845_v50 = vpop.eup %5844 }
 0x3bc   : > { %v1509_v14 = vmul.f32 %v5845_v50, %v1506_v2  ;;  %vm1515_vm12 = vweird.f32 %v5845_v50  ;;  %v2557_v29 = vpack.c.bf16 %v2512_v61, %v2512_v61 }
 0x3bd   : > { %5846 = vrsqrt.f32 %v1507_v53  ;;  %vm1516_vm13 = vmor %vm1514_vm11, %vm1515_vm12  ;;  %vm1524_vm15 = vweird.f32 %v1507_v53 }
 0x3be   : > { %v1510_v49 = vmul.f32 %v5845_v50, %v1509_v14  ;;  %v2670_v3 = vunpack.c.l.b16 %v2557_v29  ;;  %v2502_v14 = vadd.f32 %v7148_v42, %v7390_v47 }
 0x3c0   : > { %v1511_v27 = vmul.f32 0.5, %v1510_v49  ;;  %v2554_v49 = vpack.c.bf16 %v2504_v19, %v2504_v19 }
 0x3c1   : > { %v2513_v23 = vpop.f32.mrf.mxu1 }
 0x3c2   : > { %v1512_v21 = vsub.f32 1.5, %v1511_v27  ;;  %3117 = vrot.lane.b32.xlu0 %v7407_v4, %s6116_s0  ;;  %v2514_v5 = vadd.f32 %v7148_v42, %v2513_v23  ;;  %v2553_v27 = vpack.c.bf16 %v2502_v14, %v2502_v14  ;;  %v2667_v61 = vunpack.c.l.b16 %v2554_v49 }
 0x3c3   : > { %v5847_v58 = vpop.eup %5846 }
 0x3c4   : > { %v1519_v17 = vmul.f32 %v5847_v58, %v1507_v53  ;;  %v1513_v57 = vmul.f32 %v5845_v50, %v1512_v21  ;;  %v2558_v33 = vpack.c.bf16 %v2514_v5, %v2514_v5  ;;  %vm1525_vm14 = vweird.f32 %v5847_v58 }
 0x3c5   : > { %vm1526_vm2 = vmor %vm1524_vm15, %vm1525_vm14 }
 0x3c6   : > { %v1520_v18 = vmul.f32 %v5847_v58, %v1519_v17  ;;  %v1517_v48 = vsel %vm1516_vm13, %v5845_v50, %v1513_v57  ;;  %v2671_v63 = vunpack.c.l.b16 %v2558_v33 }
 0x3c7   : > { %v1528_v26 = vmul.f32 %v1517_v48, %v7247_v15  ;;  %v5765_v15 = vld [vmem:[%s9122_s9] ss:$0 sm:$0xff]  ;;  %s9147_s9 = scalar_lea.vmem %s6212_s20, %s6322_s10 }
 0x3c8   : > { %v1521_v39 = vmul.f32 0.5, %v1520_v18  ;;  %v7420_v32 = vpack.c.b16 %v2671_v63, %v2670_v3 }
 0x3c9   : > { %v2516_v10 = vpop.f32.mrf.mxu1  ;;  %v1533_v24 = vmul.f32 %v5764_v52, %v1528_v26 }
 0x3ca   : > { %v1522_v60 = vsub.f32 1.5, %v1521_v39  ;;  %9121 = vst [vmem:[#allocation54_spill] sm:$0xff] %v7420_v32  ;;  %3119 = vrot.lane.b32.xlu1 %v7420_v32, %s6116_s0  ;;  %2896 = vrot.lane.b32.xlu0 %v7420_v32, %s6115_s1  ;;  %v2517_v43 = vadd.f32 %v7148_v42, %v2516_v10 }
 0x3cb   : > { %v1538_v1 = vadd.f32 %v5765_v15, %v1533_v24 }
 0x3cc   : > { %v1523_v44 = vmul.f32 %v5847_v58, %v1522_v60  ;;  %v2559_v37 = vpack.c.bf16 %v2517_v43, %v2517_v43 }
 0x3ce   : > { %v1527_v45 = vsel %vm1526_vm2, %v5847_v58, %v1523_v44  ;;  %v2666_v58 = vunpack.c.l.b16 %v2553_v27 }
 0x3cf   : > { %v1529_v35 = vmul.f32 %v1527_v45, %v7280_v16  ;;  %v2672_v16 = vunpack.c.l.b16 %v2559_v37 }
 0x3d0   : > { %v7461_v21 = vpack.c.b16 %v2667_v61, %v2666_v58 }
 0x3d1   : > { %v1534_v25 = vmul.f32 %v5764_v52, %v1529_v35  ;;  %v2518_v55 = vpop.f32.mrf.mxu1 }
 0x3d2   : > { %v2519_v46 = vadd.f32 %v7148_v42, %v2518_v55  ;;  %3284 = vrot.lane.b32.xlu1 %v7289_v38, %s6117_s11  ;;  %v2699_v55 = vsel %vm2605_vm0, %v7407_v4, 0  ;;  %v2696_v37 = vsel %vm2605_vm0, %v7461_v21, 0 }
 0x3d3   : > { %v1539_v13 = vadd.f32 %v5765_v15, %v1534_v25  ;;  %v2702_v15 = vsel %vm2605_vm0, %v7420_v32, 0 }
 0x3d4   : > { %v2560_v2 = vpack.c.bf16 %v2519_v46, %v2519_v46  ;;  %v2693_v46 = vsel %vm2605_vm0, %v7386_v12, 0 }
 0x3d5   : > { %v2318_v7 = vpack.c.bf16 %v1539_v13, %v1538_v1  ;;  %v7505_v1 = vpop.permute.xlu1 %2829 }
 0x3d6   : > { %v2673_v8 = vunpack.c.l.b16 %v2560_v2 }
 0x3d7   : > { %5519 = vmatmul.msk.bf16.vlgmr.msra.gmra.mxu0 %vm1478_vm1, %v2318_v7 }
 0x3d8   : > { %v7435_v62 = vpack.c.b16 %v2673_v8, %v2672_v16  ;;  %v2690_v16 = vsel %vm2605_vm0, %v7372_v31, 0 }
 0x3d9   : > { %v2521_v40 = vpop.f32.mrf.mxu1 }
 0x3da   : > { %3113 = vrot.lane.b32.xlu1 %v7386_v12, %s6116_s0  ;;  %2898 = vrot.lane.b32.xlu0 %v7435_v62, %s6115_s1  ;;  %v2522_v56 = vadd.f32 %v7148_v42, %v2521_v40  ;;  %v2705_v26 = vsel %vm2605_vm0, %v7435_v62, 0 }
 0x3dc   : > { %v2561_v9 = vpack.c.bf16 %v2522_v56, %v2522_v56  ;;  %v7570_v56 = vpop.permute.xlu0 %2827 }
 0x3dd   : > { %v7519_v7 = vpop.permute.xlu1 %3055  ;;  %v2847_v22 = vsel %vm2605_vm0, %v7570_v56, 0 }
 0x3de   : > { %v2674_v41 = vunpack.c.l.b16 %v2561_v9 }
 0x3e1   : > { %v2523_v0 = vpop.f32.mrf.mxu1 }
 0x3e2   : > { %3111 = vrot.lane.b32.xlu1 %v7372_v31, %s6116_s0  ;;  %3053 = vrot.lane.b32.xlu0 %v7330_v51, %s6116_s0  ;;  %v2524_v59 = vadd.f32 %v7148_v42, %v2523_v0 }
 0x3e4   : > { %v2562_v20 = vpack.c.bf16 %v2524_v59, %v2524_v59  ;;  %v7580_v9 = vpop.permute.xlu0 %3059 }
 0x3e5   : > { %v7535_v2 = vpop.permute.xlu1 %2831 }
 0x3e6   : > { %v2675_v53 = vunpack.c.l.b16 %v2562_v20 }
 0x3e8   : > { %v7449_v50 = vpack.c.b16 %v2675_v53, %v2674_v41 }
 0x3ea   : > { %3282 = vrot.lane.b32.xlu0 %v7308_v54, %s6117_s11  ;;  %9123 = vst [vmem:[#allocation55_spill] sm:$0xff] %v7449_v50  ;;  %v2708_v33 = vsel %vm2605_vm0, %v7449_v50, 0 }
 0x3ec   : > { %v2836_v19 = vpop.permute.xlu0 %2835 }
 0x3ed   : > { %v7545_v8 = vpop.permute.xlu1 %2833 }
 0x3f2   : > { %3123 = vrot.lane.b32.xlu0 %v7449_v50, %s6116_s0 }
 0x3f4   : > { %v2840_v27 = vpop.permute.xlu0 %2839 }
 0x3f5   : > { %v7552_v40 = vpop.permute.xlu1 %3061 }
 0x3fa   : > { %3280 = vrot.lane.b32.xlu0 %v7335_v30, %s6117_s11 }
 0x3fd   : > { %v7558_v0 = vpop.permute.xlu1 %2837 }
 0x402   : > { %3278 = vrot.lane.b32.xlu0 %v7345_v34, %s6117_s11 }
 0x405   : > { %v7568_v59 = vpop.permute.xlu1 %3290 }
 0x40a   : > { %3338 = vrot.lane.b32.xlu0 %v7461_v21, %s6117_s11 }
 0x40d   : > { %v7576_v20 = vpop.permute.xlu1 %2890 }
 0x412   : > { %3346 = vrot.lane.b32.xlu0 %v7449_v50, %s6117_s11 }
 0x41a   : > { %3334 = vrot.lane.b32.xlu0 %v7372_v31, %s6117_s11 }
 0x422   : > { %2756 = vrot.lane.b32.xlu0 %v7242_v28, %s6118_s13 }
 0x42a   : > { %2752 = vrot.lane.b32.xlu0 %v7308_v54, %s6118_s13 }
 0x432   : > { %2791 = vrot.lane.b32.xlu0 %v7420_v32, %s6118_s13 }
 0x435   : > { %v2526_v47 = vpop.f32.mrf.mxu1 }
 0x436   : > { %v2527_v11 = vadd.f32 %v7148_v42, %v2526_v47  ;;  %v7608_v47 = vpop.permute.xlu0 %3288 }
 0x438   : > { %v2563_v23 = vpack.c.bf16 %v2527_v11, %v2527_v11 }
 0x43a   : > { %2972 = vrot.lane.b32.xlu0 %v7308_v54, %s6119_s29  ;;  %v2676_v29 = vunpack.c.l.b16 %v2563_v23 }
 0x43c   : > { %v7584_v53 = vpop.permute.xlu1 %3119 }
 0x43d   : > { %v2528_v17 = vpop.f32.mrf.mxu1 }
 0x43e   : > { %v2529_v57 = vadd.f32 %v7148_v42, %v2528_v17  ;;  %v5766_v42 = vld [vmem:[%s9125_s3] ss:$0 sm:$0xff]  ;;  %v7620_v23 = vpop.permute.xlu0 %2888  ;;  %s9143_s3 = sld [smem:[#allocation24_spill]] }
 0x440   : > { %v2564_v18 = vpack.c.bf16 %v2529_v57, %v2529_v57 }
 0x442   : > { %v2677_v5 = vunpack.c.l.b16 %v2564_v18  ;;  %2970 = vrot.lane.b32.xlu0 %v7335_v30, %s6119_s29 }
 0x444   : > { %v7479_v48 = vpack.c.b16 %v2677_v5, %v2676_v29  ;;  %v7592_v14 = vpop.permute.xlu1 %3284 }
 0x446   : > { %v2711_v39 = vsel %vm2605_vm0, %v7479_v48, 0  ;;  %v7634_v5 = vpop.permute.xlu0 %2894 }
 0x447   : > { %2713 = vmatpush.bf16.xpose.msra.mxu3 %v2711_v39 }
 0x44a   : > { %3015 = vrot.lane.b32.xlu0 %v7449_v50, %s6119_s29 }
 0x44c   : > { %v7600_v61 = vpop.permute.xlu1 %3113 }
 0x44f   : > { %2714 = vmatpush.bf16.xpose.msra.mxu3 %v2708_v33 }
 0x452   : > { %2968 = vrot.lane.b32.xlu0 %v7345_v34, %s6119_s29 }
 0x454   : > { %v2351_v60 = vpop.f32.mrf.mxu0  ;;  %v7614_v11 = vpop.permute.xlu1 %3111 }
 0x455   : > { %v2352_v3 = vadd.f32 %v5766_v42, %v2351_v60 }
 0x457   : > { %v2356_v63 = vmul.f32 0.35355338, %v2352_v3  ;;  %2715 = vmatpush.bf16.xpose.msra.mxu3 %v2705_v26 }
 0x459   : > { %v2531_v52 = vpack.c.bf16 %v2356_v63, %v2356_v63  ;;  %v7646_v63 = vpop.permute.xlu0 %3117 }
 0x45a   : > { %3013 = vrot.lane.b32.xlu0 %v7435_v62, %s6119_s29 }
 0x45b   : > { %v2823_v44 = vunpack.c.l.b16 %v2531_v52  ;;  %5544 = vmatmul.msk.bf16.vlgmr.msra.gmra.mxu2 %vm2605_vm0, %v2531_v52 }
 0x45c   : > { %v2353_v10 = vpop.f32.mrf.mxu0 }
 0x45d   : > { %v2354_v45 = vadd.f32 %v5766_v42, %v2353_v10  ;;  %v7497_v35 = vpack.c.b16 %v2823_v44, %v2823_v44  ;;  %v2865_v10 = vsel %vm2605_vm0, %v2840_v27, 0 }
 0x45f   : > { %v2357_v24 = vmul.f32 0.35355338, %v2354_v45  ;;  %2825 = vrot.lane.b32.xlu2 %v7497_v35, %s6115_s1  ;;  %2716 = vmatpush.bf16.xpose.msra.mxu3 %v2702_v15  ;;  %v2862_v15 = vsel %vm2605_vm0, %v7558_v0, 0 }
 0x461   : > { %v2532_v25 = vpack.c.bf16 %v2357_v24, %v2357_v24  ;;  %v7656_v45 = vpop.permute.xlu0 %2896 }
 0x462   : > { %2966 = vrot.lane.b32.xlu0 %v7330_v51, %s6119_s29 }
 0x463   : > { %v2884_v43 = vunpack.c.l.b16 %v2532_v25 }
 0x465   : > { %v7507_v13 = vpack.c.b16 %v2884_v43, %v2884_v43 }
 0x467   : > { %3109 = vrot.lane.b32.xlu1 %v7507_v13, %s6116_s0  ;;  %2886 = vrot.lane.b32.xlu2 %v7507_v13, %s6115_s1 }
 0x468   : > { %2717 = vmatpush.bf16.xpose.msra.mxu3 %v2699_v55  ;;  %v2859_v55 = vsel %vm2605_vm0, %v2836_v19, 0  ;;  %v2856_v19 = vsel %vm2605_vm0, %v7545_v8, 0 }
 0x46a   : > { %3203 = vrot.lane.b32.xlu0 %v7188_v6, %s6120_s15 }
 0x46f   : > { %3276 = vrot.lane.b32.xlu1 %v7330_v51, %s6117_s11  ;;  %3057 = vrot.lane.b32.xlu2 %v7335_v30, %s6116_s0 }
 0x470   : > { %2718 = vmatpush.bf16.xpose.msra.mxu3 %v2696_v37 }
 0x472   : > { %3003 = vrot.lane.b32.xlu0 %v7372_v31, %s6119_s29 }
 0x477   : > { %3336 = vrot.lane.b32.xlu1 %v7386_v12, %s6117_s11  ;;  %3063 = vrot.lane.b32.xlu2 %v7242_v28, %s6116_s0 }
 0x478   : > { %2719 = vmatpush.bf16.xpose.msra.mxu3 %v2693_v46  ;;  %v7686_v46 = vld [vmem:[%s9126_s22 + $0x8] sm:$0xff] }
 0x47a   : > { %3234 = vrot.lane.b32.xlu0 %v7420_v32, %s6120_s15 }
 0x47f   : > { %2758 = vrot.lane.b32.xlu1 %v7214_v36, %s6118_s13  ;;  %3286 = vrot.lane.b32.xlu2 %v7242_v28, %s6117_s11 }
 0x480   : > { %2720 = vmatpush.bf16.xpose.msra.mxu3 %v2690_v16 }
 0x487   : > { %5545 = vmatmul.msk.bf16.vlgmr.msra.gmra.mxu3 %vm2605_vm0, %v2532_v25  ;;  %2789 = vrot.lane.b32.xlu1 %v7407_v4, %s6118_s13  ;;  %v7668_v25 = vpop.permute.xlu0 %2898 }
 0x488   : > { %3065 = vrot.lane.b32.xlu2 %v7214_v36, %s6116_s0 }
 0x48f   : > { %2787 = vrot.lane.b32.xlu1 %v7461_v21, %s6118_s13  ;;  %v7679_v37 = vpop.permute.xlu0 %3053 }
 0x490   : > { %2841 = vrot.lane.b32.xlu2 %v7188_v6, %s6115_s1 }
 0x497   : > { %2978 = vrot.lane.b32.xlu1 %v7214_v36, %s6119_s29 }
 0x498   : > { %3067 = vrot.lane.b32.xlu2 %v7188_v6, %s6116_s0 }
 0x49f   : > { %2785 = vrot.lane.b32.xlu1 %v7386_v12, %s6118_s13 }
 0x4a0   : > { %2892 = vrot.lane.b32.xlu2 %v7461_v21, %s6115_s1 }
 0x4a7   : > { %2976 = vrot.lane.b32.xlu1 %v7242_v28, %s6119_s29 }
 0x4a8   : > { %3115 = vrot.lane.b32.xlu2 %v7461_v21, %s6116_s0 }
 0x4af   : > { %2974 = vrot.lane.b32.xlu1 %v7289_v38, %s6119_s29 }
 0x4b0   : > { %3051 = vrot.lane.b32.xlu2 %v7497_v35, %s6116_s0 }
 0x4b7   : > { %3011 = vrot.lane.b32.xlu1 %v7420_v32, %s6119_s29 }
 0x4b8   : > { %3121 = vrot.lane.b32.xlu2 %v7435_v62, %s6116_s0 }
 0x4b9   : > { %v7590_v41 = vpop.permute.xlu2 %2825 }
 0x4bf   : > { %3193 = vrot.lane.b32.xlu1 %v7335_v30, %s6120_s15 }
 0x4c0   : > { %3344 = vrot.lane.b32.xlu2 %v7435_v62, %s6117_s11 }
 0x4c1   : > { %v7598_v49 = vpop.permute.xlu2 %2886 }
 0x4c7   : > { %3238 = vrot.lane.b32.xlu1 %v7449_v50, %s6120_s15 }
 0x4c8   : > { %2900 = vrot.lane.b32.xlu2 %v7449_v50, %s6115_s1 }
 0x4c9   : > { %v7606_v58 = vpop.permute.xlu2 %3057 }
 0x4cf   : > { %3191 = vrot.lane.b32.xlu1 %v7345_v34, %s6120_s15 }
 0x4d0   : > { %3342 = vrot.lane.b32.xlu2 %v7420_v32, %s6117_s11 }
 0x4d1   : > { %v7616_v17 = vpop.permute.xlu2 %3063 }
 0x4d7   : > { %3125 = vrot.lane.b32.xlu1 %v7479_v48, %s6116_s0 }
 0x4d8   : > { %3340 = vrot.lane.b32.xlu2 %v7407_v4, %s6117_s11 }
 0x4d9   : > { %v7624_v57 = vpop.permute.xlu2 %3286  ;;  %v7626_v18 = vpop.permute.xlu1 %3109 }
 0x4de   : > { %v7628_v29 = vpop.f32.mrf.mxu2 }
 0x4df   : > { %3189 = vrot.lane.b32.xlu1 %v7330_v51, %s6120_s15 }
 0x4e0   : > { %3274 = vrot.lane.b32.xlu2 %v7497_v35, %s6117_s11 }
 0x4e1   : > { %v7636_v39 = vpop.permute.xlu1 %3276 }
 0x4e2   : > { %v7638_v33 = vpop.permute.xlu2 %3065 }
 0x4e6   : > { %v2644_v42 = vpop.f32.mrf.mxu2 }
 0x4e7   : > { %3232 = vrot.lane.b32.xlu1 %v7407_v4, %s6120_s15 }
 0x4e8   : > { %3332 = vrot.lane.b32.xlu2 %v7507_v13, %s6117_s11 }
 0x4e9   : > { %v7644_v60 = vpop.permute.xlu1 %3336 }
 0x4ea   : > { %v2842_v3 = vpop.permute.xlu2 %2841 }
 0x4eb   : > { %v2868_v26 = vsel %vm2605_vm0, %v2842_v3, 0  ;;  %v7702_v3 = vpop.permute.xlu0 %3282 }
 0x4ec   : > { %2870 = vmatpush.bf16.xpose.msrb.mxu2 %v2868_v26 }
 0x4ef   : > { %3426 = vrot.lane.b32.xlu1 %v7188_v6, %s6121_s16 }
 0x4f0   : > { %2902 = vrot.lane.b32.xlu2 %v7479_v48, %s6115_s1 }
 0x4f1   : > { %v7653_v52 = vpop.permute.xlu1 %2758 }
 0x4f2   : > { %v3068_v44 = vpop.permute.xlu2 %3067 }
 0x4f3   : > { %v3094_v32 = vsel %vm2605_vm0, %v3068_v44, 0  ;;  %v3088_v44 = vsel %vm2605_vm0, %v7616_v17, 0 }
 0x4f4   : > { %2871 = vmatpush.bf16.xpose.msrb.mxu2 %v2865_v10 }
 0x4f7   : > { %3348 = vrot.lane.b32.xlu1 %v7479_v48, %s6117_s11 }
 0x4f8   : > { %2760 = vrot.lane.b32.xlu2 %v7188_v6, %s6118_s13 }
 0x4f9   : > { %v7662_v35 = vpop.permute.xlu1 %2789 }
 0x4fa   : > { %v7664_v24 = vpop.permute.xlu2 %2892 }
 0x4fc   : > { %2872 = vmatpush.bf16.xpose.msrb.mxu2 %v2862_v15 }
 0x4ff   : > { %3424 = vrot.lane.b32.xlu1 %v7214_v36, %s6121_s16 }
 0x500   : > { %2754 = vrot.lane.b32.xlu2 %v7289_v38, %s6118_s13 }
 0x501   : > { %v7674_v43 = vpop.permute.xlu1 %2787 }
 0x502   : > { %v7676_v13 = vpop.permute.xlu2 %3115 }
 0x504   : > { %2873 = vmatpush.bf16.xpose.msrb.mxu2 %v2859_v55  ;;  %v2853_v55 = vsel %vm2605_vm0, %v7535_v2, 0 }
 0x507   : > { %3422 = vrot.lane.b32.xlu1 %v7242_v28, %s6121_s16 }
 0x508   : > { %2750 = vrot.lane.b32.xlu2 %v7335_v30, %s6118_s13 }
 0x509   : > { %v7688_v16 = vpop.permute.xlu1 %2978 }
 0x50a   : > { %v2722_v0 = vpop.f32.mrf.mxu3  ;;  %v7690_v27 = vpop.permute.xlu2 %3051 }
 0x50b   : > { %v7693_v42 = vadd.f32 %v2722_v0, %v7686_v46 }
 0x50c   : > { %2874 = vmatpush.bf16.xpose.msrb.mxu2 %v2856_v19  ;;  %v2850_v19 = vsel %vm2605_vm0, %v7505_v1, 0 }
 0x50d   : > { %2728 = vmax.xlane.f32.xlu0 %v7693_v42 }
 0x50f   : > { %2797 = vrot.lane.b32.xlu1 %v7479_v48, %s6118_s13 }
 0x510   : > { %2795 = vrot.lane.b32.xlu2 %v7449_v50, %s6118_s13 }
 0x511   : > { %v7704_v26 = vpop.permute.xlu1 %2785 }
 0x512   : > { %v2724_v10 = vpop.f32.mrf.mxu3  ;;  %v7706_v15 = vpop.permute.xlu2 %3121 }
 0x513   : > { %v7720_v10 = vpop.permute.xlu0 %3123 }
 0x514   : > { %2875 = vmatpush.bf16.xpose.msrb.mxu2 %v2853_v55 }
 0x517   : > { %3017 = vrot.lane.b32.xlu1 %v7479_v48, %s6119_s29 }
 0x518   : > { %2748 = vrot.lane.b32.xlu2 %v7345_v34, %s6118_s13  ;;  %v3091_v34 = vsel %vm2605_vm0, %v7638_v33, 0 }
 0x519   : > { %v7714_v8 = vpop.permute.xlu1 %2976 }
 0x51a   : > { %v7716_v0 = vpop.permute.xlu2 %3344 }
 0x51b   : > { %v7731_v1 = vpop.permute.xlu0 %3280 }
 0x51c   : > { %2876 = vmatpush.bf16.xpose.msrb.mxu2 %v2850_v19 }
 0x51f   : > { %3240 = vrot.lane.b32.xlu1 %v7479_v48, %s6120_s15 }
 0x520   : > { %2793 = vrot.lane.b32.xlu2 %v7435_v62, %s6118_s13 }
 0x521   : > { %v7726_v2 = vpop.permute.xlu1 %2974 }
 0x522   : > { %v2901_v55 = vpop.permute.xlu2 %2900 }
 0x523   : > { %v7743_v56 = vpop.permute.xlu0 %3278  ;;  %v2926_v30 = vsel %vm2605_vm0, %v2901_v55, 0 }
 0x524   : > { %2877 = vmatpush.bf16.xpose.msrb.mxu2 %v2847_v22 }
 0x528   : > { %2746 = vrot.lane.b32.xlu2 %v7330_v51, %s6118_s13  ;;  %v7772_v51 = vld [vmem:[%s9126_s22] sm:$0xff] }
 0x529   : > { %v7735_v19 = vpop.permute.xlu1 %3011 }
 0x52a   : > { %9127 = vst [vmem:[#allocation56_spill] sm:$0xff] %v7735_v19  ;;  %v7737_v50 = vpop.permute.xlu2 %3342  ;;  %v7778_v19 = vadd.f32 %v7628_v29, %v7772_v51 }
 0x52b   : > { %5546 = vmatmul.msk.bf16.vlgmr.msrb.gmra.mxu2 %vm2605_vm0, %v7590_v41 }
 0x52c   : > { %3096 = vmatpush.bf16.xpose.msra.mxu2 %v3094_v32 }
 0x530   : > { %2980 = vrot.lane.b32.xlu2 %v7188_v6, %s6119_s29  ;;  %v3085_v6 = vsel %vm2605_vm0, %v7552_v40, 0 }
 0x531   : > { %v7747_v22 = vpop.permute.xlu1 %3193 }
 0x532   : > { %9128 = vst [vmem:[#allocation57_spill] sm:$0xff] %v7747_v22  ;;  %v7749_v32 = vpop.permute.xlu2 %3340 }
 0x534   : > { %3097 = vmatpush.bf16.xpose.msra.mxu2 %v3091_v34  ;;  %v7757_v34 = vpop.permute.xlu0 %3338 }
 0x538   : > { %2783 = vrot.lane.b32.xlu2 %v7372_v31, %s6118_s13 }
 0x539   : > { %v7755_v41 = vpop.permute.xlu1 %3238 }
 0x53a   : > { %9129 = vst [vmem:[#allocation58_spill] sm:$0xff] %v7755_v41  ;;  %v7759_v33 = vpop.permute.xlu2 %3274  ;;  %v3082_v41 = vsel %vm2605_vm0, %v7580_v9, 0 }
 0x53c   : > { %3098 = vmatpush.bf16.xpose.msra.mxu2 %v3088_v44  ;;  %v7769_v44 = vpop.permute.xlu0 %3346 }
 0x540   : > { %3009 = vrot.lane.b32.xlu2 %v7407_v4, %s6119_s29  ;;  %v3079_v4 = vsel %vm2605_vm0, %v7606_v58, 0 }
 0x541   : > { %v7765_v22 = vpop.permute.xlu1 %3191 }
 0x542   : > { %9130 = vst [vmem:[#allocation59_spill] sm:$0xff] %v7765_v22  ;;  %v7767_v17 = vpop.permute.xlu2 %3332 }
 0x544   : > { %3099 = vmatpush.bf16.xpose.msra.mxu2 %v3085_v6  ;;  %v7788_v9 = vpop.permute.xlu0 %3334 }
 0x548   : > { %3007 = vrot.lane.b32.xlu2 %v7461_v21, %s6119_s29 }
 0x549   : > { %2726 = vmax.xlane.f32.xlu1 %v7778_v19  ;;  %v7783_v40 = vpop.permute.xlu1 %3125 }
 0x54a   : > { %v2903_v6 = vpop.permute.xlu2 %2902 }
 0x54b   : > { %v2929_v22 = vsel %vm2605_vm0, %v2903_v6, 0  ;;  %v3076_v6 = vsel %vm2605_vm0, %v7519_v7, 0  ;;  %v3317_v7 = vsel %vm2605_vm0, %v7568_v59, 0  ;;  %v3314_v59 = vsel %vm2605_vm0, %v7608_v47, 0 }
 0x54c   : > { %3100 = vmatpush.bf16.xpose.msra.mxu2 %v3082_v41  ;;  %2931 = vmatpush.bf16.xpose.msrb.mxu3 %v2929_v22  ;;  %v2757_v58 = vpop.permute.xlu0 %2756  ;;  %v2923_v22 = vsel %vm2605_vm0, %v7668_v25, 0  ;;  %v2920_v25 = vsel %vm2605_vm0, %v7656_v45, 0  ;;  %v3311_v45 = vsel %vm2605_vm0, %v7624_v57, 0 }
 0x550   : > { %3201 = vrot.lane.b32.xlu2 %v7214_v36, %s6120_s15 }
 0x551   : > { %v7792_v29 = vpop.permute.xlu1 %3189 }
 0x552   : > { %v2761_v41 = vpop.permute.xlu2 %2760 }
 0x553   : > { %2770 = vmatpush.bf16.msrb.mxu0 %v2761_v41 }
 0x554   : > { %3101 = vmatpush.bf16.xpose.msra.mxu2 %v3079_v4  ;;  %2932 = vmatpush.bf16.xpose.msrb.mxu3 %v2926_v30  ;;  %v3073_v30 = vsel %vm2605_vm0, %v7679_v37, 0  ;;  %v2753_v55 = vpop.permute.xlu0 %2752 }
 0x557   : > { %2771 = vmatpush.bf16.msrb.mxu0 %v7653_v52 }
 0x558   : > { %3005 = vrot.lane.b32.xlu2 %v7386_v12, %s6119_s29 }
 0x559   : > { %v7800_v4 = vpop.permute.xlu1 %3232 }
 0x55a   : > { %v2755_v36 = vpop.permute.xlu2 %2754 }
 0x55b   : > { %2772 = vmatpush.bf16.msrb.mxu0 %v2757_v58  ;;  %v3308_v58 = vsel %vm2605_vm0, %v7592_v14, 0 }
 0x55c   : > { %3102 = vmatpush.bf16.xpose.msra.mxu2 %v3076_v6  ;;  %2933 = vmatpush.bf16.xpose.msrb.mxu3 %v2923_v22  ;;  %v2917_v6 = vsel %vm2605_vm0, %v7634_v5, 0  ;;  %v3305_v22 = vsel %vm2605_vm0, %v7702_v3, 0  ;;  %v3299_v3 = vsel %vm2605_vm0, %v7743_v56, 0 }
 0x55f   : > { %2773 = vmatpush.bf16.msrb.mxu0 %v2755_v36  ;;  %v2911_v36 = vsel %vm2605_vm0, %v7576_v20, 0  ;;  %v3302_v20 = vsel %vm2605_vm0, %v7731_v1, 0  ;;  %v3146_v1 = vsel %vm2605_vm0, %v7706_v15, 0  ;;  %v3140_v15 = vsel %vm2605_vm0, %v7646_v63, 0 }
 0x560   : > { %3199 = vrot.lane.b32.xlu2 %v7242_v28, %s6120_s15 }
 0x561   : > { %v7810_v52 = vpop.permute.xlu1 %3426 }
 0x562   : > { %v2751_v41 = vpop.permute.xlu2 %2750  ;;  %3420 = vrot.lane.b32.xlu1 %v7289_v38, %s6121_s16 }
 0x563   : > { %2774 = vmatpush.bf16.msrb.mxu0 %v2753_v55 }
 0x564   : > { %3103 = vmatpush.bf16.xpose.msra.mxu2 %v3073_v30  ;;  %2934 = vmatpush.bf16.xpose.msrb.mxu3 %v2920_v25  ;;  %v2908_v30 = vsel %vm2605_vm0, %v7620_v23, 0  ;;  %v3149_v23 = vsel %vm2605_vm0, %v7720_v10, 0  ;;  %v3143_v10 = vsel %vm2605_vm0, %v7584_v53, 0 }
 0x567   : > { %2775 = vmatpush.bf16.msrb.mxu0 %v2751_v41  ;;  %v3131_v41 = vsel %vm2605_vm0, %v7614_v11, 0 }
 0x568   : > { %3197 = vrot.lane.b32.xlu2 %v7289_v38, %s6120_s15  ;;  %v2914_v38 = vsel %vm2605_vm0, %v7664_v24, 0 }
 0x569   : > { %v7822_v28 = vpop.permute.xlu1 %3348 }
 0x56a   : > { %v2796_v37 = vpop.permute.xlu2 %2795 }
 0x56b   : > { %5548 = vmatmul.msk.bf16.vlgmr.msra.gmra.mxu2 %vm2605_vm0, %v7690_v27 }
 0x56c   : > { %3319 = vmatpush.bf16.xpose.msrb.mxu2 %v3317_v7  ;;  %2935 = vmatpush.bf16.xpose.msrb.mxu3 %v2917_v6  ;;  %v3152_v7 = vsel %vm2605_vm0, %v7783_v40, 0  ;;  %v2792_v40 = vpop.permute.xlu0 %2791 }
 0x570   : > { %3195 = vrot.lane.b32.xlu2 %v7308_v54, %s6120_s15 }
 0x571   : > { %v7830_v47 = vpop.permute.xlu1 %3424 }
 0x572   : > { %v2749_v27 = vpop.permute.xlu2 %2748 }
 0x573   : > { %2776 = vmatpush.bf16.msrb.mxu0 %v2749_v27 }
 0x574   : > { %3320 = vmatpush.bf16.xpose.msrb.mxu2 %v3314_v59  ;;  %2936 = vmatpush.bf16.xpose.msrb.mxu3 %v2914_v38 }
 0x578   : > { %3236 = vrot.lane.b32.xlu2 %v7435_v62, %s6120_s15 }
 0x579   : > { %v7838_v57 = vpop.permute.xlu1 %3422 }
 0x57a   : > { %v2794_v5 = vpop.permute.xlu2 %2793 }
 0x57c   : > { %3321 = vmatpush.bf16.xpose.msrb.mxu2 %v3311_v45  ;;  %2937 = vmatpush.bf16.xpose.msrb.mxu3 %v2911_v36  ;;  %v7898_v45 = vpop.permute.xlu0 %2972 }
 0x580   : > { %3230 = vrot.lane.b32.xlu2 %v7461_v21, %s6120_s15 }
 0x581   : > { %v2798_v24 = vpop.permute.xlu1 %2797 }
 0x582   : > { %v2747_v14 = vpop.permute.xlu2 %2746 }
 0x583   : > { %2777 = vmatpush.bf16.msrb.mxu0 %v2747_v14 }
 0x584   : > { %3322 = vmatpush.bf16.xpose.msrb.mxu2 %v3308_v58  ;;  %2938 = vmatpush.bf16.xpose.msrb.mxu3 %v2908_v30  ;;  %v7906_v27 = vpop.permute.xlu0 %2970  ;;  %v3363_v58 = vsel %vm2605_vm0, %v7749_v32, 0 }
 0x587   : > { %2807 = vmatpush.bf16.msra.mxu0 %v2798_v24 }
 0x588   : > { %3228 = vrot.lane.b32.xlu2 %v7386_v12, %s6120_s15 }
 0x589   : > { %v7875_v56 = vpop.permute.xlu1 %3017 }
 0x58a   : > { %v7863_v55 = vpop.permute.xlu2 %2980 }
 0x58b   : > { %2808 = vmatpush.bf16.msra.mxu0 %v2796_v37  ;;  %5547 = vmatmul.msk.bf16.vlgmr.msrb.gmra.mxu3 %vm2605_vm0, %v7598_v49  ;;  %v3296_v49 = vsel %vm2605_vm0, %v7636_v39, 0  ;;  %v3137_v39 = vsel %vm2605_vm0, %v7676_v13, 0  ;;  %v3375_v13 = vsel %vm2605_vm0, %v7822_v28, 0  ;;  %v3369_v28 = vsel %vm2605_vm0, %v7716_v0, 0 }
 0x58c   : > { %3323 = vmatpush.bf16.xpose.msrb.mxu2 %v3305_v22  ;;  %3154 = vmatpush.bf16.xpose.msra.mxu3 %v3152_v7  ;;  %v7912_v38 = vpop.permute.xlu0 %3015  ;;  %v3360_v0 = vsel %vm2605_vm0, %v7757_v34, 0  ;;  %v3354_v34 = vsel %vm2605_vm0, %v7788_v9, 0 }
 0x58f   : > { %2809 = vmatpush.bf16.msra.mxu0 %v2794_v5 }
 0x591   : > { %v7883_v53 = vpop.permute.xlu1 %3240 }
 0x593   : > { %2810 = vmatpush.bf16.msra.mxu0 %v2792_v40 }
 0x594   : > { %3324 = vmatpush.bf16.xpose.msrb.mxu2 %v3302_v20  ;;  %3155 = vmatpush.bf16.xpose.msra.mxu3 %v3149_v23  ;;  %v2969_v36 = vpop.permute.xlu0 %2968 }
 0x597   : > { %2811 = vmatpush.bf16.msra.mxu0 %v7662_v35  ;;  %v2784_v35 = vpop.permute.xlu2 %2783 }
 0x59b   : > { %2812 = vmatpush.bf16.msra.mxu0 %v7674_v43 }
 0x59c   : > { %3325 = vmatpush.bf16.xpose.msrb.mxu2 %v3299_v3  ;;  %3156 = vmatpush.bf16.xpose.msra.mxu3 %v3146_v1  ;;  %v7925_v7 = vpop.permute.xlu0 %3013 }
 0x59f   : > { %2813 = vmatpush.bf16.msra.mxu0 %v7704_v26  ;;  %v7892_v6 = vpop.permute.xlu2 %3009 }
 0x5a3   : > { %2814 = vmatpush.bf16.msra.mxu0 %v2784_v35 }
 0x5a4   : > { %3326 = vmatpush.bf16.xpose.msrb.mxu2 %v3296_v49  ;;  %3157 = vmatpush.bf16.xpose.msra.mxu3 %v3143_v10  ;;  %v2967_v20 = vpop.permute.xlu0 %2966 }
 0x5ab   : > { %5550 = vmatmul.msk.bf16.vlgmr.msrb.gmra.mxu2 %vm2605_vm0, %v7759_v33  ;;  %v3134_v33 = vsel %vm2605_vm0, %v7600_v61, 0  ;;  %v3372_v61 = vsel %vm2605_vm0, %v7769_v44, 0 }
 0x5ac   : > { %3158 = vmatpush.bf16.xpose.msra.mxu3 %v3140_v15 }
 0x5ae   : > { %v2879_v43 = vpop.f32.mrf.mxu2 }
 0x5af   : > { %v7880_v26 = vadd.f32 %v2879_v43, %v7772_v51 }
 0x5b1   : > { %2944 = vmax.xlane.f32.xlu2 %v7880_v26 }
 0x5b4   : > { %3159 = vmatpush.bf16.xpose.msra.mxu3 %v3137_v39 }
 0x5b6   : > { %v2881_v63 = vpop.f32.mrf.mxu2 }
 0x5bc   : > { %3160 = vmatpush.bf16.xpose.msra.mxu3 %v3134_v33  ;;  %v2727_v25 = vpop.xlane.xlu1 %2726 }
 0x5bd   : > { %v2730_v59 = vsub.f32 %v7778_v19, %v2727_v25  ;;  %v7902_v19 = vpop.permute.xlu2 %3007 }
 0x5bf   : > { %v2732_v37 = vmul.f32 1.442695, %v2730_v59 }
 0x5c1   : > { %5848 = vpow2.f32 %v2732_v37 }
 0x5c4   : > { %3161 = vmatpush.bf16.xpose.msra.mxu3 %v3131_v41 }
 0x5c5   : > { %v7910_v44 = vpop.permute.xlu2 %3201 }
 0x5c7   : > { %v5849_v11 = vpop.eup %5848 }
 0x5c8   : > { %2736 = vadd.xlane.f32.xlu1 %v5849_v11 }
 0x5c9   : > { %3226 = vrot.lane.b32.xlu2 %v7372_v31, %s6120_s15 }
 0x5cb   : > { %5549 = vmatmul.msk.bf16.vlgmr.msra.gmra.mxu3 %vm2605_vm0, %v7626_v18  ;;  %v3366_v18 = vsel %vm2605_vm0, %v7737_v50, 0  ;;  %v3357_v50 = vsel %vm2605_vm0, %v7644_v60, 0  ;;  %v7935_v60 = vpop.permute.xlu0 %3203 }
 0x5cc   : > { %3377 = vmatpush.bf16.xpose.msrb.mxu3 %v3375_v13 }
 0x5cd   : > { %v7916_v5 = vpop.permute.xlu2 %3005 }
 0x5d3   : > { %v7939_v1 = vpop.permute.xlu0 %3003 }
 0x5d4   : > { %3378 = vmatpush.bf16.xpose.msrb.mxu3 %v3372_v61 }
 0x5d5   : > { %v7920_v24 = vpop.permute.xlu2 %3199 }
 0x5db   : > { %v7943_v35 = vpop.permute.xlu0 %3234 }
 0x5dc   : > { %3379 = vmatpush.bf16.xpose.msrb.mxu3 %v3369_v28 }
 0x5dd   : > { %v7927_v32 = vpop.permute.xlu2 %3197 }
 0x5e3   : > { %v2729_v39 = vpop.xlane.xlu0 %2728 }
 0x5e4   : > { %3380 = vmatpush.bf16.xpose.msrb.mxu3 %v3366_v18  ;;  %v2731_v43 = vsub.f32 %v7693_v42, %v2729_v39 }
 0x5e5   : > { %v7933_v23 = vpop.permute.xlu2 %3195 }
 0x5e6   : > { %v2734_v25 = vmul.f32 1.442695, %v2731_v43 }
 0x5ec   : > { %3381 = vmatpush.bf16.xpose.msrb.mxu3 %v3363_v58 }
 0x5ed   : > { %v7937_v3 = vpop.permute.xlu2 %3236 }
 0x5ee   : > { %v3105_v22 = vpop.f32.mrf.mxu2 }
 0x5ef   : > { %v3106_v30 = vadd.f32 %v3105_v22, %v7772_v51 }
 0x5f2   : > { %3167 = vmax.xlane.f32.xlu2 %v3106_v30 }
 0x5f4   : > { %3382 = vmatpush.bf16.xpose.msrb.mxu3 %v3360_v0 }
 0x5f5   : > { %v7941_v49 = vpop.permute.xlu2 %3230 }
 0x5f6   : > { %v3107_v14 = vpop.f32.mrf.mxu2 }
 0x5fc   : > { %3383 = vmatpush.bf16.xpose.msrb.mxu3 %v3357_v50 }
 0x5fd   : > { %v7945_v9 = vpop.permute.xlu2 %3228 }
 0x604   : > { %3384 = vmatpush.bf16.xpose.msrb.mxu3 %v3354_v34 }
 0x60b   : > { %5551 = vmatmul.msk.bf16.vlgmr.msrb.gmra.mxu3 %vm2605_vm0, %v7767_v17 }
 0x60e   : > { %v2940_v40 = vpop.f32.mrf.mxu3 }
 0x60f   : > { %v2941_v59 = vadd.f32 %v2940_v40, %v7686_v46 }
 0x616   : > { %v2942_v10 = vpop.f32.mrf.mxu3 }
 0x624   : > { %v2945_v33 = vpop.xlane.xlu2 %2944 }
 0x625   : > { %v2948_v63 = vsub.f32 %v7880_v26, %v2945_v33 }
 0x627   : > { %v2950_v41 = vmul.f32 1.442695, %v2948_v63 }
 0x629   : > { %5850 = vpow2.f32 %v2950_v41 }
 0x62a   : > { %5852 = vpow2.f32 %v2734_v25 }
 0x62e   : > { %v3328_v15 = vpop.f32.mrf.mxu2 }
 0x62f   : > { %v7948_v17 = vadd.f32 %v3328_v15, %v7772_v51  ;;  %v5851_v37 = vpop.eup %5850  ;;  %v7954_v51 = vpop.permute.xlu1 %3420 }
 0x630   : > { %2954 = vadd.xlane.f32.xlu2 %v5851_v37  ;;  %v5853_v61 = vpop.eup %5852 }
 0x631   : > { %3390 = vmax.xlane.f32.xlu0 %v7948_v17 }
 0x636   : > { %v3330_v13 = vpop.f32.mrf.mxu2 }
 0x639   : > { %2946 = vmax.xlane.f32.xlu0 %v2941_v59 }
 0x63b   : > { %v2737_v28 = vpop.xlane.xlu1 %2736 }
 0x63c   : > { %5854 = vrcp.f32 %v2737_v28 }
 0x641   : > { %2738 = vadd.xlane.f32.xlu0 %v5853_v61 }
 0x642   : > { %v5855_v42 = vpop.eup %5854 }
 0x643   : > { %v7956_v18 = vmul.f32 %v5855_v42, %v5849_v11  ;;  %v7967_v11 = vpop.permute.xlu2 %3226 }
 0x645   : > { %v2744_v26 = vpack.c.bf16 %v7956_v18, %v7956_v18 }
 0x647   : > { %2778 = vmatmul.bf16.vlgmr.msrb.gmra.mxu0 %v2744_v26  ;;  %v5663_v26 = vld [vmem:[%s6362_s14 + $0x8] sm:$0xff] }
 0x648   : > { %2990 = vmatpush.bf16.msrb.mxu0 %v7863_v55  ;;  %3730 = vmatpush.bf16.msra.mxu3 %v5663_v26  ;;  %v5939_v26 = vld [vmem:[%s9076_s7 + $0x68] sm:$0xff] }
 0x64c   : > { %2991 = vmatpush.bf16.msrb.mxu0 %v7688_v16  ;;  %v9131_v16 = vld [vmem:[#allocation51_spill] sm:$0xff] }
 0x64e   : > { %v3163_v58 = vpop.f32.mrf.mxu3 }
 0x64f   : > { %v3164_v0 = vadd.f32 %v3163_v58, %v7686_v46 }
 0x650   : > { %2992 = vmatpush.bf16.msrb.mxu0 %v7714_v8 }
 0x651   : > { %3169 = vmax.xlane.f32.xlu1 %v3164_v0 }
 0x654   : > { %2993 = vmatpush.bf16.msrb.mxu0 %v7726_v2  ;;  %v9132_v2 = vld [vmem:[#allocation52_spill] sm:$0xff] }
 0x656   : > { %v3165_v22 = vpop.f32.mrf.mxu3 }
 0x657   : > { %v5662_v22 = vld [vmem:[%s6362_s14] sm:$0xff]  ;;  %s6122_s14 = smov 8  }
 0x658   : > { %2994 = vmatpush.bf16.msrb.mxu0 %v7898_v45  ;;  %3731 = vmatpush.bf16.msra.mxu3 %v5662_v22  ;;  %v5942_v22 = vld [vmem:[%s9076_s7 + $0x80] sm:$0xff] }
 0x65c   : > { %2995 = vmatpush.bf16.msrb.mxu0 %v7906_v27 }
 0x660   : > { %2996 = vmatpush.bf16.msrb.mxu0 %v2969_v36 }
 0x664   : > { %2997 = vmatpush.bf16.msrb.mxu0 %v2967_v20 }
 0x665   : > { %v3168_v55 = vpop.xlane.xlu2 %3167 }
 0x666   : > { %v3171_v50 = vsub.f32 %v3106_v30, %v3168_v55  ;;  %v5926_v55 = vld [vmem:[%s9076_s7] sm:$0xff] }
 0x668   : > { %v3173_v14 = vmul.f32 1.442695, %v3171_v50  ;;  %v5927_v50 = vld [vmem:[%s9076_s7 + $0x8] sm:$0xff] }
 0x66a   : > { %3463 = vrot.lane.b32.xlu1 %v7479_v48, %s6121_s16  ;;  %5856 = vpow2.f32 %v3173_v14  ;;  %v9133_v48 = vld [vmem:[#allocation55_spill] sm:$0xff]  ;;  %v3640_v14 = vpack.c.bf16 %v5927_v50, %v5926_v55  ;;  %v5943_v55 = vld [vmem:[%s9076_s7 + $0x88] sm:$0xff] }
 0x66b   : > { %v3648_v50 = vpack.c.bf16 %v5943_v55, %v5942_v22  ;;  %v5953_v22 = vld [vmem:[%s9076_s7 + $0xd0] sm:$0xff] }
 0x66c   : > { %5578 = vmatmul.msk.bf16.vlgmr.msra.gmra.mxu3 %vm1478_vm1, %v3640_v14 }
 0x670   : > { %v7973_v8 = vpop.eup %5856 }
 0x671   : > { %3177 = vadd.xlane.f32.xlu0 %v7973_v8 }
 0x672   : > { %3416 = vrot.lane.b32.xlu1 %v9131_v16, %s6121_s16  ;;  %v9140_v16 = vld [vmem:[#allocation58_spill] sm:$0xff] }
 0x67a   : > { %3414 = vrot.lane.b32.xlu1 %v9132_v2, %s6121_s16 }
 0x685   : > { %3461 = vrot.lane.b32.xlu0 %v9133_v48, %s6121_s16 }
 0x68e   : > { %v3386_v45 = vpop.f32.mrf.mxu3 }
 0x68f   : > { %v7979_v27 = vadd.f32 %v3386_v45, %v7686_v46 }
 0x691   : > { %3392 = vmax.xlane.f32.xlu2 %v7979_v27 }
 0x696   : > { %v3388_v36 = vpop.f32.mrf.mxu3 }
 0x6a3   : > { %v2955_v43 = vpop.xlane.xlu2 %2954 }
 0x6a4   : > { %v3391_v30 = vpop.xlane.xlu0 %3390 }
 0x6a9   : > { %3418 = vrot.lane.b32.xlu2 %v7308_v54, %s6121_s16  ;;  %v3394_v54 = vsub.f32 %v7948_v17, %v3391_v30  ;;  %v9135_v17 = vld [vmem:[#allocation50_spill] sm:$0xff] }
 0x6ab   : > { %v3396_v41 = vmul.f32 1.442695, %v3394_v54 }
 0x6ac   : > { %v2947_v34 = vpop.xlane.xlu0 %2946 }
 0x6ad   : > { %v2949_v20 = vsub.f32 %v2941_v59, %v2947_v34 }
 0x6af   : > { %v2952_v40 = vmul.f32 1.442695, %v2949_v20  ;;  %v5928_v20 = vld [vmem:[%s9076_s7 + $0x10] sm:$0xff] }
 0x6b1   : > { %5858 = vpow2.f32 %v2952_v40  ;;  %v5929_v40 = vld [vmem:[%s9076_s7 + $0x18] sm:$0xff] }
 0x6b4   : > { %v2739_v10 = vpop.xlane.xlu0 %2738 }
 0x6b5   : > { %5860 = vrcp.f32 %v2739_v10  ;;  %v3641_v10 = vpack.c.bf16 %v5929_v40, %v5928_v20 }
 0x6b6   : > { %5862 = vrcp.f32 %v2955_v43 }
 0x6b7   : > { %v5859_v15 = vpop.eup %5858  ;;  %5864 = vpow2.f32 %v3396_v41  ;;  %5579 = vmatmul.msk.bf16.gmra.mxu3 %vm1478_vm1, %v3641_v10  ;;  %v5930_v41 = vld [vmem:[%s9076_s7 + $0x20] sm:$0xff] }
 0x6b8   : > { %2956 = vadd.xlane.f32.xlu1 %v5859_v15 }
 0x6bb   : > { %v5861_v46 = vpop.eup %5860 }
 0x6bc   : > { %v7986_v39 = vmul.f32 %v5861_v46, %v5853_v61  ;;  %v5863_v63 = vpop.eup %5862  ;;  %v9134_v61 = vld [vmem:[#allocation56_spill] sm:$0xff] }
 0x6bd   : > { %v7994_v25 = vmul.f32 %v5863_v63, %v5851_v37 }
 0x6be   : > { %v2745_v33 = vpack.c.bf16 %v7986_v39, %v7986_v39 }
 0x6bf   : > { %v2964_v42 = vpack.c.bf16 %v7994_v25, %v7994_v25  ;;  %v2962_v46 = vadd.f32 %v7994_v25, %v7956_v18  ;;  %v5931_v25 = vld [vmem:[%s9076_s7 + $0x28] sm:$0xff] }
 0x6c0   : > { %2815 = vmatmul.bf16.vlgmr.msra.gmra.mxu0 %v2745_v33 }
 0x6c1   : > { %3027 = vmatpush.bf16.msra.mxu0 %v7875_v56  ;;  %v7999_v56 = vpop.eup %5864 }
 0x6c4   : > { %v3170_v13 = vpop.xlane.xlu1 %3169 }
 0x6c5   : > { %3028 = vmatpush.bf16.msra.mxu0 %v7912_v38  ;;  %v3172_v59 = vsub.f32 %v3164_v0, %v3170_v13  ;;  %v2779_v38 = vpop.f32.mrf.mxu0  ;;  %v3642_v13 = vpack.c.bf16 %v5931_v25, %v5930_v41 }
 0x6c6   : > { %2820 = vst.msk [vmem:[#allocation3] sm:$0xff] %vm2605_vm0, %v2779_v38 }
 0x6c7   : > { %v3175_v28 = vmul.f32 1.442695, %v3172_v59  ;;  %5580 = vmatmul.msk.bf16.gmra.mxu3 %vm1478_vm1, %v3642_v13 }
 0x6c9   : > { %3029 = vmatpush.bf16.msra.mxu0 %v7925_v7  ;;  %5866 = vpow2.f32 %v3175_v28  ;;  %v5934_v28 = vld [vmem:[%s9076_s7 + $0x40] sm:$0xff] }
 0x6cd   : > { %3030 = vmatpush.bf16.msra.mxu0 %v9134_v61 }
 0x6cf   : > { %v8007_v7 = vpop.eup %5866 }
 0x6d0   : > { %2998 = vmatmul.bf16.vlgmr.msrb.gmra.mxu0 %v2964_v42  ;;  %3179 = vadd.xlane.f32.xlu0 %v8007_v7  ;;  %v5935_v42 = vld [vmem:[%s9076_s7 + $0x48] sm:$0xff] }
 0x6d1   : > { %3031 = vmatpush.bf16.msra.mxu0 %v7892_v6  ;;  %3459 = vrot.lane.b32.xlu1 %v7435_v62, %s6121_s16  ;;  %v2781_v6 = vpop.f32.mrf.mxu0  ;;  %v9136_v62 = vld [vmem:[#allocation53_spill] sm:$0xff] }
 0x6d2   : > { %3400 = vadd.xlane.f32.xlu2 %v7999_v56 }
 0x6d5   : > { %3032 = vmatpush.bf16.msra.mxu0 %v7902_v19  ;;  %v9137_v19 = vld [vmem:[#allocation54_spill] sm:$0xff] }
 0x6d9   : > { %3033 = vmatpush.bf16.msra.mxu0 %v7916_v5  ;;  %3412 = vrot.lane.b32.xlu1 %v9135_v17, %s6121_s16  ;;  %v9138_v5 = vld [vmem:[#allocation57_spill] sm:$0xff] }
 0x6dd   : > { %3034 = vmatpush.bf16.msra.mxu0 %v7939_v1 }
 0x6e1   : > { %3213 = vmatpush.bf16.msrb.mxu0 %v7935_v60  ;;  %3455 = vrot.lane.b32.xlu1 %v9136_v62, %s6121_s16  ;;  %v5936_v62 = vld [vmem:[%s9076_s7 + $0x58] sm:$0xff] }
 0x6e4   : > { %3457 = vrot.lane.b32.xlu0 %v9137_v19, %s6121_s16  ;;  %v3178_v58 = vpop.xlane.xlu0 %3177  ;;  %v5937_v19 = vld [vmem:[%s9076_s7 + $0x50] sm:$0xff] }
 0x6e5   : > { %3214 = vmatpush.bf16.msrb.mxu0 %v7910_v44  ;;  %v9139_v44 = vld [vmem:[#allocation59_spill] sm:$0xff] }
 0x6e9   : > { %3215 = vmatpush.bf16.msrb.mxu0 %v7920_v24  ;;  %3453 = vrot.lane.b32.xlu1 %v7461_v21, %s6121_s16 }
 0x6ea   : > { %3451 = vrot.lane.b32.xlu2 %v7386_v12, %s6121_s16 }
 0x6ed   : > { %3216 = vmatpush.bf16.msrb.mxu0 %v7927_v32  ;;  %v8033_v32 = vpop.permute.xlu1 %3463 }
 0x6f1   : > { %3217 = vmatpush.bf16.msrb.mxu0 %v7933_v23  ;;  %3449 = vrot.lane.b32.xlu1 %v7372_v31, %s6121_s16 }
 0x6f5   : > { %3218 = vmatpush.bf16.msrb.mxu0 %v9138_v5  ;;  %v8038_v31 = vpop.permute.xlu1 %3416  ;;  %v3645_v5 = vpack.c.bf16 %v5936_v62, %v5937_v19 }
 0x6f9   : > { %3219 = vmatpush.bf16.msrb.mxu0 %v9139_v44 }
 0x6fd   : > { %3220 = vmatpush.bf16.msrb.mxu0 %v7792_v29  ;;  %v8040_v23 = vpop.permute.xlu1 %3414 }
 0x704   : > { %v3393_v21 = vpop.xlane.xlu2 %3392 }
 0x705   : > { %v3395_v24 = vsub.f32 %v7979_v27, %v3393_v21 }
 0x707   : > { %v3398_v12 = vmul.f32 1.442695, %v3395_v24 }
 0x709   : > { %5868 = vpow2.f32 %v3398_v12 }
 0x70c   : > { %v3419_v2 = vpop.permute.xlu2 %3418 }
 0x70f   : > { %v8035_v60 = vpop.eup %5868 }
 0x710   : > { %3402 = vadd.xlane.f32.xlu0 %v8035_v60 }
 0x72b   : > { %v2957_v1 = vpop.xlane.xlu1 %2956 }
 0x72c   : > { %5870 = vrcp.f32 %v2957_v1 }
 0x72d   : > { %5872 = vrcp.f32 %v3178_v58 }
 0x732   : > { %v5871_v29 = vpop.eup %5870 }
 0x733   : > { %v8042_v37 = vmul.f32 %v5871_v29, %v5859_v15  ;;  %v5873_v27 = vpop.eup %5872  ;;  %v5938_v29 = vld [vmem:[%s9076_s7 + $0x60] sm:$0xff] }
 0x734   : > { %v3183_v48 = vmul.f32 %v5873_v27, %v7973_v8  ;;  %v3646_v58 = vpack.c.bf16 %v5939_v26, %v5938_v29 }
 0x735   : > { %v2965_v0 = vpack.c.bf16 %v8042_v37, %v8042_v37  ;;  %v2963_v21 = vadd.f32 %v8042_v37, %v7986_v39  ;;  %v5940_v39 = vld [vmem:[%s9076_s7 + $0x70] sm:$0xff]  ;;  %v5941_v37 = vld [vmem:[%s9076_s7 + $0x78] sm:$0xff] }
 0x736   : > { %v3187_v34 = vpack.c.bf16 %v3183_v48, %v3183_v48  ;;  %v3185_v8 = vadd.f32 %v3183_v48, %v2962_v46 }
 0x737   : > { %3035 = vmatmul.bf16.vlgmr.msra.gmra.mxu0 %v2965_v0  ;;  %v3647_v0 = vpack.c.bf16 %v5941_v37, %v5940_v39 }
 0x738   : > { %3250 = vmatpush.bf16.msra.mxu0 %v7883_v53  ;;  %v3462_v53 = vpop.permute.xlu0 %3461 }
 0x73c   : > { %3251 = vmatpush.bf16.msra.mxu0 %v9140_v16 }
 0x73d   : > { %v2816_v45 = vpop.f32.mrf.mxu0 }
 0x73e   : > { %2821 = vst.msk [vmem:[#allocation3 + $0x8] sm:$0xff] %vm2605_vm0, %v2816_v45  ;;  %v8106_v45 = vld [vmem:[%s1398_s8] ss:$0 sm:$0xff]  ;;  %s6124_s8 = smov 24  }
 0x740   : > { %3252 = vmatpush.bf16.msra.mxu0 %v7937_v3 }
 0x743   : > { %v3180_v15 = vpop.xlane.xlu0 %3179 }
 0x744   : > { %3253 = vmatpush.bf16.msra.mxu0 %v7943_v35 }
 0x745   : > { %v3401_v36 = vpop.xlane.xlu2 %3400  ;;  %v2818_v30 = vpop.f32.mrf.mxu0 }
 0x746   : > { %5874 = vrcp.f32 %v3401_v36  ;;  %v5944_v30 = vld [vmem:[%s9076_s7 + $0x98] sm:$0xff] }
 0x747   : > { %3221 = vmatmul.bf16.vlgmr.msrb.gmra.mxu0 %v3187_v34  ;;  %5876 = vrcp.f32 %v3180_v15  ;;  %v5945_v34 = vld [vmem:[%s9076_s7 + $0x90] sm:$0xff] }
 0x748   : > { %3254 = vmatpush.bf16.msra.mxu0 %v7800_v4  ;;  %v3649_v20 = vpack.c.bf16 %v5944_v30, %v5945_v34 }
 0x74c   : > { %v5875_v3 = vpop.eup %5874  ;;  %3255 = vmatpush.bf16.msra.mxu0 %v7941_v49 }
 0x74d   : > { %v3406_v35 = vmul.f32 %v5875_v3, %v7999_v56  ;;  %v2999_v43 = vpop.f32.mrf.mxu0  ;;  %v5877_v33 = vpop.eup %5876  ;;  %v3644_v56 = vpack.c.bf16 %v5935_v42, %v5934_v28  ;;  %v5949_v28 = vld [vmem:[%s9076_s7 + $0xb8] sm:$0xff] }
 0x74e   : > { %3042 = vrot.lane.b32.xlu1 %v2999_v43, %s6122_s14  ;;  %v3184_v54 = vmul.f32 %v5877_v33, %v8007_v7  ;;  %v3452_v6 = vpop.permute.xlu2 %3451 }
 0x74f   : > { %v3408_v4 = vadd.f32 %v3406_v35, %v3185_v8 }
 0x750   : > { %3256 = vmatpush.bf16.msra.mxu0 %v7945_v9  ;;  %v3188_v49 = vpack.c.bf16 %v3184_v54, %v3184_v54  ;;  %v3460_v9 = vpop.permute.xlu1 %3459  ;;  %v3186_v12 = vadd.f32 %v3184_v54, %v2963_v21  ;;  %v5946_v54 = vld [vmem:[%s9076_s7 + $0xa0] sm:$0xff] }
 0x751   : > { %v3497_v18 = vmul.f32 0.25, %v3408_v4 }
 0x753   : > { %3499 = vst [vmem:[#allocation6] sm:$0xff] %v3497_v18 }
 0x754   : > { %3257 = vmatpush.bf16.msra.mxu0 %v7967_v11  ;;  %v5933_v11 = vld [vmem:[%s9076_s7 + $0x38] sm:$0xff] }
 0x755   : > { %v3001_v63 = vpop.f32.mrf.mxu0 }
 0x756   : > { %v3458_v38 = vpop.permute.xlu0 %3457 }
 0x757   : > { %3258 = vmatmul.bf16.vlgmr.msra.gmra.mxu0 %v3188_v49  ;;  %v5947_v49 = vld [vmem:[%s9076_s7 + $0xa8] sm:$0xff] }
 0x758   : > { %3436 = vmatpush.bf16.msrb.mxu0 %v7810_v52  ;;  %v5932_v52 = vld [vmem:[%s9076_s7 + $0x30] sm:$0xff]  ;;  %v3650_v63 = vpack.c.bf16 %v5947_v49, %v5946_v54 }
 0x759   : > { %v3643_v59 = vpack.c.bf16 %v5933_v11, %v5932_v52 }
 0x75b   : > { %5581 = vmatmul.msk.bf16.gmra.mxu3 %vm1478_vm1, %v3643_v59 }
 0x75c   : > { %3437 = vmatpush.bf16.msrb.mxu0 %v7830_v47  ;;  %v3413_v47 = vpop.permute.xlu1 %3412 }
 0x760   : > { %3438 = vmatpush.bf16.msrb.mxu0 %v7838_v57  ;;  %v3410_v57 = vpack.c.bf16 %v3406_v35, %v3406_v35 }
 0x764   : > { %3439 = vmatpush.bf16.msrb.mxu0 %v7954_v51  ;;  %v5659_v51 = vld [vmem:[%s9141_s26 + $0x8] sm:$0xff]  ;;  %v3456_v61 = vpop.permute.xlu1 %3455 }
 0x765   : > { %3533 = vmatpush.bf16.msrb.mxu1 %v5659_v51 }
 0x768   : > { %3440 = vmatpush.bf16.msrb.mxu0 %v3419_v2  ;;  %v3733_v2 = vpop.f32.mrf.mxu3 }
 0x769   : > { %v3734_v27 = vadd.f32 %v8106_v45, %v3733_v2  ;;  %v5954_v2 = vld [vmem:[%s9076_s7 + $0xe0] sm:$0xff] }
 0x76b   : > { %5582 = vmatmul.msk.bf16.gmra.mxu3 %vm1478_vm1, %v3644_v56 }
 0x76c   : > { %3441 = vmatpush.bf16.msrb.mxu0 %v8038_v31  ;;  %v3454_v7 = vpop.permute.xlu1 %3453 }
 0x770   : > { %3442 = vmatpush.bf16.msrb.mxu0 %v8040_v23  ;;  %v3735_v36 = vpop.f32.mrf.mxu3 }
 0x771   : > { %v3736_v40 = vadd.f32 %v8106_v45, %v3735_v36 }
 0x773   : > { %v3816_v15 = vpack.c.bf16 %v3736_v40, %v3736_v40  ;;  %v5956_v40 = vld [vmem:[%s9076_s7 + $0xf0] sm:$0xff] }
 0x774   : > { %3443 = vmatpush.bf16.msrb.mxu0 %v3413_v47  ;;  %v3450_v44 = vpop.permute.xlu1 %3449 }
 0x775   : > { %v3867_v3 = vunpack.c.l.b16 %v3816_v15 }
 0x777   : > { %3444 = vmatmul.bf16.vlgmr.msrb.gmra.mxu0 %v3410_v57 }
 0x778   : > { %3473 = vmatpush.bf16.msra.mxu0 %v8033_v32  ;;  %v3738_v35 = vpop.f32.mrf.mxu3 }
 0x779   : > { %v3739_v43 = vadd.f32 %v8106_v45, %v3738_v35 }
 0x77b   : > { %5583 = vmatmul.msk.bf16.gmra.mxu3 %vm1478_vm1, %v3645_v5  ;;  %v3817_v33 = vpack.c.bf16 %v3739_v43, %v3739_v43 }
 0x77c   : > { %3474 = vmatpush.bf16.msra.mxu0 %v3462_v53  ;;  %v3815_v53 = vpack.c.bf16 %v3734_v27, %v3734_v27  ;;  %v5955_v27 = vld [vmem:[%s9076_s7 + $0xe8] sm:$0xff] }
 0x77d   : > { %v3868_v25 = vunpack.c.l.b16 %v3817_v33 }
 0x77e   : > { %v3866_v10 = vunpack.c.l.b16 %v3815_v53 }
 0x780   : > { %3475 = vmatpush.bf16.msra.mxu0 %v3460_v9  ;;  %v8114_v8 = vpack.c.b16 %v3867_v3, %v3866_v10  ;;  %v3740_v18 = vpop.f32.mrf.mxu3  ;;  %v5957_v10 = vld [vmem:[%s9076_s7 + $0xf8] sm:$0xff] }
 0x781   : > { %v3741_v41 = vadd.f32 %v8106_v45, %v3740_v18  ;;  %v3655_v15 = vpack.c.bf16 %v5957_v10, %v5956_v40 }
 0x783   : > { %v3403_v17 = vpop.xlane.xlu0 %3402  ;;  %v3818_v13 = vpack.c.bf16 %v3741_v41, %v3741_v41 }
 0x784   : > { %3476 = vmatpush.bf16.msra.mxu0 %v3458_v38  ;;  %5878 = vrcp.f32 %v3403_v17 }
 0x785   : > { %v3869_v52 = vunpack.c.l.b16 %v3818_v13 }
 0x787   : > { %v8122_v11 = vpack.c.b16 %v3869_v52, %v3868_v25 }
 0x788   : > { %3477 = vmatpush.bf16.msra.mxu0 %v3456_v61  ;;  %v3743_v59 = vpop.f32.mrf.mxu3  ;;  %v5948_v61 = vld [vmem:[%s9076_s7 + $0xb0] sm:$0xff] }
 0x789   : > { %v3744_v47 = vadd.f32 %v8106_v45, %v3743_v59  ;;  %v3651_v42 = vpack.c.bf16 %v5949_v28, %v5948_v61 }
 0x78a   : > { %v5879_v24 = vpop.eup %5878 }
 0x78b   : > { %v3407_v32 = vmul.f32 %v5879_v24, %v8035_v60  ;;  %5584 = vmatmul.msk.bf16.gmra.mxu3 %vm1478_vm1, %v3646_v58  ;;  %v3819_v57 = vpack.c.bf16 %v3744_v47, %v3744_v47  ;;  %v5950_v24 = vld [vmem:[%s9076_s7 + $0xc0] sm:$0xff] }
 0x78c   : > { %3478 = vmatpush.bf16.msra.mxu0 %v3454_v7 }
 0x78d   : > { %v3409_v31 = vadd.f32 %v3407_v32, %v3186_v12  ;;  %v3411_v23 = vpack.c.bf16 %v3407_v32, %v3407_v32  ;;  %v3870_v38 = vunpack.c.l.b16 %v3819_v57  ;;  %v5951_v12 = vld [vmem:[%s9076_s7 + $0xc8] sm:$0xff] }
 0x78e   : > { %v3652_v32 = vpack.c.bf16 %v5951_v12, %v5950_v24 }
 0x78f   : > { %v3498_v1 = vmul.f32 0.25, %v3409_v31 }
 0x790   : > { %3479 = vmatpush.bf16.msra.mxu0 %v3452_v6  ;;  %v3745_v51 = vpop.f32.mrf.mxu3 }
 0x791   : > { %3500 = vst [vmem:[#allocation6 + $0x8] sm:$0xff] %v3498_v1  ;;  %v3746_v56 = vadd.f32 %v8106_v45, %v3745_v51  ;;  %v5658_v1 = vld [vmem:[%s9141_s26] sm:$0xff]  ;;  %s9144_s26 = scalar_lea.vmem %s9143_s3, %s6322_s10 }
 0x792   : > { %3534 = vmatpush.bf16.msrb.mxu1 %v5658_v1 }
 0x793   : > { %v3820_v7 = vpack.c.bf16 %v3746_v56, %v3746_v56 }
 0x794   : > { %3480 = vmatpush.bf16.msra.mxu0 %v3450_v44 }
 0x795   : > { %v3871_v17 = vunpack.c.l.b16 %v3820_v7 }
 0x797   : > { %3481 = vmatmul.bf16.vlgmr.msra.gmra.mxu0 %v3411_v23  ;;  %v8129_v6 = vpack.c.b16 %v3871_v17, %v3870_v38 }
 0x79b   : > { %5585 = vmatmul.msk.bf16.gmra.mxu3 %vm1478_vm1, %v3647_v0 }
 0x7ab   : > { %5586 = vmatmul.msk.bf16.gmra.mxu3 %vm1478_vm1, %v3648_v50 }
 0x7b4   : > { %v3036_v60 = vpop.f32.mrf.mxu0 }
 0x7b5   : > { %3044 = vrot.lane.b32.xlu1 %v3036_v60, %s6122_s14  ;;  %v5952_v60 = vld [vmem:[%s9076_s7 + $0xd8] sm:$0xff] }
 0x7b6   : > { %v3653_v55 = vpack.c.bf16 %v5952_v60, %v5953_v22 }
 0x7bb   : > { %5587 = vmatmul.msk.bf16.gmra.mxu3 %vm1478_vm1, %v3649_v20 }
 0x7bc   : > { %v3038_v14 = vpop.f32.mrf.mxu0 }
 0x7c0   : > { %v3043_v16 = vpop.permute.xlu1 %3042 }
 0x7c1   : > { %3049 = vst.msk [vmem:[#allocation3] sm:$0xff] %vm3048_vm3, %v3043_v16 }
 0x7c4   : > { %v3222_v48 = vpop.f32.mrf.mxu0 }
 0x7c5   : > { %3265 = vrot.lane.b32.xlu2 %v3222_v48, %s6123_s25  ;;  %v3654_v48 = vpack.c.bf16 %v5955_v27, %v5954_v2 }
 0x7cb   : > { %5588 = vmatmul.msk.bf16.gmra.mxu3 %vm1478_vm1, %v3650_v63 }
 0x7cc   : > { %v3224_v46 = vpop.f32.mrf.mxu0 }
 0x7d4   : > { %v3259_v4 = vpop.f32.mrf.mxu0 }
 0x7d5   : > { %3267 = vrot.lane.b32.xlu1 %v3259_v4, %s6123_s25 }
 0x7db   : > { %5589 = vmatmul.msk.bf16.gmra.mxu3 %vm1478_vm1, %v3651_v42 }
 0x7dc   : > { %v3261_v9 = vpop.f32.mrf.mxu0 }
 0x7de   : > { %v3748_v62 = vpop.f32.mrf.mxu3 }
 0x7df   : > { %v3749_v5 = vadd.f32 %v8106_v45, %v3748_v62 }
 0x7e1   : > { %v3821_v44 = vpack.c.bf16 %v3749_v5, %v3749_v5 }
 0x7e3   : > { %v3872_v29 = vunpack.c.l.b16 %v3821_v44 }
 0x7e6   : > { %v3750_v21 = vpop.f32.mrf.mxu3 }
 0x7e7   : > { %v3751_v23 = vadd.f32 %v8106_v45, %v3750_v21 }
 0x7e9   : > { %v3822_v26 = vpack.c.bf16 %v3751_v23, %v3751_v23 }
 0x7eb   : > { %v3873_v58 = vunpack.c.l.b16 %v3822_v26  ;;  %5590 = vmatmul.msk.bf16.gmra.mxu3 %vm1478_vm1, %v3652_v32 }
 0x7ed   : > { %v8138_v39 = vpack.c.b16 %v3873_v58, %v3872_v29 }
 0x7ee   : > { %v3753_v37 = vpop.f32.mrf.mxu3 }
 0x7ef   : > { %v3754_v38 = vadd.f32 %v8106_v45, %v3753_v37 }
 0x7f1   : > { %v3823_v12 = vpack.c.bf16 %v3754_v38, %v3754_v38 }
 0x7f3   : > { %v3874_v58 = vunpack.c.l.b16 %v3823_v12 }
 0x7f4   : > { %v3445_v19 = vpop.f32.mrf.mxu0 }
 0x7f5   : > { %3488 = vrot.lane.b32.xlu2 %v3445_v19, %s6124_s8 }
 0x7f6   : > { %v3755_v0 = vpop.f32.mrf.mxu3 }
 0x7f7   : > { %v3756_v7 = vadd.f32 %v8106_v45, %v3755_v0 }
 0x7f9   : > { %v3824_v32 = vpack.c.bf16 %v3756_v7, %v3756_v7 }
 0x7fb   : > { %5591 = vmatmul.msk.bf16.gmra.mxu3 %vm1478_vm1, %v3653_v55  ;;  %v3875_v37 = vunpack.c.l.b16 %v3824_v32 }
 0x7fc   : > { %v3447_v31 = vpop.f32.mrf.mxu0 }
 0x7fd   : > { %v8178_v55 = vpack.c.b16 %v3875_v37, %v3874_v58 }
 0x7fe   : > { %v3758_v50 = vpop.f32.mrf.mxu3 }
 0x7ff   : > { %v3759_v13 = vadd.f32 %v8106_v45, %v3758_v50 }
 0x801   : > { %v3825_v61 = vpack.c.bf16 %v3759_v13, %v3759_v13 }
 0x803   : > { %v3876_v17 = vunpack.c.l.b16 %v3825_v61 }
 0x806   : > { %v3760_v16 = vpop.f32.mrf.mxu3 }
 0x807   : > { %v3761_v9 = vadd.f32 %v8106_v45, %v3760_v16  ;;  %v3906_v16 = vsel %vm2605_vm0, %v8178_v55, 0 }
 0x809   : > { %v3826_v28 = vpack.c.bf16 %v3761_v9, %v3761_v9 }
 0x80b   : > { %5592 = vmatmul.msk.bf16.gmra.mxu3 %vm1478_vm1, %v3654_v48  ;;  %v3877_v62 = vunpack.c.l.b16 %v3826_v28 }
 0x80d   : > { %v8171_v31 = vpack.c.b16 %v3877_v62, %v3876_v17 }
 0x80e   : > { %v3763_v30 = vpop.f32.mrf.mxu3 }
 0x80f   : > { %v3764_v35 = vadd.f32 %v8106_v45, %v3763_v30  ;;  %v3909_v60 = vsel %vm2605_vm0, %v8171_v31, 0 }
 0x811   : > { %v3827_v54 = vpack.c.bf16 %v3764_v35, %v3764_v35 }
 0x813   : > { %v3878_v52 = vunpack.c.l.b16 %v3827_v54 }
 0x814   : > { %v3482_v14 = vpop.f32.mrf.mxu0 }
 0x815   : > { %3490 = vrot.lane.b32.xlu0 %v3482_v14, %s6124_s8 }
 0x816   : > { %v3765_v20 = vpop.f32.mrf.mxu3 }
 0x817   : > { %v3766_v43 = vadd.f32 %v8106_v45, %v3765_v20 }
 0x819   : > { %v3828_v49 = vpack.c.bf16 %v3766_v43, %v3766_v43 }
 0x81b   : > { %5593 = vmatmul.msk.bf16.gmra.mxu3 %vm1478_vm1, %v3655_v15  ;;  %v3879_v59 = vunpack.c.l.b16 %v3828_v49  ;;  %v3900_v15 = vsel %vm2605_vm0, %v8129_v6, 0 }
 0x81c   : > { %v3484_v53 = vpop.f32.mrf.mxu0 }
 0x81d   : > { %v8162_v42 = vpack.c.b16 %v3879_v59, %v3878_v52 }
 0x81e   : > { %v3768_v46 = vpop.f32.mrf.mxu3 }
 0x81f   : > { %v3266_v36 = vpop.permute.xlu2 %3265  ;;  %v3769_v3 = vadd.f32 %v8106_v45, %v3768_v46  ;;  %v3912_v44 = vsel %vm2605_vm0, %v8162_v42, 0 }
 0x820   : > { %3272 = vst.msk [vmem:[#allocation3] sm:$0xff] %vm3271_vm4, %v3266_v36 }
 0x821   : > { %v3829_v4 = vpack.c.bf16 %v3769_v3, %v3769_v3 }
 0x823   : > { %v3880_v63 = vunpack.c.l.b16 %v3829_v4 }
 0x826   : > { %v3770_v33 = vpop.f32.mrf.mxu3 }
 0x827   : > { %v3045_v34 = vpop.permute.xlu1 %3044  ;;  %v3771_v18 = vadd.f32 %v8106_v45, %v3770_v33 }
 0x828   : > { %3050 = vst.msk [vmem:[#allocation3 + $0x8] sm:$0xff] %vm3048_vm3, %v3045_v34  ;;  %v3903_v34 = vsel %vm2605_vm0, %v8138_v39, 0 }
 0x829   : > { %v3830_v41 = vpack.c.bf16 %v3771_v18, %v3771_v18  ;;  %v3897_v18 = vsel %vm2605_vm0, %v8122_v11, 0 }
 0x82b   : > { %v3881_v25 = vunpack.c.l.b16 %v3830_v41  ;;  %v3894_v41 = vsel %vm2605_vm0, %v8114_v8, 0 }
 0x82d   : > { %v8158_v47 = vpack.c.b16 %v3881_v25, %v3880_v63 }
 0x82e   : > { %v3773_v57 = vpop.f32.mrf.mxu3 }
 0x82f   : > { %v3915_v51 = vsel %vm2605_vm0, %v8158_v47, 0  ;;  %v3774_v56 = vadd.f32 %v8106_v45, %v3773_v57 }
 0x830   : > { %3917 = vmatpush.bf16.xpose.msrb.mxu0 %v3915_v51 }
 0x831   : > { %v3831_v5 = vpack.c.bf16 %v3774_v56, %v3774_v56 }
 0x833   : > { %v3946_v23 = vunpack.c.l.b16 %v3831_v5 }
 0x836   : > { %v3775_v21 = vpop.f32.mrf.mxu3 }
 0x837   : > { %v3776_v24 = vadd.f32 %v8106_v45, %v3775_v21 }
 0x838   : > { %3918 = vmatpush.bf16.xpose.msrb.mxu0 %v3912_v44 }
 0x839   : > { %v3832_v1 = vpack.c.bf16 %v3776_v24, %v3776_v24 }
 0x83b   : > { %v3947_v26 = vunpack.c.l.b16 %v3832_v1 }
 0x83d   : > { %v8174_v0 = vpack.c.b16 %v3947_v26, %v3946_v23 }
 0x83e   : > { %v3778_v22 = vpop.f32.mrf.mxu3 }
 0x83f   : > { %v3779_v50 = vadd.f32 %v8106_v45, %v3778_v22 }
 0x840   : > { %3919 = vmatpush.bf16.xpose.msrb.mxu0 %v3909_v60 }
 0x841   : > { %v3833_v14 = vpack.c.bf16 %v3779_v50, %v3779_v50 }
 0x843   : > { %v3948_v48 = vunpack.c.l.b16 %v3833_v14 }
 0x846   : > { %v3780_v2 = vpop.f32.mrf.mxu3 }
 0x847   : > { %v3268_v19 = vpop.permute.xlu1 %3267  ;;  %v3781_v27 = vadd.f32 %v8106_v45, %v3780_v2 }
 0x848   : > { %3273 = vst.msk [vmem:[#allocation3 + $0x8] sm:$0xff] %vm3271_vm4, %v3268_v19  ;;  %3920 = vmatpush.bf16.xpose.msrb.mxu0 %v3906_v16 }
 0x849   : > { %v3834_v53 = vpack.c.bf16 %v3781_v27, %v3781_v27 }
 0x84b   : > { %v3949_v36 = vunpack.c.l.b16 %v3834_v53 }
 0x84d   : > { %v8184_v30 = vpack.c.b16 %v3949_v36, %v3948_v48 }
 0x84e   : > { %v3783_v20 = vpop.f32.mrf.mxu3 }
 0x84f   : > { %v3489_v29 = vpop.permute.xlu2 %3488  ;;  %v3784_v40 = vadd.f32 %v8106_v45, %v3783_v20 }
 0x850   : > { %3495 = vst.msk [vmem:[#allocation3] sm:$0xff] %vm3494_vm5, %v3489_v29  ;;  %3921 = vmatpush.bf16.xpose.msrb.mxu0 %v3903_v34 }
 0x851   : > { %v3835_v10 = vpack.c.bf16 %v3784_v40, %v3784_v40 }
 0x853   : > { %v3950_v35 = vunpack.c.l.b16 %v3835_v10 }
 0x856   : > { %v3785_v46 = vpop.f32.mrf.mxu3 }
 0x857   : > { %v3786_v3 = vadd.f32 %v8106_v45, %v3785_v46  ;;  %v3501_v19 = vld [vmem:[#allocation3] sm:$0xff] }
 0x858   : > { %3922 = vmatpush.bf16.xpose.msrb.mxu0 %v3900_v15 }
 0x859   : > { %v3836_v43 = vpack.c.bf16 %v3786_v3, %v3786_v3 }
 0x85b   : > { %v3951_v4 = vunpack.c.l.b16 %v3836_v43 }
 0x85d   : > { %v8192_v33 = vpack.c.b16 %v3951_v4, %v3950_v35 }
 0x85e   : > { %v3788_v54 = vpop.f32.mrf.mxu3 }
 0x85f   : > { %v3789_v49 = vadd.f32 %v8106_v45, %v3788_v54 }
 0x860   : > { %3923 = vmatpush.bf16.xpose.msrb.mxu0 %v3897_v18 }
 0x861   : > { %v3837_v63 = vpack.c.bf16 %v3789_v49, %v3789_v49 }
 0x863   : > { %v3952_v9 = vunpack.c.l.b16 %v3837_v63  ;;  %v3980_v63 = vsel %vm2605_vm0, %v8192_v33, 0 }
 0x866   : > { %v3790_v25 = vpop.f32.mrf.mxu3 }
 0x867   : > { %v3791_v13 = vadd.f32 %v8106_v45, %v3790_v25  ;;  %v3974_v25 = vsel %vm2605_vm0, %v8174_v0, 0 }
 0x868   : > { %3924 = vmatpush.bf16.xpose.msrb.mxu0 %v3894_v41  ;;  %v3977_v41 = vsel %vm2605_vm0, %v8184_v30, 0 }
 0x869   : > { %v3838_v52 = vpack.c.bf16 %v3791_v13, %v3791_v13  ;;  %v5768_v13 = vld [vmem:[%s9144_s26] ss:$0 sm:$0xff] }
 0x86b   : > { %v3953_v59 = vunpack.c.l.b16 %v3838_v52 }
 0x86d   : > { %v8200_v57 = vpack.c.b16 %v3953_v59, %v3952_v9  ;;  %v5958_v59 = vld [vmem:[#allocation2] sm:$0xff] }
 0x86e   : > { %v3793_v51 = vpop.f32.mrf.mxu3 }
 0x86f   : > { %v3794_v61 = vadd.f32 %v8106_v45, %v3793_v51  ;;  %v3983_v49 = vsel %vm2605_vm0, %v8200_v57, 0 }
 0x871   : > { %v3839_v56 = vpack.c.bf16 %v3794_v61, %v3794_v61 }
 0x873   : > { %v3954_v17 = vunpack.c.l.b16 %v3839_v56 }
 0x876   : > { %v3795_v38 = vpop.f32.mrf.mxu3 }
 0x877   : > { %v3796_v7 = vadd.f32 %v8106_v45, %v3795_v38  ;;  %v5959_v38 = vld [vmem:[#allocation2 + $0x8] sm:$0xff] }
 0x879   : > { %v3840_v62 = vpack.c.bf16 %v3796_v7, %v3796_v7 }
 0x87b   : > { %v3955_v21 = vunpack.c.l.b16 %v3840_v62 }
 0x87d   : > { %v8206_v24 = vpack.c.b16 %v3955_v21, %v3954_v17 }
 0x87e   : > { %v3798_v12 = vpop.f32.mrf.mxu3 }
 0x87f   : > { %v3799_v53 = vadd.f32 %v8106_v45, %v3798_v12  ;;  %v3986_v54 = vsel %vm2605_vm0, %v8206_v24, 0 }
 0x881   : > { %v3841_v15 = vpack.c.bf16 %v3799_v53, %v3799_v53 }
 0x883   : > { %v3956_v35 = vunpack.c.l.b16 %v3841_v15 }
 0x886   : > { %v3800_v32 = vpop.f32.mrf.mxu3 }
 0x887   : > { %v3491_v28 = vpop.permute.xlu0 %3490  ;;  %v3801_v36 = vadd.f32 %v8106_v45, %v3800_v32 }
 0x888   : > { %3496 = vst.msk [vmem:[#allocation3 + $0x8] sm:$0xff] %vm3494_vm5, %v3491_v28 }
 0x889   : > { %v3842_v46 = vpack.c.bf16 %v3801_v36, %v3801_v36 }
 0x88b   : > { %v3957_v43 = vunpack.c.l.b16 %v3842_v46 }
 0x88e   : > { %v3803_v23 = vpop.f32.mrf.mxu3 }
 0x88f   : > { %v3502_v5 = vld [vmem:[#allocation3 + $0x8] sm:$0xff]  ;;  %v3804_v58 = vadd.f32 %v8106_v45, %v3803_v23 }
 0x890   : > { %v3503_v44 = vpack.c.bf16 %v3502_v5, %v3501_v19  ;;  %v9145_v19 = vld [vmem:[#allocation49_spill] sm:$0xff] }
 0x891   : > { %v3843_v14 = vpack.c.bf16 %v3804_v58, %v3804_v58 }
 0x892   : > { %5560 = vmatmul.msk.bf16.vlgmr.msrb.gmra.mxu1 %vm1478_vm1, %v3503_v44 }
 0x893   : > { %v3958_v34 = vunpack.c.l.b16 %v3843_v14 }
 0x896   : > { %v3805_v1 = vpop.f32.mrf.mxu3 }
 0x897   : > { %v3806_v37 = vadd.f32 %v8106_v45, %v3805_v1 }
 0x899   : > { %v3844_v16 = vpack.c.bf16 %v3806_v37, %v3806_v37 }
 0x89b   : > { %v3959_v20 = vunpack.c.l.b16 %v3844_v16 }
 0x89d   : > { %v8218_v3 = vpack.c.b16 %v3959_v20, %v3958_v34 }
 0x89e   : > { %v3808_v29 = vpop.f32.mrf.mxu3 }
 0x89f   : > { %v3809_v26 = vadd.f32 %v8106_v45, %v3808_v29  ;;  %v3992_v4 = vsel %vm2605_vm0, %v8218_v3, 0 }
 0x8a1   : > { %v3845_v60 = vpack.c.bf16 %v3809_v26, %v3809_v26 }
 0x8a3   : > { %v3960_v2 = vunpack.c.l.b16 %v3845_v60 }
 0x8a6   : > { %v3810_v22 = vpop.f32.mrf.mxu3 }
 0x8a7   : > { %v3811_v50 = vadd.f32 %v8106_v45, %v3810_v22  ;;  %v8222_v45 = vpack.c.b16 %v3957_v43, %v3956_v35 }
 0x8a9   : > { %v3846_v27 = vpack.c.bf16 %v3811_v50, %v3811_v50  ;;  %v3989_v18 = vsel %vm2605_vm0, %v8222_v45, 0 }
 0x8ab   : > { %v3961_v48 = vunpack.c.l.b16 %v3846_v27 }
 0x8ad   : > { %v8214_v40 = vpack.c.b16 %v3961_v48, %v3960_v2 }
 0x8af   : > { %v3995_v10 = vsel %vm2605_vm0, %v8214_v40, 0 }
 0x8b0   : > { %3997 = vmatpush.bf16.xpose.msra.mxu1 %v3995_v10 }
 0x8b8   : > { %3998 = vmatpush.bf16.xpose.msra.mxu1 %v3992_v4 }
 0x8c0   : > { %3999 = vmatpush.bf16.xpose.msra.mxu1 %v3989_v18  ;;  %v5661_v18 = vld [vmem:[%s6357_s28 + $0x8] sm:$0xff] }
 0x8c1   : > { %3630 = vmatpush.bf16.msra.mxu2 %v5661_v18 }
 0x8c8   : > { %4000 = vmatpush.bf16.xpose.msra.mxu1 %v3986_v54  ;;  %v5660_v54 = vld [vmem:[%s6357_s28] sm:$0xff]  ;;  %s9146_s28 = scalar_lea.vmem %s6207_s12, %s6322_s10 }
 0x8c9   : > { %3631 = vmatpush.bf16.msra.mxu2 %v5660_v54 }
 0x8d0   : > { %4001 = vmatpush.bf16.xpose.msra.mxu1 %v3983_v49 }
 0x8d8   : > { %4002 = vmatpush.bf16.xpose.msra.mxu1 %v3980_v63 }
 0x8e0   : > { %4003 = vmatpush.bf16.xpose.msra.mxu1 %v3977_v41 }
 0x8e8   : > { %4004 = vmatpush.bf16.xpose.msra.mxu1 %v3974_v25 }
 0x90f   : > { %v3536_v9 = vpop.f32.mrf.mxu1 }
 0x910   : > { %v3537_v52 = vadd.f32 %v5768_v13, %v3536_v9 }
 0x912   : > { %v8239_v51 = vadd.f32 %v5958_v59, %v3537_v52 }
 0x914   : > { %v3545_v61 = vsel %vm1478_vm1, %v8239_v51, 0.0 }
 0x915   : > { %3546 = vadd.xlane.f32.xlu1 %v3545_v61 }
 0x917   : > { %v3538_v28 = vpop.f32.mrf.mxu1 }
 0x918   : > { %v3539_v56 = vadd.f32 %v5768_v13, %v3538_v28 }
 0x91a   : > { %v8243_v7 = vadd.f32 %v5959_v38, %v3539_v56 }
 0x91c   : > { %v3548_v17 = vsel %vm1478_vm1, %v8243_v7, 0.0 }
 0x91d   : > { %3549 = vadd.xlane.f32.xlu2 %v3548_v17 }
 0x92e   : > { %4125 = vrot.lane.b32.xlu1 %v8158_v47, %s6115_s1 }
 0x935   : > { %4123 = vrot.lane.b32.xlu2 %v8162_v42, %s6115_s1 }
 0x936   : > { %4186 = vrot.lane.b32.xlu1 %v8214_v40, %s6115_s1 }
 0x93d   : > { %4119 = vrot.lane.b32.xlu2 %v8178_v55, %s6115_s1 }
 0x93e   : > { %4184 = vrot.lane.b32.xlu1 %v8218_v3, %s6115_s1 }
 0x945   : > { %4182 = vrot.lane.b32.xlu2 %v8222_v45, %s6115_s1 }
 0x946   : > { %4350 = vrot.lane.b32.xlu1 %v8158_v47, %s6116_s0 }
 0x94e   : > { %4348 = vrot.lane.b32.xlu1 %v8162_v42, %s6116_s0 }
 0x956   : > { %4346 = vrot.lane.b32.xlu1 %v8171_v31, %s6116_s0 }
 0x95e   : > { %4176 = vrot.lane.b32.xlu1 %v8192_v33, %s6115_s1 }
 0x966   : > { %4404 = vrot.lane.b32.xlu1 %v8222_v45, %s6116_s0 }
 0x96e   : > { %4340 = vrot.lane.b32.xlu1 %v8129_v6, %s6116_s0 }
 0x976   : > { %4568 = vrot.lane.b32.xlu1 %v8171_v31, %s6117_s11 }
 0x97e   : > { %4398 = vrot.lane.b32.xlu1 %v8192_v33, %s6116_s0 }
 0x986   : > { %4626 = vrot.lane.b32.xlu1 %v8222_v45, %s6117_s11 }
 0x988   : > { %v3547_v62 = vpop.xlane.xlu1 %3546 }
 0x989   : > { %v3551_v5 = vmul.f32 %v3547_v62, %v9145_v19 }
 0x98b   : > { %v8279_v44 = vsub.f32 %v8239_v51, %v3551_v5 }
 0x98d   : > { %v3555_v21 = vmul.f32 %v8279_v44, %v8279_v44 }
 0x98e   : > { %4624 = vrot.lane.b32.xlu1 %v8206_v24, %s6117_s11 }
 0x98f   : > { %v3557_v12 = vsel %vm1478_vm1, %v3555_v21, 0.0 }
 0x990   : > { %v3550_v32 = vpop.xlane.xlu2 %3549  ;;  %3558 = vadd.xlane.f32.xlu0 %v3557_v12 }
 0x991   : > { %v3552_v23 = vmul.f32 %v3550_v32, %v9145_v19 }
 0x993   : > { %v8288_v1 = vsub.f32 %v8243_v7, %v3552_v23 }
 0x995   : > { %v3556_v29 = vmul.f32 %v8288_v1, %v8288_v1 }
 0x996   : > { %4622 = vrot.lane.b32.xlu1 %v8200_v57, %s6117_s11 }
 0x997   : > { %v3560_v26 = vsel %vm1478_vm1, %v3556_v29, 0.0 }
 0x998   : > { %3561 = vadd.xlane.f32.xlu2 %v3560_v26  ;;  %v4124_v60 = vpop.permute.xlu2 %4123 }
 0x999   : > { %v4149_v14 = vsel %vm2605_vm0, %v4124_v60, 0 }
 0x99e   : > { %4044 = vrot.lane.b32.xlu1 %v8158_v47, %s6118_s13 }
 0x9a0   : > { %v4126_v58 = vpop.permute.xlu1 %4125  ;;  %v8304_v16 = vpop.permute.xlu2 %4119 }
 0x9a1   : > { %v4152_v37 = vsel %vm2605_vm0, %v4126_v58, 0  ;;  %v4143_v18 = vsel %vm2605_vm0, %v8304_v16, 0 }
 0x9a2   : > { %4154 = vmatpush.bf16.xpose.msra.mxu0 %v4152_v37 }
 0x9a4   : > { %4121 = vrot.lane.b32.xlu0 %v8171_v31, %s6115_s1 }
 0x9a6   : > { %4038 = vrot.lane.b32.xlu1 %v8178_v55, %s6118_s13 }
 0x9a8   : > { %v4187_v22 = vpop.permute.xlu1 %4186  ;;  %v4183_v48 = vpop.permute.xlu2 %4182 }
 0x9a9   : > { %v4213_v50 = vsel %vm2605_vm0, %v4187_v22, 0  ;;  %v4207_v53 = vsel %vm2605_vm0, %v4183_v48, 0 }
 0x9aa   : > { %4155 = vmatpush.bf16.xpose.msra.mxu0 %v4149_v14  ;;  %4215 = vmatpush.bf16.xpose.msrb.mxu1 %v4213_v50 }
 0x9ac   : > { %4117 = vrot.lane.b32.xlu0 %v8138_v39, %s6115_s1 }
 0x9ae   : > { %4034 = vrot.lane.b32.xlu1 %v8129_v6, %s6118_s13 }
 0x9b0   : > { %4180 = vrot.lane.b32.xlu2 %v8206_v24, %s6115_s1  ;;  %v4185_v2 = vpop.permute.xlu1 %4184 }
 0x9b1   : > { %v4210_v27 = vsel %vm2605_vm0, %v4185_v2, 0  ;;  %v5769_v2 = vld [vmem:[%s9146_s28] ss:$0 sm:$0xff] }
 0x9b2   : > { %4216 = vmatpush.bf16.xpose.msrb.mxu1 %v4210_v27 }
 0x9b4   : > { %4115 = vrot.lane.b32.xlu0 %v8129_v6, %s6115_s1 }
 0x9b6   : > { %4079 = vrot.lane.b32.xlu1 %v8218_v3, %s6118_s13 }
 0x9b8   : > { %4178 = vrot.lane.b32.xlu2 %v8200_v57, %s6115_s1  ;;  %v8320_v36 = vpop.permute.xlu1 %4350 }
 0x9ba   : > { %4217 = vmatpush.bf16.xpose.msrb.mxu1 %v4207_v53 }
 0x9bc   : > { %4113 = vrot.lane.b32.xlu0 %v8122_v11, %s6115_s1 }
 0x9c0   : > { %4111 = vrot.lane.b32.xlu2 %v8114_v8, %s6115_s1  ;;  %v8326_v34 = vpop.permute.xlu1 %4348 }
 0x9c4   : > { %4408 = vrot.lane.b32.xlu0 %v8214_v40, %s6116_s0 }
 0x9c8   : > { %4406 = vrot.lane.b32.xlu2 %v8218_v3, %s6116_s0  ;;  %v8332_v20 = vpop.permute.xlu1 %4346 }
 0x9cc   : > { %4344 = vrot.lane.b32.xlu0 %v8178_v55, %s6116_s0 }
 0x9d0   : > { %4342 = vrot.lane.b32.xlu2 %v8138_v39, %s6116_s0  ;;  %v8338_v10 = vpop.permute.xlu1 %4176 }
 0x9d4   : > { %4174 = vrot.lane.b32.xlu0 %v8184_v30, %s6115_s1 }
 0x9d8   : > { %4172 = vrot.lane.b32.xlu2 %v8174_v0, %s6115_s1  ;;  %v8344_v15 = vpop.permute.xlu1 %4404 }
 0x9dc   : > { %4572 = vrot.lane.b32.xlu0 %v8158_v47, %s6117_s11 }
 0x9e0   : > { %4570 = vrot.lane.b32.xlu2 %v8162_v42, %s6117_s11  ;;  %v8350_v46 = vpop.permute.xlu1 %4340 }
 0x9e4   : > { %4402 = vrot.lane.b32.xlu0 %v8206_v24, %s6116_s0 }
 0x9e8   : > { %4400 = vrot.lane.b32.xlu2 %v8200_v57, %s6116_s0  ;;  %v8356_v35 = vpop.permute.xlu1 %4568 }
 0x9ec   : > { %4338 = vrot.lane.b32.xlu0 %v8122_v11, %s6116_s0 }
 0x9f0   : > { %4336 = vrot.lane.b32.xlu2 %v8114_v8, %s6116_s0  ;;  %v8362_v43 = vpop.permute.xlu1 %4398 }
 0x9f4   : > { %4630 = vrot.lane.b32.xlu0 %v8214_v40, %s6117_s11 }
 0x9f8   : > { %4628 = vrot.lane.b32.xlu2 %v8218_v3, %s6117_s11  ;;  %v8368_v4 = vpop.permute.xlu1 %4626 }
 0x9fc   : > { %4566 = vrot.lane.b32.xlu0 %v8178_v55, %s6117_s11 }
 0xa00   : > { %4564 = vrot.lane.b32.xlu2 %v8138_v39, %s6117_s11  ;;  %v8376_v49 = vpop.permute.xlu1 %4624 }
 0xa03   : > { %v3559_v63 = vpop.xlane.xlu0 %3558 }
 0xa04   : > { %v3563_v41 = vmul.f32 %v3559_v63, %v9145_v19  ;;  %4396 = vrot.lane.b32.xlu0 %v8184_v30, %s6116_s0  ;;  %v5770_v63 = vld [vmem:[%s9147_s9] ss:$0 sm:$0xff] }
 0xa06   : > { %v3565_v25 = vadd.f32 1e-05, %v3563_v41 }
 0xa08   : > { %5880 = vrsqrt.f32 %v3565_v25  ;;  %4562 = vrot.lane.b32.xlu2 %v8129_v6, %s6117_s11  ;;  %v8383_v13 = vpop.permute.xlu1 %4622  ;;  %vm3573_vm7 = vweird.f32 %v3565_v25 }
 0xa0b   : > { %v3562_v9 = vpop.xlane.xlu2 %3561 }
 0xa0c   : > { %v3564_v52 = vmul.f32 %v3562_v9, %v9145_v19  ;;  %4394 = vrot.lane.b32.xlu0 %v8174_v0, %s6116_s0 }
 0xa0e   : > { %v5881_v59 = vpop.eup %5880  ;;  %v3566_v61 = vadd.f32 1e-05, %v3564_v52 }
 0xa0f   : > { %v3568_v28 = vmul.f32 %v5881_v59, %v3565_v25  ;;  %vm3574_vm6 = vweird.f32 %v5881_v59 }
 0xa10   : > { %5882 = vrsqrt.f32 %v3566_v61  ;;  %4560 = vrot.lane.b32.xlu2 %v8122_v11, %s6117_s11  ;;  %v4045_v56 = vpop.permute.xlu1 %4044  ;;  %vm3575_vm8 = vmor %vm3573_vm7, %vm3574_vm6  ;;  %vm3583_vm10 = vweird.f32 %v3566_v61 }
 0xa11   : > { %v3569_v38 = vmul.f32 %v5881_v59, %v3568_v28  ;;  %4054 = vmatpush.bf16.msrb.mxu2 %v4045_v56 }
 0xa13   : > { %v3570_v17 = vmul.f32 0.5, %v3569_v38  ;;  %v4181_v62 = vpop.permute.xlu2 %4180 }
 0xa14   : > { %v4204_v5 = vsel %vm2605_vm0, %v4181_v62, 0  ;;  %4558 = vrot.lane.b32.xlu0 %v8114_v8, %s6117_s11 }
 0xa15   : > { %v3571_v21 = vsub.f32 1.5, %v3570_v17  ;;  %4218 = vmatpush.bf16.xpose.msrb.mxu1 %v4204_v5 }
 0xa16   : > { %v5883_v12 = vpop.eup %5882  ;;  %v4122_v32 = vpop.permute.xlu0 %4121 }
 0xa17   : > { %v3572_v23 = vmul.f32 %v5881_v59, %v3571_v21  ;;  %v3578_v29 = vmul.f32 %v5883_v12, %v3566_v61  ;;  %v4146_v26 = vsel %vm2605_vm0, %v4122_v32, 0  ;;  %vm3584_vm9 = vweird.f32 %v5883_v12 }
 0xa18   : > { %4620 = vrot.lane.b32.xlu2 %v8192_v33, %s6117_s11  ;;  %4156 = vmatpush.bf16.xpose.msra.mxu0 %v4146_v26  ;;  %vm3585_vm11 = vmor %vm3583_vm10, %vm3584_vm9 }
 0xa19   : > { %v3579_v58 = vmul.f32 %v5883_v12, %v3578_v29  ;;  %v3576_v37 = vsel %vm3575_vm8, %v5881_v59, %v3572_v23 }
 0xa1a   : > { %v3587_v27 = vmul.f32 %v3576_v37, %v8279_v44  ;;  %v4198_v44 = vsel %vm2605_vm0, %v8338_v10, 0 }
 0xa1b   : > { %v3580_v60 = vmul.f32 0.5, %v3579_v58  ;;  %v4179_v22 = vpop.permute.xlu2 %4178 }
 0xa1c   : > { %v4201_v50 = vsel %vm2605_vm0, %v4179_v22, 0  ;;  %4618 = vrot.lane.b32.xlu0 %v8184_v30, %s6117_s11  ;;  %v3592_v41 = vmul.f32 %v5769_v2, %v3587_v27 }
 0xa1d   : > { %v3581_v14 = vsub.f32 1.5, %v3580_v60  ;;  %4219 = vmatpush.bf16.xpose.msrb.mxu1 %v4201_v50 }
 0xa1e   : > { %v4118_v48 = vpop.permute.xlu0 %4117  ;;  %v3597_v16 = vadd.f32 %v5770_v63, %v3592_v41 }
 0xa1f   : > { %v3582_v53 = vmul.f32 %v5883_v12, %v3581_v14  ;;  %v4140_v28 = vsel %vm2605_vm0, %v4118_v48, 0 }
 0xa20   : > { %4616 = vrot.lane.b32.xlu2 %v8174_v0, %s6117_s11  ;;  %4157 = vmatpush.bf16.xpose.msra.mxu0 %v4143_v18 }
 0xa21   : > { %v3586_v54 = vsel %vm3585_vm11, %v5883_v12, %v3582_v53 }
 0xa22   : > { %v3588_v25 = vmul.f32 %v3586_v54, %v8288_v1 }
 0xa23   : > { %v4112_v9 = vpop.permute.xlu2 %4111 }
 0xa24   : > { %v3593_v52 = vmul.f32 %v5769_v2, %v3588_v25  ;;  %4042 = vrot.lane.b32.xlu0 %v8162_v42, %s6118_s13  ;;  %v4131_v32 = vsel %vm2605_vm0, %v4112_v9, 0 }
 0xa25   : > { %4220 = vmatpush.bf16.xpose.msrb.mxu1 %v4198_v44 }
 0xa26   : > { %v3598_v59 = vadd.f32 %v5770_v63, %v3593_v52  ;;  %v4116_v61 = vpop.permute.xlu0 %4115 }
 0xa27   : > { %v4137_v38 = vsel %vm2605_vm0, %v4116_v61, 0  ;;  %v4039_v61 = vpop.permute.xlu1 %4038 }
 0xa28   : > { %4040 = vrot.lane.b32.xlu2 %v8171_v31, %s6118_s13  ;;  %4158 = vmatpush.bf16.xpose.msra.mxu0 %v4140_v28  ;;  %v3600_v56 = vpack.c.bf16 %v3598_v59, %v3597_v16 }
 0xa2a   : > { %5569 = vmatmul.msk.bf16.vlgmr.msra.gmra.mxu2 %vm1478_vm1, %v3600_v56 }
 0xa2b   : > { %v8419_v1 = vpop.permute.xlu2 %4406 }
 0xa2c   : > { %4036 = vrot.lane.b32.xlu0 %v8138_v39, %s6118_s13 }
 0xa2e   : > { %v4114_v10 = vpop.permute.xlu0 %4113 }
 0xa2f   : > { %v4134_v5 = vsel %vm2605_vm0, %v4114_v10, 0  ;;  %v4035_v56 = vpop.permute.xlu1 %4034  ;;  %v5771_v10 = vld [vmem:[%s1390_s17] ss:$0 sm:$0xff]  ;;  %s9148_s17 = sld [smem:[#allocation14_spill]] }
 0xa30   : > { %4081 = vrot.lane.b32.xlu2 %v8214_v40, %s6118_s13  ;;  %4159 = vmatpush.bf16.xpose.msra.mxu0 %v4137_v38 }
 0xa33   : > { %v8426_v17 = vpop.permute.xlu2 %4342 }
 0xa34   : > { %4075 = vrot.lane.b32.xlu0 %v8206_v24, %s6118_s13 }
 0xa36   : > { %v8430_v62 = vpop.permute.xlu0 %4408 }
 0xa38   : > { %4073 = vrot.lane.b32.xlu2 %v8200_v57, %s6118_s13  ;;  %4160 = vmatpush.bf16.xpose.msra.mxu0 %v4134_v5 }
 0xa3b   : > { %v4173_v21 = vpop.permute.xlu2 %4172 }
 0xa3c   : > { %4256 = vrot.lane.b32.xlu0 %v8138_v39, %s6119_s29  ;;  %v4192_v60 = vsel %vm2605_vm0, %v4173_v21, 0 }
 0xa3e   : > { %v8437_v12 = vpop.permute.xlu0 %4344 }
 0xa40   : > { %4071 = vrot.lane.b32.xlu2 %v8192_v33, %s6118_s13  ;;  %4161 = vmatpush.bf16.xpose.msra.mxu0 %v4131_v32 }
 0xa43   : > { %v8442_v23 = vpop.permute.xlu2 %4570 }
 0xa46   : > { %v4175_v29 = vpop.permute.xlu0 %4174 }
 0xa47   : > { %v4195_v26 = vsel %vm2605_vm0, %v4175_v29, 0  ;;  %v4377_v29 = vsel %vm2605_vm0, %v8320_v36, 0  ;;  %v4435_v36 = vsel %vm2605_vm0, %v8430_v62, 0  ;;  %v4429_v62 = vsel %vm2605_vm0, %v8344_v15, 0 }
 0xa48   : > { %4262 = vrot.lane.b32.xlu2 %v8162_v42, %s6119_s29  ;;  %4221 = vmatpush.bf16.xpose.msrb.mxu1 %v4195_v26  ;;  %v4362_v15 = vsel %vm2605_vm0, %v8350_v46, 0 }
 0xa4b   : > { %v8447_v58 = vpop.permute.xlu2 %4400 }
 0xa4e   : > { %v8449_v37 = vpop.permute.xlu0 %4572 }
 0xa50   : > { %4069 = vrot.lane.b32.xlu2 %v8184_v30, %s6118_s13  ;;  %4222 = vmatpush.bf16.xpose.msrb.mxu1 %v4192_v60 }
 0xa53   : > { %v8454_v22 = vpop.permute.xlu2 %4336 }
 0xa54   : > { %v4356_v46 = vsel %vm2605_vm0, %v8454_v22, 0 }
 0xa56   : > { %v8456_v50 = vpop.permute.xlu0 %4402 }
 0xa58   : > { %4260 = vrot.lane.b32.xlu2 %v8171_v31, %s6119_s29 }
 0xa5b   : > { %v8460_v14 = vpop.permute.xlu2 %4628 }
 0xa5e   : > { %v8462_v2 = vpop.permute.xlu0 %4338 }
 0xa60   : > { %4258 = vrot.lane.b32.xlu2 %v8178_v55, %s6119_s29 }
 0xa63   : > { %v8468_v48 = vpop.permute.xlu2 %4564 }
 0xa66   : > { %v8466_v27 = vpop.permute.xlu0 %4630 }
 0xa68   : > { %4301 = vrot.lane.b32.xlu2 %v8214_v40, %s6119_s29 }
 0xa6b   : > { %v8476_v18 = vpop.permute.xlu2 %4562 }
 0xa6e   : > { %v8472_v53 = vpop.permute.xlu0 %4566 }
 0xa70   : > { %4295 = vrot.lane.b32.xlu2 %v8206_v24, %s6119_s29 }
 0xa73   : > { %v8482_v63 = vpop.permute.xlu2 %4560 }
 0xa76   : > { %v8478_v54 = vpop.permute.xlu0 %4396 }
 0xa78   : > { %4478 = vrot.lane.b32.xlu2 %v8138_v39, %s6120_s15 }
 0xa7b   : > { %v8488_v25 = vpop.permute.xlu2 %4620 }
 0xa7e   : > { %v8484_v41 = vpop.permute.xlu0 %4394 }
 0xa80   : > { %4476 = vrot.lane.b32.xlu2 %v8129_v6, %s6120_s15 }
 0xa83   : > { %v8496_v52 = vpop.permute.xlu2 %4616 }
 0xa86   : > { %v8490_v9 = vpop.permute.xlu0 %4558 }
 0xa88   : > { %4521 = vrot.lane.b32.xlu2 %v8218_v3, %s6120_s15 }
 0xa8b   : > { %v4041_v59 = vpop.permute.xlu2 %4040 }
 0xa8e   : > { %v8494_v44 = vpop.permute.xlu0 %4618 }
 0xa90   : > { %4474 = vrot.lane.b32.xlu2 %v8122_v11, %s6120_s15 }
 0xa96   : > { %v4043_v16 = vpop.permute.xlu0 %4042 }
 0xa97   : > { %4055 = vmatpush.bf16.msrb.mxu2 %v4043_v16 }
 0xa98   : > { %4519 = vrot.lane.b32.xlu2 %v8222_v45, %s6120_s15 }
 0xa9b   : > { %4056 = vmatpush.bf16.msrb.mxu2 %v4041_v59 }
 0xa9e   : > { %v4037_v28 = vpop.permute.xlu0 %4036 }
 0xa9f   : > { %4057 = vmatpush.bf16.msrb.mxu2 %v4039_v61 }
 0xaa0   : > { %4517 = vrot.lane.b32.xlu2 %v8206_v24, %s6120_s15 }
 0xaa3   : > { %4058 = vmatpush.bf16.msrb.mxu2 %v4037_v28 }
 0xaa7   : > { %4059 = vmatpush.bf16.msrb.mxu2 %v4035_v56  ;;  %v4374_v56 = vsel %vm2605_vm0, %v8326_v34, 0  ;;  %v4432_v34 = vsel %vm2605_vm0, %v8419_v1, 0  ;;  %v4426_v1 = vsel %vm2605_vm0, %v8456_v50, 0 }
 0xaa8   : > { %4708 = vrot.lane.b32.xlu2 %v8158_v47, %s6121_s16 }
 0xaad   : > { %v3633_v38 = vpop.f32.mrf.mxu2 }
 0xaae   : > { %v3634_v5 = vadd.f32 %v5771_v10, %v3633_v38 }
 0xab0   : > { %v3638_v21 = vmul.f32 0.35355338, %v3634_v5  ;;  %4513 = vrot.lane.b32.xlu2 %v8192_v33, %s6120_s15 }
 0xab2   : > { %v3813_v32 = vpack.c.bf16 %v3638_v21, %v3638_v21  ;;  %v4368_v21 = vsel %vm2605_vm0, %v8437_v12, 0  ;;  %v4423_v12 = vsel %vm2605_vm0, %v8447_v58, 0  ;;  %v4417_v58 = vsel %vm2605_vm0, %v8478_v54, 0 }
 0xab4   : > { %v4107_v26 = vunpack.c.l.b16 %v3813_v32  ;;  %5594 = vmatmul.msk.bf16.vlgmr.msrb.gmra.mxu0 %vm2605_vm0, %v3813_v32  ;;  %v4599_v32 = vsel %vm2605_vm0, %v8449_v37, 0 }
 0xab5   : > { %4379 = vmatpush.bf16.xpose.msrb.mxu0 %v4377_v29  ;;  %v3635_v60 = vpop.f32.mrf.mxu2  ;;  %v8609_v29 = vld [vmem:[%s9148_s17] ss:$0 sm:$0xff] }
 0xab6   : > { %v4108_v16 = vpack.c.b16 %v4107_v26, %v4107_v26  ;;  %v3636_v59 = vadd.f32 %v5771_v10, %v3635_v60  ;;  %v4371_v10 = vsel %vm2605_vm0, %v8332_v20, 0  ;;  %v4365_v20 = vsel %vm2605_vm0, %v8426_v17, 0 }
 0xab7   : > { %v4359_v17 = vsel %vm2605_vm0, %v8462_v2, 0  ;;  %v4080_v2 = vpop.permute.xlu1 %4079 }
 0xab8   : > { %v3639_v61 = vmul.f32 0.35355338, %v3636_v59  ;;  %4706 = vrot.lane.b32.xlu2 %v8162_v42, %s6121_s16  ;;  %4109 = vrot.lane.b32.xlu1 %v4108_v16, %s6115_s1  ;;  %v4596_v59 = vsel %vm2605_vm0, %v8442_v23, 0  ;;  %v4076_v23 = vpop.permute.xlu0 %4075 }
 0xaba   : > { %v3814_v28 = vpack.c.bf16 %v3639_v61, %v3639_v61 }
 0xabc   : > { %v4168_v38 = vunpack.c.l.b16 %v3814_v28  ;;  %5595 = vmatmul.msk.bf16.vlgmr.msra.gmra.mxu1 %vm2605_vm0, %v3814_v28 }
 0xabd   : > { %4380 = vmatpush.bf16.xpose.msrb.mxu0 %v4374_v56  ;;  %4437 = vmatpush.bf16.xpose.msra.mxu1 %v4435_v36 }
 0xabe   : > { %v4169_v5 = vpack.c.b16 %v4168_v38, %v4168_v38  ;;  %v4593_v38 = vsel %vm2605_vm0, %v8356_v35, 0 }
 0xac0   : > { %4704 = vrot.lane.b32.xlu2 %v8171_v31, %s6121_s16  ;;  %4392 = vrot.lane.b32.xlu0 %v4169_v5, %s6116_s0  ;;  %v8641_v35 = vpop.permute.xlu0 %4256 }
 0xac1   : > { %4334 = vrot.lane.b32.xlu1 %v4108_v16, %s6116_s0 }
 0xac5   : > { %4381 = vmatpush.bf16.xpose.msrb.mxu0 %v4371_v10  ;;  %4438 = vmatpush.bf16.xpose.msra.mxu1 %v4432_v34  ;;  %v4590_v34 = vsel %vm2605_vm0, %v8472_v53, 0  ;;  %v4654_v53 = vsel %vm2605_vm0, %v8460_v14, 0 }
 0xac8   : > { %4702 = vrot.lane.b32.xlu2 %v8178_v55, %s6121_s16  ;;  %4486 = vrot.lane.b32.xlu0 %v8158_v47, %s6120_s15 }
 0xac9   : > { %4556 = vrot.lane.b32.xlu1 %v4108_v16, %s6117_s11 }
 0xacd   : > { %4382 = vmatpush.bf16.xpose.msrb.mxu0 %v4368_v21  ;;  %4439 = vmatpush.bf16.xpose.msra.mxu1 %v4429_v62  ;;  %v4657_v21 = vsel %vm2605_vm0, %v8466_v27, 0 }
 0xad0   : > { %4291 = vrot.lane.b32.xlu0 %v8192_v33, %s6119_s29 }
 0xad1   : > { %4170 = vrot.lane.b32.xlu1 %v4169_v5, %s6115_s1 }
 0xad5   : > { %4383 = vmatpush.bf16.xpose.msrb.mxu0 %v4365_v20  ;;  %4440 = vmatpush.bf16.xpose.msra.mxu1 %v4426_v1  ;;  %v4587_v1 = vsel %vm2605_vm0, %v8468_v48, 0  ;;  %v4651_v48 = vsel %vm2605_vm0, %v8368_v4, 0 }
 0xad8   : > { %4484 = vrot.lane.b32.xlu0 %v8162_v42, %s6120_s15  ;;  %v4420_v42 = vsel %vm2605_vm0, %v8362_v43, 0  ;;  %v8576_v43 = vpop.permute.xlu2 %4081 }
 0xad9   : > { %4032 = vrot.lane.b32.xlu1 %v8122_v11, %s6118_s13 }
 0xadd   : > { %4384 = vmatpush.bf16.xpose.msrb.mxu0 %v4362_v15  ;;  %4441 = vmatpush.bf16.xpose.msra.mxu1 %v4423_v12 }
 0xae0   : > { %4289 = vrot.lane.b32.xlu0 %v8184_v30, %s6119_s29  ;;  %v8582_v22 = vpop.permute.xlu2 %4073 }
 0xae1   : > { %4077 = vrot.lane.b32.xlu1 %v8222_v45, %s6118_s13 }
 0xae5   : > { %4385 = vmatpush.bf16.xpose.msrb.mxu0 %v4359_v17  ;;  %4442 = vmatpush.bf16.xpose.msra.mxu1 %v4420_v42  ;;  %v4584_v42 = vsel %vm2605_vm0, %v8476_v18, 0  ;;  %v4578_v18 = vsel %vm2605_vm0, %v8490_v9, 0 }
 0xae8   : > { %4482 = vrot.lane.b32.xlu0 %v8171_v31, %s6120_s15  ;;  %v4414_v31 = vsel %vm2605_vm0, %v8484_v41, 0 }
 0xae9   : > { %4030 = vrot.lane.b32.xlu1 %v8114_v8, %s6118_s13 }
 0xaed   : > { %4386 = vmatpush.bf16.xpose.msrb.mxu0 %v4356_v46  ;;  %4443 = vmatpush.bf16.xpose.msra.mxu1 %v4417_v58  ;;  %v4581_v58 = vsel %vm2605_vm0, %v8482_v63, 0  ;;  %v4645_v63 = vsel %vm2605_vm0, %v8383_v13, 0 }
 0xaf0   : > { %4480 = vrot.lane.b32.xlu0 %v8178_v55, %s6120_s15 }
 0xaf1   : > { %4264 = vrot.lane.b32.xlu1 %v8158_v47, %s6119_s29  ;;  %v8588_v47 = vpop.permute.xlu2 %4071 }
 0xaf5   : > { %4444 = vmatpush.bf16.xpose.msra.mxu1 %v4414_v31 }
 0xaf8   : > { %4523 = vrot.lane.b32.xlu0 %v8214_v40, %s6120_s15 }
 0xaf9   : > { %4067 = vrot.lane.b32.xlu1 %v8174_v0, %s6118_s13  ;;  %v8593_v55 = vpop.permute.xlu2 %4262 }
 0xb00   : > { %4472 = vrot.lane.b32.xlu0 %v8114_v8, %s6120_s15 }
 0xb01   : > { %4254 = vrot.lane.b32.xlu1 %v8129_v6, %s6119_s29  ;;  %v8597_v50 = vpop.permute.xlu2 %4069 }
 0xb09   : > { %4299 = vrot.lane.b32.xlu1 %v8218_v3, %s6119_s29  ;;  %v8601_v54 = vpop.permute.xlu2 %4260 }
 0xb11   : > { %4614 = vrot.lane.b32.xlu1 %v4169_v5, %s6117_s11  ;;  %v8611_v26 = vpop.permute.xlu2 %4258 }
 0xb19   : > { %4252 = vrot.lane.b32.xlu1 %v8122_v11, %s6119_s29  ;;  %v8623_v56 = vpop.permute.xlu2 %4301 }
 0xb21   : > { %4297 = vrot.lane.b32.xlu1 %v8222_v45, %s6119_s29  ;;  %v8638_v20 = vpop.permute.xlu2 %4295 }
 0xb29   : > { %4250 = vrot.lane.b32.xlu1 %v8114_v8, %s6119_s29  ;;  %v8649_v27 = vpop.permute.xlu2 %4478 }
 0xb2a   : > { %v4110_v41 = vpop.permute.xlu1 %4109 }
 0xb2b   : > { %5596 = vmatmul.msk.bf16.vlgmr.msra.gmra.mxu0 %vm2605_vm0, %v4110_v41  ;;  %v4648_v41 = vsel %vm2605_vm0, %v8376_v49, 0 }
 0xb2c   : > { %4601 = vmatpush.bf16.xpose.msra.mxu0 %v4599_v32 }
 0xb31   : > { %4293 = vrot.lane.b32.xlu1 %v8200_v57, %s6119_s29  ;;  %v3926_v60 = vpop.f32.mrf.mxu0  ;;  %v8658_v14 = vpop.permute.xlu2 %4476 }
 0xb32   : > { %v8616_v16 = vadd.f32 %v8609_v29, %v3926_v60  ;;  %v4393_v12 = vpop.permute.xlu0 %4392 }
 0xb33   : > { %v4335_v61 = vpop.permute.xlu1 %4334 }
 0xb34   : > { %4602 = vmatpush.bf16.xpose.msra.mxu0 %v4596_v59  ;;  %4010 = vmax.xlane.f32.xlu0 %v8616_v16  ;;  %v4639_v59 = vsel %vm2605_vm0, %v8494_v44, 0 }
 0xb39   : > { %4287 = vrot.lane.b32.xlu1 %v8174_v0, %s6119_s29  ;;  %v3928_v37 = vpop.f32.mrf.mxu0  ;;  %v4006_v28 = vpop.f32.mrf.mxu1 }
 0xb3a   : > { %v8626_v36 = vadd.f32 %v8609_v29, %v4006_v28  ;;  %v8660_v46 = vpop.permute.xlu0 %4486  ;;  %v8667_v4 = vpop.permute.xlu2 %4521 }
 0xb3b   : > { %v4557_v5 = vpop.permute.xlu1 %4556  ;;  %5598 = vmatmul.msk.bf16.vlgmr.msrb.gmra.mxu0 %vm2605_vm0, %v4335_v61 }
 0xb3c   : > { %4603 = vmatpush.bf16.xpose.msra.mxu0 %v4593_v38  ;;  %4012 = vmax.xlane.f32.xlu2 %v8626_v36 }
 0xb41   : > { %4515 = vrot.lane.b32.xlu1 %v8200_v57, %s6120_s15  ;;  %v4008_v10 = vpop.f32.mrf.mxu1 }
 0xb42   : > { %v8671_v32 = vpop.permute.xlu0 %4291 }
 0xb43   : > { %v4171_v62 = vpop.permute.xlu1 %4170 }
 0xb44   : > { %5597 = vmatmul.msk.bf16.vlgmr.msrb.gmra.mxu1 %vm2605_vm0, %v4171_v62  ;;  %4604 = vmatpush.bf16.xpose.msra.mxu0 %v4590_v34 }
 0xb45   : > { %4659 = vmatpush.bf16.xpose.msrb.mxu1 %v4657_v21 }
 0xb49   : > { %4511 = vrot.lane.b32.xlu1 %v8184_v30, %s6120_s15 }
 0xb4a   : > { %v8682_v9 = vpop.permute.xlu0 %4484 }
 0xb4b   : > { %v4033_v15 = vpop.permute.xlu1 %4032 }
 0xb4c   : > { %4060 = vmatpush.bf16.msrb.mxu2 %v4033_v15  ;;  %4605 = vmatpush.bf16.xpose.msra.mxu0 %v4587_v1 }
 0xb4d   : > { %4660 = vmatpush.bf16.xpose.msrb.mxu1 %v4654_v53 }
 0xb51   : > { %4509 = vrot.lane.b32.xlu1 %v8174_v0, %s6120_s15 }
 0xb53   : > { %v4078_v17 = vpop.permute.xlu1 %4077 }
 0xb54   : > { %5599 = vmatmul.msk.bf16.vlgmr.msra.gmra.mxu1 %vm2605_vm0, %v4393_v12  ;;  %4606 = vmatpush.bf16.xpose.msra.mxu0 %v4584_v42 }
 0xb55   : > { %4661 = vmatpush.bf16.xpose.msrb.mxu1 %v4651_v48 }
 0xb5b   : > { %v4031_v31 = vpop.permute.xlu1 %4030 }
 0xb5c   : > { %4061 = vmatpush.bf16.msrb.mxu2 %v4031_v31  ;;  %4607 = vmatpush.bf16.xpose.msra.mxu0 %v4581_v58 }
 0xb5d   : > { %4662 = vmatpush.bf16.xpose.msrb.mxu1 %v4648_v41 }
 0xb60   : > { %4091 = vmatpush.bf16.msra.mxu2 %v8576_v43  ;;  %v4642_v43 = vsel %vm2605_vm0, %v8488_v25, 0  ;;  %v8693_v25 = vpop.permute.xlu0 %4289 }
 0xb63   : > { %v8673_v60 = vpop.permute.xlu1 %4264 }
 0xb64   : > { %4092 = vmatpush.bf16.msra.mxu2 %v4080_v2  ;;  %4608 = vmatpush.bf16.xpose.msra.mxu0 %v4578_v18  ;;  %v8680_v2 = vpop.permute.xlu2 %4474 }
 0xb65   : > { %4663 = vmatpush.bf16.xpose.msrb.mxu1 %v4645_v63 }
 0xb68   : > { %4093 = vmatpush.bf16.msra.mxu2 %v4078_v17  ;;  %v8701_v28 = vpop.permute.xlu0 %4482 }
 0xb6b   : > { %5600 = vmatmul.msk.bf16.vlgmr.msra.gmra.mxu0 %vm2605_vm0, %v4557_v5  ;;  %v4068_v49 = vpop.permute.xlu1 %4067 }
 0xb6c   : > { %4094 = vmatpush.bf16.msra.mxu2 %v4076_v23  ;;  %v8691_v61 = vpop.permute.xlu2 %4519 }
 0xb6d   : > { %4664 = vmatpush.bf16.xpose.msrb.mxu1 %v4642_v43 }
 0xb70   : > { %4095 = vmatpush.bf16.msra.mxu2 %v8582_v22  ;;  %v4636_v22 = vsel %vm2605_vm0, %v8496_v52, 0 }
 0xb73   : > { %v8686_v13 = vpop.permute.xlu1 %4254 }
 0xb74   : > { %4096 = vmatpush.bf16.msra.mxu2 %v8588_v47  ;;  %v8699_v47 = vpop.permute.xlu2 %4517 }
 0xb75   : > { %4665 = vmatpush.bf16.xpose.msrb.mxu1 %v4639_v59 }
 0xb78   : > { %4097 = vmatpush.bf16.msra.mxu2 %v8597_v50  ;;  %v8706_v50 = vpop.permute.xlu0 %4480 }
 0xb7b   : > { %v8695_v37 = vpop.permute.xlu1 %4299 }
 0xb7c   : > { %4098 = vmatpush.bf16.msra.mxu2 %v4068_v49  ;;  %v8704_v44 = vpop.permute.xlu2 %4708 }
 0xb7d   : > { %4666 = vmatpush.bf16.xpose.msrb.mxu1 %v4636_v22 }
 0xb80   : > { %v8710_v23 = vpop.permute.xlu0 %4523 }
 0xb83   : > { %v4615_v38 = vpop.permute.xlu1 %4614 }
 0xb84   : > { %5601 = vmatmul.msk.bf16.vlgmr.msrb.gmra.mxu1 %vm2605_vm0, %v4615_v38  ;;  %v8708_v5 = vpop.permute.xlu2 %4513 }
 0xb88   : > { %v8714_v34 = vpop.permute.xlu0 %4472 }
 0xb8b   : > { %v8725_v22 = vpop.permute.xlu1 %4252 }
 0xb8c   : > { %v8712_v10 = vpop.permute.xlu2 %4706 }
 0xb94   : > { %v8716_v62 = vpop.permute.xlu2 %4704 }
 0xb9c   : > { %v8720_v17 = vpop.permute.xlu2 %4702 }
 0xba7   : > { %v4011_v52 = vpop.xlane.xlu0 %4010 }
 0xba8   : > { %v4014_v21 = vsub.f32 %v8616_v16, %v4011_v52  ;;  %v4163_v1 = vpop.f32.mrf.mxu0 }
 0xba9   : > { %v4164_v15 = vadd.f32 %v8609_v29, %v4163_v1 }
 0xbaa   : > { %v4016_v53 = vmul.f32 1.442695, %v4014_v21 }
 0xbab   : > { %4228 = vmax.xlane.f32.xlu1 %v4164_v15 }
 0xbac   : > { %5884 = vpow2.f32 %v4016_v53 }
 0xbaf   : > { %v4013_v31 = vpop.xlane.xlu2 %4012 }
 0xbb0   : > { %v4165_v12 = vpop.f32.mrf.mxu0  ;;  %v4015_v41 = vsub.f32 %v8626_v36, %v4013_v31  ;;  %v8731_v36 = vpop.permute.xlu1 %4297 }
 0xbb2   : > { %v5885_v42 = vpop.eup %5884  ;;  %v4018_v16 = vmul.f32 1.442695, %v4015_v41 }
 0xbb3   : > { %4020 = vadd.xlane.f32.xlu2 %v5885_v42 }
 0xbb4   : > { %5886 = vpow2.f32 %v4018_v16 }
 0xbb8   : > { %v4388_v48 = vpop.f32.mrf.mxu0  ;;  %v4251_v1 = vpop.permute.xlu1 %4250 }
 0xbb9   : > { %v4389_v58 = vadd.f32 %v8609_v29, %v4388_v48 }
 0xbba   : > { %v5887_v59 = vpop.eup %5886 }
 0xbbb   : > { %4450 = vmax.xlane.f32.xlu1 %v4389_v58 }
 0xbc0   : > { %v4390_v18 = vpop.f32.mrf.mxu0  ;;  %v8743_v48 = vpop.permute.xlu1 %4293 }
 0xbc1   : > { %v4224_v63 = vpop.f32.mrf.mxu1 }
 0xbc2   : > { %v4225_v49 = vadd.f32 %v8609_v29, %v4224_v63 }
 0xbc4   : > { %4230 = vmax.xlane.f32.xlu0 %v4225_v49 }
 0xbc9   : > { %v4226_v43 = vpop.f32.mrf.mxu1 }
 0xbcc   : > { %4022 = vadd.xlane.f32.xlu0 %v5887_v59 }
 0xbd1   : > { %v4446_v38 = vpop.f32.mrf.mxu1 }
 0xbd2   : > { %v8728_v52 = vadd.f32 %v8609_v29, %v4446_v38 }
 0xbd4   : > { %4452 = vmax.xlane.f32.xlu2 %v8728_v52 }
 0xbd9   : > { %v4448_v21 = vpop.f32.mrf.mxu1 }
 0xbe0   : > { %4743 = vrot.lane.b32.xlu0 %v8218_v3, %s6121_s16  ;;  %v8747_v3 = vpop.permute.xlu1 %4287 }
 0xbe8   : > { %v4610_v53 = vpop.f32.mrf.mxu0  ;;  %4694 = vrot.lane.b32.xlu0 %v8114_v8, %s6121_s16  ;;  %v8751_v41 = vpop.permute.xlu1 %4515 }
 0xbe9   : > { %v8738_v12 = vadd.f32 %v8609_v29, %v4610_v53 }
 0xbeb   : > { %4672 = vmax.xlane.f32.xlu1 %v8738_v12 }
 0xbec   : > { %4745 = vrot.lane.b32.xlu2 %v8214_v40, %s6121_s16 }
 0xbf0   : > { %v4612_v31 = vpop.f32.mrf.mxu0  ;;  %v8757_v18 = vpop.permute.xlu1 %4511 }
 0xbf4   : > { %4698 = vrot.lane.b32.xlu2 %v8129_v6, %s6121_s16 }
 0xbf8   : > { %v8763_v6 = vpop.permute.xlu1 %4509 }
 0xbfc   : > { %4696 = vrot.lane.b32.xlu2 %v8122_v11, %s6121_s16 }
 0xc01   : > { %v4668_v8 = vpop.f32.mrf.mxu1 }
 0xc02   : > { %v8760_v16 = vadd.f32 %v8609_v29, %v4668_v8 }
 0xc04   : > { %4700 = vrot.lane.b32.xlu1 %v8138_v39, %s6121_s16  ;;  %4741 = vrot.lane.b32.xlu2 %v8222_v45, %s6121_s16 }
 0xc09   : > { %v4670_v40 = vpop.f32.mrf.mxu1 }
 0xc12   : > { %4674 = vmax.xlane.f32.xlu0 %v8760_v16 }
 0xc1e   : > { %v4229_v11 = vpop.xlane.xlu1 %4228 }
 0xc1f   : > { %v4232_v63 = vsub.f32 %v4164_v15, %v4229_v11 }
 0xc21   : > { %v4234_v43 = vmul.f32 1.442695, %v4232_v63 }
 0xc23   : > { %5888 = vpow2.f32 %v4234_v43 }
 0xc26   : > { %v4021_v38 = vpop.xlane.xlu2 %4020 }
 0xc27   : > { %5890 = vrcp.f32 %v4021_v38 }
 0xc29   : > { %v8765_v39 = vpop.eup %5888 }
 0xc2a   : > { %4238 = vadd.xlane.f32.xlu0 %v8765_v39 }
 0xc2d   : > { %v5891_v45 = vpop.eup %5890 }
 0xc2e   : > { %v8768_v21 = vmul.f32 %v5891_v45, %v5885_v42  ;;  %v4451_v53 = vpop.xlane.xlu1 %4450 }
 0xc2f   : > { %v4454_v29 = vsub.f32 %v4389_v58, %v4451_v53 }
 0xc30   : > { %v4028_v31 = vpack.c.bf16 %v8768_v21, %v8768_v21 }
 0xc31   : > { %v4456_v8 = vmul.f32 1.442695, %v4454_v29 }
 0xc32   : > { %4062 = vmatmul.bf16.vlgmr.msrb.gmra.mxu2 %v4028_v31 }
 0xc33   : > { %5892 = vpow2.f32 %v4456_v8  ;;  %4274 = vmatpush.bf16.msrb.mxu2 %v8673_v60 }
 0xc37   : > { %v4231_v15 = vpop.xlane.xlu0 %4230  ;;  %4275 = vmatpush.bf16.msrb.mxu2 %v8593_v55 }
 0xc38   : > { %v4233_v40 = vsub.f32 %v4225_v49, %v4231_v15 }
 0xc39   : > { %v8774_v11 = vpop.eup %5892 }
 0xc3a   : > { %v4236_v63 = vmul.f32 1.442695, %v4233_v40  ;;  %4460 = vadd.xlane.f32.xlu1 %v8774_v11 }
 0xc3b   : > { %4276 = vmatpush.bf16.msrb.mxu2 %v8601_v54 }
 0xc3c   : > { %5894 = vpow2.f32 %v4236_v63 }
 0xc3e   : > { %4737 = vrot.lane.b32.xlu0 %v8200_v57, %s6121_s16 }
 0xc3f   : > { %v4023_v42 = vpop.xlane.xlu0 %4022  ;;  %4277 = vmatpush.bf16.msrb.mxu2 %v8611_v26 }
 0xc40   : > { %5896 = vrcp.f32 %v4023_v42 }
 0xc42   : > { %v8781_v60 = vpop.eup %5894 }
 0xc43   : > { %4240 = vadd.xlane.f32.xlu2 %v8781_v60  ;;  %4278 = vmatpush.bf16.msrb.mxu2 %v8641_v35 }
 0xc46   : > { %v5897_v55 = vpop.eup %5896 }
 0xc47   : > { %v8785_v58 = vmul.f32 %v5897_v55, %v5887_v59  ;;  %4279 = vmatpush.bf16.msrb.mxu2 %v8686_v13  ;;  %v4453_v57 = vpop.xlane.xlu2 %4452 }
 0xc48   : > { %v4455_v26 = vsub.f32 %v8728_v52, %v4453_v57 }
 0xc49   : > { %v4029_v54 = vpack.c.bf16 %v8785_v58, %v8785_v58 }
 0xc4a   : > { %v4458_v35 = vmul.f32 1.442695, %v4455_v26 }
 0xc4b   : > { %4099 = vmatmul.bf16.vlgmr.msra.gmra.mxu2 %v4029_v54 }
 0xc4c   : > { %4280 = vmatpush.bf16.msrb.mxu2 %v8725_v22  ;;  %5898 = vpow2.f32 %v4458_v35 }
 0xc50   : > { %4281 = vmatpush.bf16.msrb.mxu2 %v4251_v1 }
 0xc54   : > { %4311 = vmatpush.bf16.msra.mxu2 %v8623_v56  ;;  %v8801_v56 = vpop.eup %5898 }
 0xc58   : > { %4312 = vmatpush.bf16.msra.mxu2 %v8695_v37 }
 0xc5b   : > { %4739 = vrot.lane.b32.xlu2 %v8206_v24, %s6121_s16  ;;  %v8809_v24 = vpop.permute.xlu0 %4743 }
 0xc5c   : > { %4313 = vmatpush.bf16.msra.mxu2 %v8731_v36  ;;  %v8822_v36 = vpop.permute.xlu2 %4745 }
 0xc5e   : > { %v4673_v13 = vpop.xlane.xlu1 %4672 }
 0xc5f   : > { %v4676_v49 = vsub.f32 %v8738_v12, %v4673_v13 }
 0xc60   : > { %4314 = vmatpush.bf16.msra.mxu2 %v8638_v20 }
 0xc61   : > { %v4678_v59 = vmul.f32 1.442695, %v4676_v49 }
 0xc63   : > { %5900 = vpow2.f32 %v4678_v59  ;;  %v8813_v20 = vpop.permute.xlu0 %4694 }
 0xc64   : > { %4315 = vmatpush.bf16.msra.mxu2 %v8743_v48 }
 0xc68   : > { %4316 = vmatpush.bf16.msra.mxu2 %v8671_v32  ;;  %4462 = vadd.xlane.f32.xlu0 %v8801_v56 }
 0xc69   : > { %v8804_v37 = vpop.eup %5900 }
 0xc6a   : > { %4682 = vadd.xlane.f32.xlu1 %v8804_v37 }
 0xc6c   : > { %4317 = vmatpush.bf16.msra.mxu2 %v8693_v25 }
 0xc70   : > { %4318 = vmatpush.bf16.msra.mxu2 %v8747_v3 }
 0xc76   : > { %v4701_v38 = vpop.permute.xlu1 %4700 }
 0xc7c   : > { %4733 = vrot.lane.b32.xlu0 %v8184_v30, %s6121_s16  ;;  %v8825_v30 = vpop.permute.xlu2 %4698 }
 0xc83   : > { %4735 = vrot.lane.b32.xlu1 %v8192_v33, %s6121_s16 }
 0xc84   : > { %4731 = vrot.lane.b32.xlu0 %v8174_v0, %s6121_s16  ;;  %v8827_v33 = vpop.permute.xlu2 %4696 }
 0xc85   : > { %v4675_v32 = vpop.xlane.xlu0 %4674 }
 0xc86   : > { %v4677_v25 = vsub.f32 %v8760_v16, %v4675_v32 }
 0xc88   : > { %v4680_v22 = vmul.f32 1.442695, %v4677_v25 }
 0xc8a   : > { %5902 = vpow2.f32 %v4680_v22 }
 0xc8c   : > { %v8831_v3 = vpop.permute.xlu2 %4741 }
 0xc90   : > { %v8820_v52 = vpop.eup %5902 }
 0xc91   : > { %4684 = vadd.xlane.f32.xlu2 %v8820_v52 }
 0xc9d   : > { %v4239_v1 = vpop.xlane.xlu0 %4238 }
 0xc9e   : > { %5904 = vrcp.f32 %v4239_v1 }
 0xca4   : > { %v5905_v12 = vpop.eup %5904 }
 0xca5   : > { %v4244_v0 = vmul.f32 %v5905_v12, %v8765_v39 }
 0xca7   : > { %v4248_v48 = vpack.c.bf16 %v4244_v0, %v4244_v0 }
 0xca9   : > { %4282 = vmatmul.bf16.vlgmr.msrb.gmra.mxu2 %v4248_v48 }
 0xcaa   : > { %4496 = vmatpush.bf16.msrb.mxu2 %v8660_v46 }
 0xcad   : > { %v4461_v53 = vpop.xlane.xlu1 %4460 }
 0xcae   : > { %4497 = vmatpush.bf16.msrb.mxu2 %v8682_v9 }
 0xcb0   : > { %v4738_v29 = vpop.permute.xlu0 %4737 }
 0xcb2   : > { %4498 = vmatpush.bf16.msrb.mxu2 %v8701_v28 }
 0xcb5   : > { %v4063_v16 = vpop.f32.mrf.mxu2 }
 0xcb6   : > { %v4241_v43 = vpop.xlane.xlu2 %4240  ;;  %4104 = vst.msk [vmem:[#allocation3] sm:$0xff] %vm2605_vm0, %v4063_v16  ;;  %4499 = vmatpush.bf16.msrb.mxu2 %v8706_v50  ;;  %v5773_v16 = vld [vmem:[%s1406_s19] ss:$0 sm:$0xff] }
 0xcb7   : > { %5906 = vrcp.f32 %v4241_v43 }
 0xcb8   : > { %5908 = vrcp.f32 %v4461_v53 }
 0xcba   : > { %4500 = vmatpush.bf16.msrb.mxu2 %v8649_v27 }
 0xcbd   : > { %v5907_v39 = vpop.eup %5906  ;;  %v4065_v45 = vpop.f32.mrf.mxu2 }
 0xcbe   : > { %v4245_v46 = vmul.f32 %v5907_v39, %v8781_v60  ;;  %4501 = vmatpush.bf16.msrb.mxu2 %v8658_v14  ;;  %v5909_v28 = vpop.eup %5908 }
 0xcbf   : > { %v4466_v50 = vmul.f32 %v5909_v28, %v8774_v11 }
 0xcc0   : > { %v4249_v9 = vpack.c.bf16 %v4245_v46, %v4245_v46 }
 0xcc1   : > { %v4470_v14 = vpack.c.bf16 %v4466_v50, %v4466_v50 }
 0xcc2   : > { %4319 = vmatmul.bf16.vlgmr.msra.gmra.mxu2 %v4249_v9 }
 0xcc3   : > { %4502 = vmatpush.bf16.msrb.mxu2 %v8680_v2 }
 0xcc7   : > { %4503 = vmatpush.bf16.msrb.mxu2 %v8714_v34 }
 0xccb   : > { %4533 = vmatpush.bf16.msra.mxu2 %v8710_v23 }
 0xcce   : > { %v4100_v27 = vpop.f32.mrf.mxu2 }
 0xccf   : > { %4534 = vmatpush.bf16.msra.mxu2 %v8667_v4  ;;  %4105 = vst.msk [vmem:[#allocation3 + $0x8] sm:$0xff] %vm2605_vm0, %v4100_v27 }
 0xcd2   : > { %4504 = vmatmul.bf16.vlgmr.msrb.gmra.mxu2 %v4470_v14 }
 0xcd3   : > { %4535 = vmatpush.bf16.msra.mxu2 %v8691_v61  ;;  %v4246_v61 = vadd.f32 %v4244_v0, %v8768_v21 }
 0xcd6   : > { %v4102_v2 = vpop.f32.mrf.mxu2 }
 0xcd7   : > { %4536 = vmatpush.bf16.msra.mxu2 %v8699_v47  ;;  %v4468_v47 = vadd.f32 %v4466_v50, %v4246_v61 }
 0xcdb   : > { %4537 = vmatpush.bf16.msra.mxu2 %v8751_v41  ;;  %v4463_v34 = vpop.xlane.xlu0 %4462 }
 0xcdc   : > { %5910 = vrcp.f32 %v4463_v34 }
 0xcdd   : > { %v4683_v23 = vpop.xlane.xlu1 %4682 }
 0xcde   : > { %5912 = vrcp.f32 %v4683_v23 }
 0xcdf   : > { %4538 = vmatpush.bf16.msra.mxu2 %v8708_v5 }
 0xce2   : > { %v5911_v4 = vpop.eup %5910 }
 0xce3   : > { %4539 = vmatpush.bf16.msra.mxu2 %v8757_v18  ;;  %v4467_v31 = vmul.f32 %v5911_v4, %v8801_v56  ;;  %v5665_v18 = vld [vmem:[%s6367_s2 + $0x8] sm:$0xff]  ;;  %v5664_v56 = vld [vmem:[%s6367_s2] sm:$0xff] }
 0xce4   : > { %v5913_v8 = vpop.eup %5912  ;;  %4814 = vmatpush.bf16.msrb.mxu3 %v5665_v18 }
 0xce5   : > { %v4688_v41 = vmul.f32 %v5913_v8, %v8804_v37  ;;  %v4471_v5 = vpack.c.bf16 %v4467_v31, %v4467_v31 }
 0xce7   : > { %4540 = vmatpush.bf16.msra.mxu2 %v8763_v6  ;;  %v4690_v15 = vadd.f32 %v4688_v41, %v4468_v47  ;;  %v4740_v6 = vpop.permute.xlu2 %4739  ;;  %v5667_v47 = vld [vmem:[%s6376_s24 + $0x8] sm:$0xff] }
 0xce8   : > { %4815 = vmatpush.bf16.msrb.mxu3 %v5664_v56  ;;  %4910 = vmatpush.bf16.msrb.mxu0 %v5667_v47 }
 0xce9   : > { %v4778_v40 = vmul.f32 0.25, %v4690_v15 }
 0xcea   : > { %4541 = vmatmul.bf16.vlgmr.msra.gmra.mxu2 %v4471_v5 }
 0xceb   : > { %4718 = vmatpush.bf16.msrb.mxu2 %v8704_v44  ;;  %4780 = vst [vmem:[#allocation8] sm:$0xff] %v4778_v40  ;;  %v4692_v44 = vpack.c.bf16 %v4688_v41, %v4688_v41  ;;  %v5666_v41 = vld [vmem:[%s6376_s24] sm:$0xff] }
 0xcec   : > { %4911 = vmatpush.bf16.msrb.mxu0 %v5666_v41 }
 0xcee   : > { %v4734_v60 = vpop.permute.xlu0 %4733 }
 0xcef   : > { %4719 = vmatpush.bf16.msrb.mxu2 %v8712_v10 }
 0xcf3   : > { %4720 = vmatpush.bf16.msrb.mxu2 %v8716_v62  ;;  %v4247_v62 = vadd.f32 %v4245_v46, %v8785_v58 }
 0xcf5   : > { %v4469_v21 = vadd.f32 %v4467_v31, %v4247_v62  ;;  %v4736_v55 = vpop.permute.xlu1 %4735 }
 0xcf6   : > { %v4732_v54 = vpop.permute.xlu0 %4731 }
 0xcf7   : > { %4721 = vmatpush.bf16.msrb.mxu2 %v8720_v17 }
 0xcfb   : > { %4722 = vmatpush.bf16.msrb.mxu2 %v4701_v38 }
 0xcff   : > { %4723 = vmatpush.bf16.msrb.mxu2 %v8825_v30 }
 0xd03   : > { %4724 = vmatpush.bf16.msrb.mxu2 %v8827_v33 }
 0xd04   : > { %v4685_v10 = vpop.xlane.xlu2 %4684 }
 0xd05   : > { %5914 = vrcp.f32 %v4685_v10 }
 0xd07   : > { %4725 = vmatpush.bf16.msrb.mxu2 %v8813_v20 }
 0xd0a   : > { %4726 = vmatmul.bf16.vlgmr.msrb.gmra.mxu2 %v4692_v44 }
 0xd0b   : > { %4755 = vmatpush.bf16.msra.mxu2 %v8822_v36  ;;  %v5915_v17 = vpop.eup %5914 }
 0xd0c   : > { %v4689_v11 = vmul.f32 %v5915_v17, %v8820_v52 }
 0xd0e   : > { %v4691_v63 = vadd.f32 %v4689_v11, %v4469_v21  ;;  %v4693_v57 = vpack.c.bf16 %v4689_v11, %v4689_v11 }
 0xd0f   : > { %4756 = vmatpush.bf16.msra.mxu2 %v8809_v24 }
 0xd10   : > { %v4779_v42 = vmul.f32 0.25, %v4691_v63 }
 0xd12   : > { %4781 = vst [vmem:[#allocation8 + $0x8] sm:$0xff] %v4779_v42 }
 0xd13   : > { %4757 = vmatpush.bf16.msra.mxu2 %v8831_v3 }
 0xd17   : > { %4758 = vmatpush.bf16.msra.mxu2 %v4740_v6 }
 0xd1b   : > { %4759 = vmatpush.bf16.msra.mxu2 %v4738_v29 }
 0xd1f   : > { %4760 = vmatpush.bf16.msra.mxu2 %v4736_v55  ;;  %v5774_v55 = vld [vmem:[%s1409_s5] ss:$0 sm:$0xff] }
 0xd23   : > { %4761 = vmatpush.bf16.msra.mxu2 %v4734_v60 }
 0xd27   : > { %4762 = vmatpush.bf16.msra.mxu2 %v4732_v54 }
 0xd2a   : > { %4763 = vmatmul.bf16.vlgmr.msra.gmra.mxu2 %v4693_v57 }
 0xd2c   : > { %v4283_v58 = vpop.f32.mrf.mxu2 }
 0xd2d   : > { %4326 = vrot.lane.b32.xlu0 %v4283_v58, %s6122_s14 }
 0xd34   : > { %v4285_v26 = vpop.f32.mrf.mxu2 }
 0xd35   : > { %v5775_v26 = vld [vmem:[%s1412_s18] ss:$0 sm:$0xff] }
 0xd45   : > { %v4320_v35 = vpop.f32.mrf.mxu2 }
 0xd46   : > { %4328 = vrot.lane.b32.xlu1 %v4320_v35, %s6122_s14 }
 0xd4d   : > { %v4322_v13 = vpop.f32.mrf.mxu2 }
 0xd55   : > { %v4505_v49 = vpop.f32.mrf.mxu2 }
 0xd56   : > { %4548 = vrot.lane.b32.xlu0 %v4505_v49, %s6123_s25 }
 0xd5d   : > { %v4507_v59 = vpop.f32.mrf.mxu2 }
 0xd6d   : > { %v4542_v37 = vpop.f32.mrf.mxu2 }
 0xd6e   : > { %4550 = vrot.lane.b32.xlu1 %v4542_v37, %s6123_s25 }
 0xd75   : > { %v4544_v24 = vpop.f32.mrf.mxu2 }
 0xd76   : > { %v5776_v24 = vld [vmem:[%s1420_s30] ss:$0 sm:$0xff]  ;;  %s9154_s30 = sld [smem:[#allocation40_spill]] }
 0xd7c   : > { %p5637_p6 = scmp.ne.s32.totalorder %s9154_s30, 1 }
 0xd8d   : > { %v4727_v20 = vpop.f32.mrf.mxu2 }
 0xd8e   : > { %4770 = vrot.lane.b32.xlu0 %v4727_v20, %s6124_s8 }
 0xd95   : > { %v4729_v32 = vpop.f32.mrf.mxu2 }
 0xd96   : > { %v5671_v32 = vld [vmem:[%s6382_s6 + $0x18] sm:$0xff] }
 0xd97   : > { %4981 = vmatpush.bf16.msra.mxu1 %v5671_v32 }
 0xd9f   : > { %v4327_v25 = vpop.permute.xlu0 %4326 }
 0xda0   : > { %4332 = vst.msk [vmem:[#allocation3] sm:$0xff] %vm3048_vm3, %v4327_v25 }
 0xdad   : > { %v4764_v22 = vpop.f32.mrf.mxu2 }
 0xdae   : > { %4772 = vrot.lane.b32.xlu2 %v4764_v22, %s6124_s8  ;;  %v5670_v22 = vld [vmem:[%s6382_s6 + $0x10] sm:$0xff] }
 0xdaf   : > { %4982 = vmatpush.bf16.msra.mxu1 %v5670_v22 }
 0xdb5   : > { %v4766_v52 = vpop.f32.mrf.mxu2 }
 0xdb8   : > { %v4329_v36 = vpop.permute.xlu1 %4328 }
 0xdb9   : > { %4333 = vst.msk [vmem:[#allocation3 + $0x8] sm:$0xff] %vm3048_vm3, %v4329_v36  ;;  %vm4973_vm3 = vcmask 523264  }
 0xdc8   : > { %v4549_v30 = vpop.permute.xlu0 %4548 }
 0xdc9   : > { %4554 = vst.msk [vmem:[#allocation3] sm:$0xff] %vm3271_vm4, %v4549_v30  ;;  %v5669_v30 = vld [vmem:[%s6382_s6 + $0x8] sm:$0xff] }
 0xdca   : > { %4983 = vmatpush.bf16.msra.mxu1 %v5669_v30 }
 0xde0   : > { %v4551_v1 = vpop.permute.xlu1 %4550 }
 0xde1   : > { %4555 = vst.msk [vmem:[#allocation3 + $0x8] sm:$0xff] %vm3271_vm4, %v4551_v1 }
 0xe00   : > { %v4771_v12 = vpop.permute.xlu0 %4770 }
 0xe01   : > { %4776 = vst.msk [vmem:[#allocation3] sm:$0xff] %vm3494_vm5, %v4771_v12 }
 0xe08   : > { %v4773_v33 = vpop.permute.xlu2 %4772  ;;  %v4782_v0 = vld [vmem:[#allocation3] sm:$0xff] }
 0xe09   : > { %4777 = vst.msk [vmem:[#allocation3 + $0x8] sm:$0xff] %vm3494_vm5, %v4773_v33 }
 0xe10   : > { %v4783_v48 = vld [vmem:[#allocation3 + $0x8] sm:$0xff] }
 0xe11   : > { %v4784_v3 = vpack.c.bf16 %v4783_v48, %v4782_v0  ;;  %v5668_v48 = vld [vmem:[%s6382_s6] sm:$0xff]  ;;  %s9157_s6 = sld [smem:[#allocation36_spill]] (!%p5637_p6) }
 0xe12   : > { %4984 = vmatpush.bf16.msra.mxu1 %v5668_v48 }
 0xe13   : > { %5610 = vmatmul.msk.bf16.vlgmr.msrb.gmra.mxu3 %vm1478_vm1, %v4784_v3 }
 0xe96   : > { %v4817_v43 = vpop.f32.mrf.mxu3 }
 0xe97   : > { %v4818_v38 = vadd.f32 %v5773_v16, %v4817_v43 }
 0xe99   : > { %v8886_v39 = vadd.f32 %v4818_v38, %v8239_v51 }
 0xe9b   : > { %v4826_v45 = vsel %vm1478_vm1, %v8886_v39, 0.0 }
 0xe9c   : > { %4827 = vadd.xlane.f32.xlu1 %v4826_v45 }
 0xe9e   : > { %v4819_v46 = vpop.f32.mrf.mxu3 }
 0xe9f   : > { %v4820_v53 = vadd.f32 %v5773_v16, %v4819_v46 }
 0xea1   : > { %v8891_v9 = vadd.f32 %v4820_v53, %v8243_v7 }
 0xea3   : > { %v4829_v28 = vsel %vm1478_vm1, %v8891_v9, 0.0 }
 0xea4   : > { %4830 = vadd.xlane.f32.xlu0 %v4829_v28 }
 0xf0f   : > { %v4828_v50 = vpop.xlane.xlu1 %4827 }
 0xf10   : > { %v4832_v27 = vmul.f32 %v4828_v50, %v9145_v19 }
 0xf12   : > { %v4834_v51 = vsub.f32 %v8886_v39, %v4832_v27 }
 0xf14   : > { %v4836_v14 = vmul.f32 %v4834_v51, %v4834_v51 }
 0xf16   : > { %v4838_v29 = vsel %vm1478_vm1, %v4836_v14, 0.0 }
 0xf17   : > { %v4831_v2 = vpop.xlane.xlu0 %4830  ;;  %4839 = vadd.xlane.f32.xlu2 %v4838_v29 }
 0xf18   : > { %v4833_v34 = vmul.f32 %v4831_v2, %v9145_v19 }
 0xf1a   : > { %v4835_v7 = vsub.f32 %v8891_v9, %v4833_v34 }
 0xf1c   : > { %v4837_v23 = vmul.f32 %v4835_v7, %v4835_v7 }
 0xf1e   : > { %v4841_v4 = vsel %vm1478_vm1, %v4837_v23, 0.0 }
 0xf1f   : > { %4842 = vadd.xlane.f32.xlu1 %v4841_v4 }
 0xf8a   : > { %v4840_v61 = vpop.xlane.xlu2 %4839 }
 0xf8b   : > { %v4844_v31 = vmul.f32 %v4840_v61, %v9145_v19 }
 0xf8d   : > { %v4846_v8 = vadd.f32 1e-05, %v4844_v31 }
 0xf8f   : > { %5916 = vrsqrt.f32 %v4846_v8  ;;  %vm4854_vm12 = vweird.f32 %v4846_v8 }
 0xf92   : > { %v4843_v5 = vpop.xlane.xlu1 %4842 }
 0xf93   : > { %v4845_v15 = vmul.f32 %v4843_v5, %v9145_v19 }
 0xf95   : > { %v5917_v40 = vpop.eup %5916  ;;  %v4847_v18 = vadd.f32 1e-05, %v4845_v15 }
 0xf96   : > { %v4849_v6 = vmul.f32 %v5917_v40, %v4846_v8  ;;  %vm4855_vm0 = vweird.f32 %v5917_v40 }
 0xf97   : > { %5918 = vrsqrt.f32 %v4847_v18  ;;  %vm4856_vm13 = vmor %vm4854_vm12, %vm4855_vm0  ;;  %vm4864_vm15 = vweird.f32 %v4847_v18 }
 0xf98   : > { %v4850_v44 = vmul.f32 %v5917_v40, %v4849_v6 }
 0xf9a   : > { %v4851_v10 = vmul.f32 0.5, %v4850_v44 }
 0xf9c   : > { %v4852_v62 = vsub.f32 1.5, %v4851_v10 }
 0xf9d   : > { %v5919_v17 = vpop.eup %5918 }
 0xf9e   : > { %v4853_v21 = vmul.f32 %v5917_v40, %v4852_v62  ;;  %v4859_v11 = vmul.f32 %v5919_v17, %v4847_v18  ;;  %vm4865_vm14 = vweird.f32 %v5919_v17 }
 0xf9f   : > { %vm4866_vm2 = vmor %vm4864_vm15, %vm4865_vm14 }
 0xfa0   : > { %v4860_v63 = vmul.f32 %v5919_v17, %v4859_v11  ;;  %v4857_v19 = vsel %vm4856_vm13, %v5917_v40, %v4853_v21 }
 0xfa1   : > { %v4868_v54 = vmul.f32 %v4857_v19, %v4834_v51 }
 0xfa2   : > { %v4861_v42 = vmul.f32 0.5, %v4860_v63 }
 0xfa3   : > { %v4873_v35 = vmul.f32 %v5774_v55, %v4868_v54 }
 0xfa4   : > { %v4862_v60 = vsub.f32 1.5, %v4861_v42 }
 0xfa5   : > { %v4878_v59 = vadd.f32 %v5775_v26, %v4873_v35 }
 0xfa6   : > { %v4863_v57 = vmul.f32 %v5919_v17, %v4862_v60 }
 0xfa8   : > { %v4867_v58 = vsel %vm4866_vm2, %v5919_v17, %v4863_v57 }
 0xfa9   : > { %v4869_v13 = vmul.f32 %v4867_v58, %v4835_v7  ;;  %v5777_v7 = vld [vmem:[%s1428_s21] ss:$0 sm:$0xff]  ;;  %s9156_s21 = sld [smem:[#allocation35_spill]] (!%p5637_p6) }
 0xfab   : > { %v4874_v49 = vmul.f32 %v5774_v55, %v4869_v13 }
 0xfad   : > { %v4879_v56 = vadd.f32 %v5775_v26, %v4874_v49 }
 0xfaf   : > { %v4880_v37 = vpack.c.bf16 %v4879_v56, %v4878_v59 }
 0xfb1   : > { %5619 = vmatmul.msk.bf16.vlgmr.msrb.gmra.mxu0 %vm1478_vm1, %v4880_v37 }
0x102e   : > { %v4913_v20 = vpop.f32.mrf.mxu0 }
0x102f   : > { %v4914_v25 = vadd.f32 %v5776_v24, %v4913_v20 }
0x1031   : > { %v4918_v52 = vmul.f32 %v4914_v25, %v4914_v25 }
0x1033   : > { %v4920_v36 = vmul.f32 %v4918_v52, %v4914_v25 }
0x1035   : > { %v4922_v1 = vmul.f32 0.044715, %v4920_v36 }
0x1036   : > { %v4915_v12 = vpop.f32.mrf.mxu0 }
0x1037   : > { %v4924_v33 = vadd.f32 %v4922_v1, %v4914_v25  ;;  %v4916_v0 = vadd.f32 %v5776_v24, %v4915_v12 }
0x1039   : > { %v4926_v3 = vmul.f32 0.7978846, %v4924_v33  ;;  %v4919_v16 = vmul.f32 %v4916_v0, %v4916_v0 }
0x103b   : > { %v4921_v43 = vmul.f32 %v4919_v16, %v4916_v0  ;;  %5920 = vtanh.f32 %v4926_v3 }
0x103d   : > { %v4923_v38 = vmul.f32 0.044715, %v4921_v43 }
0x103f   : > { %v4925_v45 = vadd.f32 %v4923_v38, %v4916_v0 }
0x1041   : > { %v4927_v46 = vmul.f32 0.7978846, %v4925_v45  ;;  %v5921_v53 = vpop.eup %5920 }
0x1042   : > { %v4930_v28 = vadd.f32 1.0, %v5921_v53 }
0x1043   : > { %5922 = vtanh.f32 %v4927_v46 }
0x1044   : > { %v4932_v27 = vmul.f32 0.5, %v4930_v28 }
0x1046   : > { %v4934_v29 = vmul.f32 %v4932_v27, %v4914_v25 }
0x1049   : > { %v5923_v50 = vpop.eup %5922 }
0x104a   : > { %v4931_v51 = vadd.f32 1.0, %v5923_v50 }
0x104c   : > { %v4933_v14 = vmul.f32 0.5, %v4931_v51 }
0x104e   : > { %v4935_v2 = vmul.f32 %v4933_v14, %v4916_v0 }
0x1050   : > { %v4936_v34 = vpack.c.bf16 %v4935_v2, %v4934_v29 }
0x1052   : > { %5636 = vmatmul.msk.bf16.vlgmr.msra.gmra.mxu1 %vm4973_vm3, %v4936_v34 }
0x10cf   : > { %v4986_v23 = vpop.f32.mrf.mxu1 }
0x10d0   : > { %v4987_v4 = vadd.f32 %v5777_v7, %v4986_v23 }
0x10d2   : > { %v4991_v61 = vadd.f32 %v4987_v4, %v8886_v39 }
0x10d4   : > { %4993 = vst.msk [vmem:[#allocation2] sm:$0xff] %vm1478_vm1, %v4991_v61 }
0x10d7   : > { %v4988_v31 = vpop.f32.mrf.mxu1 }
0x10d8   : > { %v4989_v8 = vadd.f32 %v5777_v7, %v4988_v31  ;;  %4998 = sbr.rel (%p5637_p6) target bundleno = 4594 (0x11f2), region = 148 }
0x10da   : > { %v4992_v47 = vadd.f32 %v4989_v8, %v8891_v9 }
0x10dc   : > { %4994 = vst.msk [vmem:[#allocation2 + $0x8] sm:$0xff] %vm1478_vm1, %v4992_v47 }
0x10dd   : > { %v5001_v41 = vsel %vm1478_vm1, %v4991_v61, 0.0  ;;  %v5004_v5 = vsel %vm1478_vm1, %v4992_v47, 0.0  ;;  %v9155_v40 = vld [vmem:[#allocation49_spill] sm:$0xff]  ;;  %v5960_v56 = vld [vmem:[%s9156_s21] ss:$0 sm:$0xff] }
0x10de   : > { %5002 = vadd.xlane.f32.xlu0 %v5001_v41  ;;  %v5961_v32 = vld [vmem:[%s9157_s6] ss:$0 sm:$0xff] }
0x10e6   : > { %5005 = vadd.xlane.f32.xlu0 %v5004_v5 }
0x1151   : > { %v5003_v15 = vpop.xlane.xlu0 %5002 }
0x1152   : > { %v5007_v39 = vmul.f32 %v5003_v15, %v9155_v40 }
0x1154   : > { %v5009_v18 = vsub.f32 %v4991_v61, %v5007_v39 }
0x1156   : > { %v5011_v6 = vmul.f32 %v5009_v18, %v5009_v18 }
0x1158   : > { %v5013_v44 = vsel %vm1478_vm1, %v5011_v6, 0.0 }
0x1159   : > { %5014 = vadd.xlane.f32.xlu1 %v5013_v44  ;;  %v5006_v9 = vpop.xlane.xlu0 %5005 }
0x115a   : > { %v5008_v10 = vmul.f32 %v5006_v9, %v9155_v40 }
0x115c   : > { %v5010_v62 = vsub.f32 %v4992_v47, %v5008_v10 }
0x115e   : > { %v5012_v17 = vmul.f32 %v5010_v62, %v5010_v62 }
0x1160   : > { %v5016_v21 = vsel %vm1478_vm1, %v5012_v17, 0.0 }
0x1161   : > { %5017 = vadd.xlane.f32.xlu1 %v5016_v21 }
0x11cc   : > { %v5015_v11 = vpop.xlane.xlu1 %5014 }
0x11cd   : > { %v5019_v63 = vmul.f32 %v5015_v11, %v9155_v40 }
0x11cf   : > { %v5021_v19 = vadd.f32 1e-05, %v5019_v63 }
0x11d1   : > { %5962 = vrsqrt.f32 %v5021_v19  ;;  %vm5029_vm5 = vweird.f32 %v5021_v19 }
0x11d4   : > { %v5018_v42 = vpop.xlane.xlu1 %5017 }
0x11d5   : > { %v5020_v60 = vmul.f32 %v5018_v42, %v9155_v40 }
0x11d7   : > { %v5963_v55 = vpop.eup %5962  ;;  %v5022_v54 = vadd.f32 1e-05, %v5020_v60 }
0x11d8   : > { %v5024_v57 = vmul.f32 %v5963_v55, %v5021_v19  ;;  %vm5030_vm4 = vweird.f32 %v5963_v55 }
0x11d9   : > { %5964 = vrsqrt.f32 %v5022_v54  ;;  %vm5031_vm6 = vmor %vm5029_vm5, %vm5030_vm4  ;;  %vm5039_vm8 = vweird.f32 %v5022_v54 }
0x11da   : > { %v5025_v58 = vmul.f32 %v5963_v55, %v5024_v57 }
0x11dc   : > { %v5026_v26 = vmul.f32 0.5, %v5025_v58 }
0x11de   : > { %v5027_v35 = vsub.f32 1.5, %v5026_v26 }
0x11df   : > { %v5965_v13 = vpop.eup %5964 }
0x11e0   : > { %v5028_v49 = vmul.f32 %v5963_v55, %v5027_v35  ;;  %v5034_v59 = vmul.f32 %v5965_v13, %v5022_v54  ;;  %vm5040_vm7 = vweird.f32 %v5965_v13 }
0x11e1   : > { %vm5041_vm9 = vmor %vm5039_vm8, %vm5040_vm7 }
0x11e2   : > { %v5032_v37 = vsel %vm5031_vm6, %v5963_v55, %v5028_v49  ;;  %v5035_v24 = vmul.f32 %v5965_v13, %v5034_v59 }
0x11e3   : > { %v5043_v20 = vmul.f32 %v5032_v37, %v5009_v18 }
0x11e4   : > { %v5036_v25 = vmul.f32 0.5, %v5035_v24 }
0x11e5   : > { %v5048_v22 = vmul.f32 %v5960_v56, %v5043_v20 }
0x11e6   : > { %v5037_v52 = vsub.f32 1.5, %v5036_v25 }
0x11e7   : > { %v5053_v36 = vadd.f32 %v5961_v32, %v5048_v22 }
0x11e8   : > { %v5038_v30 = vmul.f32 %v5965_v13, %v5037_v52 }
0x11e9   : > { %5055 = vst.msk [vmem:[#allocation4] sm:$0xff] %vm1478_vm1, %v5053_v36 }
0x11ea   : > { %v5042_v1 = vsel %vm5041_vm9, %v5965_v13, %v5038_v30 }
0x11eb   : > { %v5044_v12 = vmul.f32 %v5042_v1, %v5010_v62 }
0x11ed   : > { %v5049_v33 = vmul.f32 %v5960_v56, %v5044_v12 }
0x11ef   : > { %v5054_v0 = vadd.f32 %v5961_v32, %v5049_v33 }
0x11f1   : > { %5056 = vst.msk [vmem:[#allocation4 + $0x8] sm:$0xff] %vm1478_vm1, %v5054_v0 }
0x11f2 PF: > { %s9158_s10 = sld [smem:[#allocation42_spill]]  ;;  %s6125_s29 = smov [#allocation6]  }
0x11f3   : > { %s9160_s0 = sld [smem:[#allocation38_spill]]  ;;  %s5082_s15 = sshll.u32 %s6125_s29, 4  ;;  %s5083_s15 = int_to_ptr.vmem [resolvable:$true] %s5082_s15 }
0x11f8   : > { %s9159_s18 = sadd.s32 4294967295, %s9158_s10  }
0x11f9   : > { %p8941_p7 = scmp.eq.s32.totalorder %s9159_s18, 1  ;;  %s5084_s13 = sshll.u32 %s9160_s0, 4  ;;  %s5085_s13 = int_to_ptr.hbm [resolvable:$true] %s5084_s13 }
0x11fa   : > { %s5980_s16 = sshra.s32 %s5085_s13, 4  ;;  %s5986_s8 = scalar_lea.hbm %s9160_s0, 16  ;;  %s5981_s16 = int_to_ptr.hbm [resolvable:$true] %s5980_s16 }
0x11fb   : > { %s5982_s25 = scalar_lea.hbm %s5981_s16, 16  ;;  %p5987_p11 = scmp.lt.s32.totalorder %s5981_s16, %s9160_s0 }
0x11fc   : > { %p5983_p8 = scmp.ne.s32.totalorder %s5981_s16, %s5982_s25  ;;  %p5988_p12 = scmp.lt.s32.totalorder %s5986_s8, %s5982_s25 }
0x11fe   : > { %p5984_p9 = pnand %p5983_p8, %p8941_p7  ;;  %p5989_p13 = por %p5988_p12, %p5987_p11 }
0x1200   : > { %p5985_p10 = pneg %p5984_p9 }
0x1202   : > { %p5990_p0 = pnand %p5989_p13, %p5985_p10 }
0x1204   : > { %5993 = shalt.err (!%p5990_p0)
}
0x1205   : > { %s6126_s3 = smov 128   ;;  %s9162_s26 = sld [smem:[#allocation37_spill]] }
0x1206   : > { %5675 = dma.vmem_to_hbm [thread:$0]  (%p8941_p7), %s5083_s15, 256, %s5085_s13, [#allocation7], %s6126_s3, %s6126_s3, %s6122_s14  }
0x1207   : > { %s6127_s9 = smov [#allocation4]  }
0x1208   : > { %s5065_s17 = sshll.u32 %s6127_s9, 4  ;;  %s5066_s17 = int_to_ptr.vmem [resolvable:$true] %s5065_s17 }
0x120b   : > { %s5067_s28 = sshll.u32 %s9162_s26, 4  ;;  %s6014_s2 = scalar_lea.hbm %s9162_s26, 16  ;;  %s5068_s28 = int_to_ptr.hbm [resolvable:$true] %s5067_s28 }
0x120c   : > { %s6008_s1 = sshra.s32 %s5068_s28, 4  ;;  %s6009_s1 = int_to_ptr.hbm [resolvable:$true] %s6008_s1 }
0x120d   : > { %s6010_s19 = scalar_lea.hbm %s6009_s1, 16  ;;  %p6015_p4 = scmp.lt.s32.totalorder %s6009_s1, %s9162_s26 }
0x120e   : > { %p6011_p1 = scmp.ne.s32.totalorder %s6009_s1, %s6010_s19  ;;  %p6016_p5 = scmp.lt.s32.totalorder %s6014_s2, %s6010_s19 }
0x1210   : > { %p6012_p2 = pnand %p6011_p1, %p8941_p7  ;;  %p6017_p6 = por %p6016_p5, %p6015_p4 }
0x1212   : > { %p6013_p3 = pneg %p6012_p2 }
0x1214   : > { %p6018_p8 = pnand %p6017_p6, %p6013_p3 }
0x1216   : > { %6021 = shalt.err (!%p6018_p8)
}
0x1217   : > { %s9163_s24 = sld [smem:[#allocation39_spill]]  ;;  %s6128_s5 = smov [#allocation8]  }
0x1218   : > { %5673 = dma.vmem_to_hbm [thread:$0]  (%p8941_p7), %s5066_s17, 256, %s5068_s28, [#allocation5], %s6126_s3, %s6126_s3, %s6122_s14  }
0x1219   : > { %s5099_s30 = sshll.u32 %s6128_s5, 4  ;;  %s5100_s30 = int_to_ptr.vmem [resolvable:$true] %s5099_s30 }
0x121d   : > { %s5101_s21 = sshll.u32 %s9163_s24, 4  ;;  %s6042_s18 = scalar_lea.hbm %s9163_s24, 16  ;;  %s5102_s21 = int_to_ptr.hbm [resolvable:$true] %s5101_s21 }
0x121e   : > { %s6036_s6 = sshra.s32 %s5102_s21, 4  ;;  %s6037_s6 = int_to_ptr.hbm [resolvable:$true] %s6036_s6 }
0x121f   : > { %s6038_s10 = scalar_lea.hbm %s6037_s6, 16  ;;  %p6043_p12 = scmp.lt.s32.totalorder %s6037_s6, %s9163_s24 }
0x1220   : > { %p6039_p9 = scmp.ne.s32.totalorder %s6037_s6, %s6038_s10  ;;  %p6044_p13 = scmp.lt.s32.totalorder %s6042_s18, %s6038_s10 }
0x1222   : > { %p6040_p10 = pnand %p6039_p9, %p8941_p7  ;;  %p6045_p0 = por %p6044_p13, %p6043_p12 }
0x1224   : > { %p6041_p11 = pneg %p6040_p10 }
0x1226   : > { %p6046_p1 = pnand %p6045_p0, %p6041_p11 }
0x1228   : > { %6049 = shalt.err (!%p6046_p1)
}
0x1229   : > { %5677 = dma.vmem_to_hbm [thread:$0]  (%p8941_p7), %s5100_s30, 256, %s5102_s21, [#allocation7], %s6126_s3, %s6126_s3, %s6122_s14  }
0x122a   : > { %6063 = dma.done.wait (%p8941_p7), [#allocation5], 256  }
0x122b   : > { %6065 = vsyncadd (%p8941_p7), [#allocation5], 4294967040 }
0x122c   : > { %6067 = dma.done.wait (%p8941_p7), [#allocation7], 512  }
0x122d   : > { %6069 = vsyncadd (%p8941_p7), [#allocation7], 4294966784 }
0x122e PF: > { %s9164_s13 = sld [smem:[#allocation42_spill]] }
0x122f   : > { %s9165_s28 = sld [smem:[#allocation41_spill]] }
0x1230   : > { %s9166_s1 = sld [smem:[#allocation43_spill]] }
0x1234   : > { %s78_s2 = sadd.s32 1, %s9164_s13  }
0x1235   : > { %p75_p2 = scmp.ge.s32.totalorder %s78_s2, 4  }
0x1237   :  { %77 = sbr.rel (!%p75_p2) target bundleno = 75 (0x4b), region = 304 }
0x123c   :  { %5128 = vsyncpa [#allocation5], 1 }
0x123d   :  { %5130 = vsyncpa [#allocation5 + $0x1], 1 }
0x123e   :  { %5131 = vsyncpa [#allocation7], 1 }

</bundles_post_ra>
